<compile_context>
chip_gen: v5e
topology: v5e:2x2
jax: 0.10.0
libtpu: 0.0.40
codegen_flags: <defaults>
</compile_context>

<pallas_src>
import math

import jax
import jax.numpy as jnp
from jax.experimental import pallas as pl
from jax.experimental.pallas import tpu as pltpu

# ---- configuration (matches RNNEncoder(__init__) hyper-params) -------------
NUM_LAYERS = 2          # rnn_num_layers
INPUT_FEAT = 4          # input_feature_len (Hin)
SEQ_LEN = 8             # sequence_len (L)
HIDDEN = 32             # hidden_size (HID)
BIDIRECTIONAL = True    # -> rnn_directions = 2
NUM_DIRS = 2 if BIDIRECTIONAL else 1
BATCH = 2               # N


# ---------------------------------------------------------------------------
# Fused Pallas kernel: full encoder (2 layers x 2 directions) + post-processing
# ---------------------------------------------------------------------------
def encoder_kernel(x_ref,                                        # (N, L*F)
                   wih0_ref, whh0_ref, bgi0_ref, bhn0_ref,       # layer-0 packed
                   wp1_ref, wq1_ref, whh1_ref, bgi1_ref, bhn1_ref,  # layer-1 packed
                   out_ref, hid_ref,                             # (N, L*H), (N, H)
                   gi0_scr, gi1_scr, y0_scr, y1_scr):            # VMEM scratch
    L, N, H, F = SEQ_LEN, BATCH, HIDDEN, INPUT_FEAT
    H2, H4 = 2 * H, 4 * H
    f32 = jnp.float32

    # ---- in-kernel input glue: fused fwd/bwd rows [x(t) | x(L-1-t)] --------
    x = x_ref[...].astype(f32)                                   # (N, L*F)
    xcat = jnp.concatenate(
        [jnp.concatenate([x[:, t * F:(t + 1) * F],
                          x[:, (L - 1 - t) * F:(L - t) * F]], axis=-1)
         for t in range(L)], axis=0)                             # (L*N, 2F)

    # ---- hoisted layer-0 input->gate preacts, spilled to VMEM scratch ------
    gi0_scr[...] = (jnp.dot(xcat, wih0_ref[...], preferred_element_type=f32)
                    + bgi0_ref[...])                             # (L*N, 6H)

    def run_layer(gi_scr, whh, bhn, y_scr):
        """Fused fwd+bwd GRU recurrence; ONE MXU push + one sigmoid per step."""
        bhn_b = jnp.broadcast_to(bhn, (N, H2))                   # hoisted broadcast
        h = jnp.zeros((N, H2), f32)
        for t in range(L):                                       # static unroll, L=8
            gi_t = gi_scr[pl.ds(t * N, N), :]                    # (N, 6H) cheap vld
            hg = jnp.dot(h, whh, preferred_element_type=f32)     # (N, 6H) one push
            rz = jax.nn.sigmoid(gi_t[:, :H4] + hg[:, :H4])       # fused 128-lane sigmoid
            r = rz[:, :H2]
            z = rz[:, H2:]
            n = jnp.tanh(gi_t[:, H4:] + r * (hg[:, H4:] + bhn_b))
            h = (1.0 - z) * n + z * h
            y_scr[pl.ds(t * N, N), :] = h                        # off the dep chain
        return h

    run_layer(gi0_scr, whh0_ref[...], bhn0_ref[...], y0_scr)

    # ---- hoisted layer-1 preacts from layer-0 outputs -----------------------
    # Packed Wp/Wq absorb both the direction-concat of the layer-0 output and
    # the time reversal needed by the backward stream.
    y0 = y0_scr[...]                                             # (L*N, 2H)
    y0r = jnp.concatenate(
        [y0[(L - 1 - t) * N:(L - t) * N, :] for t in range(L)], axis=0)
    gi1_scr[...] = (jnp.dot(y0, wp1_ref[...], preferred_element_type=f32)
                    + jnp.dot(y0r, wq1_ref[...], preferred_element_type=f32)
                    + bgi1_ref[...])
    h1 = run_layer(gi1_scr, whh1_ref[...], bhn1_ref[...], y1_scr)

    # ---- post-processing (module semantics): sum the two directions --------
    hid_ref[...] = h1[:, :H] + h1[:, H:]                         # (N, H)
    y1 = y1_scr[...]
    # gru_out[b, t, :] = h1_fwd(t) + h1_bwd(orig time t); emitted lane-dense.
    out_ref[...] = jnp.concatenate(
        [y1[t * N:(t + 1) * N, :H] + y1[(L - 1 - t) * N:(L - t) * N, H:]
         for t in range(L)], axis=1)                             # (N, L*H) bulk store


def _encoder_pallas(x2d, pk):
    L, N, H = SEQ_LEN, BATCH, HIDDEN
    vmem = pl.BlockSpec(memory_space=pltpu.MemorySpace.VMEM)
    return pl.pallas_call(
        encoder_kernel,
        out_shape=(jax.ShapeDtypeStruct((N, L * H), jnp.float32),
                   jax.ShapeDtypeStruct((N, H), jnp.float32)),
        in_specs=[vmem] * 10,
        out_specs=(vmem, vmem),
        scratch_shapes=[
            pltpu.VMEM((L * N, 6 * H), jnp.float32),   # gi0
            pltpu.VMEM((L * N, 6 * H), jnp.float32),   # gi1
            pltpu.VMEM((L * N, 2 * H), jnp.float32),   # y0
            pltpu.VMEM((L * N, 2 * H), jnp.float32),   # y1
        ],
    )(x2d, pk['wih0'], pk['whh0'], pk['bgi0'], pk['bhn0'],
      pk['wp1'], pk['wq1'], pk['whh1'], pk['bgi1'], pk['bhn1'])


# ---------------------------------------------------------------------------
# Parameter init (torch.nn.GRU-style) and one-time packing for the kernel
# ---------------------------------------------------------------------------
def init_params(key):
    params = {}
    bound = 1.0 / math.sqrt(HIDDEN)
    for layer in range(NUM_LAYERS):
        in_size = INPUT_FEAT if layer == 0 else HIDDEN * NUM_DIRS
        for d in range(NUM_DIRS):
            key, k0, k1, k2, k3 = jax.random.split(key, 5)
            params[(layer, d)] = (
                jax.random.uniform(k0, (3 * HIDDEN, in_size), jnp.float32,
                                   -bound, bound),   # weight_ih  (3H, in)
                jax.random.uniform(k1, (3 * HIDDEN, HIDDEN), jnp.float32,
                                   -bound, bound),   # weight_hh  (3H, H)
                jax.random.uniform(k2, (3 * HIDDEN,), jnp.float32,
                                   -bound, bound),   # bias_ih    (3H,)
                jax.random.uniform(k3, (3 * HIDDEN,), jnp.float32,
                                   -bound, bound),   # bias_hh    (3H,)
            )
    return params


def _block_diag(a, b):
    """[[a, 0], [0, b]]"""
    za = jnp.zeros((a.shape[0], b.shape[1]), a.dtype)
    zb = jnp.zeros((b.shape[0], a.shape[1]), b.dtype)
    return jnp.concatenate([jnp.concatenate([a, za], axis=1),
                            jnp.concatenate([zb, b], axis=1)], axis=0)


def _anti_block(top_right, bottom_left):
    """[[0, tr], [bl, 0]]"""
    z_tl = jnp.zeros((top_right.shape[0], bottom_left.shape[1]), top_right.dtype)
    z_br = jnp.zeros((bottom_left.shape[0], top_right.shape[1]), top_right.dtype)
    return jnp.concatenate([jnp.concatenate([z_tl, top_right], axis=1),
                            jnp.concatenate([bottom_left, z_br], axis=1)], axis=0)


def pack_params(params):
    """Pre-transpose + direction-fuse + gate-lane-pack all GRU weights ONCE.

    Gate order [r, z, n]; packed matrices are (K, 6H) with per-gate 2H blocks
    each laid out [fwd | bwd], matching the fused recurrence's (N, 2H) state.
    """
    H = HIDDEN

    def gate(w, g):            # (3H, K) torch layout -> transposed gate block (K, H)
        return jnp.transpose(w[g * H:(g + 1) * H])

    def gate_b(b, g):
        return b[g * H:(g + 1) * H]

    # ---- layer 0: fused per-step input is [x(t) | x(L-1-t)]  (width 2F) ----
    wif, whf, bif, bhf = params[(0, 0)]
    wib, whb, bib, bhb = params[(0, 1)]
    wih0, whh0, bgi0 = [], [], []
    for g in range(3):
        wih0.append(_block_diag(gate(wif, g), gate(wib, g)))       # (2F, 2H)
        whh0.append(_block_diag(gate(whf, g), gate(whb, g)))       # (2H, 2H)
        if g < 2:   # r, z: fold bias_ih + bias_hh into the hoisted preactivation
            bgi0.append(jnp.concatenate([gate_b(bif, g) + gate_b(bhf, g),
                                         gate_b(bib, g) + gate_b(bhb, g)]))
        else:       # n: only bias_ih folds; bias_hh must stay inside r * (.)
            bgi0.append(jnp.concatenate([gate_b(bif, g), gate_b(bib, g)]))
    bhn0 = jnp.concatenate([gate_b(bhf, 2), gate_b(bhb, 2)])[None, :]

    # ---- layer 1: consumes P = y0[step t] and Q = y0[step L-1-t] -----------
    wif1, whf1, bif1, bhf1 = params[(1, 0)]
    wib1, whb1, bib1, bhb1 = params[(1, 1)]
    wp1, wq1, whh1, bgi1 = [], [], [], []
    for g in range(3):
        WfT = gate(wif1, g)        # (2H, H): rows [0:H] act on h0_fwd, [H:] on h0_bwd
        WbT = gate(wib1, g)        # (2H, H)
        wp1.append(_block_diag(WfT[:H], WbT[H:]))                  # applied to P
        wq1.append(_anti_block(WbT[:H], WfT[H:]))                  # applied to Q
        whh1.append(_block_diag(gate(whf1, g), gate(whb1, g)))
        if g < 2:
            bgi1.append(jnp.concatenate([gate_b(bif1, g) + gate_b(bhf1, g),
                                         gate_b(bib1, g) + gate_b(bhb1, g)]))
        else:
            bgi1.append(jnp.concatenate([gate_b(bif1, g), gate_b(bib1, g)]))
    bhn1 = jnp.concatenate([gate_b(bhf1, 2), gate_b(bhb1, 2)])[None, :]

    cat_lanes = lambda xs: jnp.concatenate(xs, axis=1)   # gate-pack along lanes
    return dict(
        wih0=cat_lanes(wih0), whh0=cat_lanes(whh0),
        bgi0=jnp.concatenate(bgi0)[None, :], bhn0=bhn0,
        wp1=cat_lanes(wp1), wq1=cat_lanes(wq1), whh1=cat_lanes(whh1),
        bgi1=jnp.concatenate(bgi1)[None, :], bhn1=bhn1,
    )


# ---------------------------------------------------------------------------
# RNNEncoder.forward equivalent (single fused kernel; wrapper glue = bitcasts)
# ---------------------------------------------------------------------------
@jax.jit
def rnn_encoder_forward(input_seq, packed):
    """input_seq: (N, L, Hin) batch_first, like the PyTorch module."""
    assert input_seq.ndim == 3, 'dims(input) no es 3, batch first!!!'
    N, L, F = input_seq.shape

    x2d = input_seq.reshape(N, L * F)                     # free bitcast reshape
    out2d, hidden = _encoder_pallas(x2d, packed)          # (N, L*H), (N, H)
    gru_out = out2d.reshape(N, L, HIDDEN)                 # free bitcast reshape
    return gru_out, hidden


# ---------------------------------------------------------------------------
# Pure-JAX reference (lax.scan GRU) for correctness checking
# ---------------------------------------------------------------------------
def _ref_gru_layer(x_tm, w_ih, w_hh, b_ih, b_hh):
    H = w_hh.shape[1]

    def cell(h, x_t):
        gi = x_t @ w_ih.T + b_ih
        gh = h @ w_hh.T + b_hh
        r = jax.nn.sigmoid(gi[:, :H] + gh[:, :H])
        z = jax.nn.sigmoid(gi[:, H:2 * H] + gh[:, H:2 * H])
        n = jnp.tanh(gi[:, 2 * H:] + r * gh[:, 2 * H:])
        h_new = (1.0 - z) * n + z * h
        return h_new, h_new

    h0 = jnp.zeros((x_tm.shape[1], H), jnp.float32)
    hN, ys = jax.lax.scan(cell, h0, x_tm)
    return ys, hN


def _ref_forward(input_seq, params):
    N = input_seq.shape[0]
    layer_in = jnp.transpose(input_seq, (1, 0, 2)).astype(jnp.float32)
    hiddens = []
    for layer in range(NUM_LAYERS):
        outs = []
        for d in range(NUM_DIRS):
            w_ih, w_hh, b_ih, b_hh = params[(layer, d)]
            x_dir = layer_in if d == 0 else jnp.flip(layer_in, axis=0)
            y, hN = _ref_gru_layer(x_dir, w_ih, w_hh, b_ih, b_hh)
            if d == 1:
                y = jnp.flip(y, axis=0)
            outs.append(y)
            hiddens.append(hN)
        layer_in = jnp.concatenate(outs, axis=-1)
    gru_out = jnp.transpose(layer_in, (1, 0, 2))
    hidden_stack = jnp.stack(hiddens, axis=0)
    if NUM_DIRS > 1:
        gru_out = gru_out.reshape(N, SEQ_LEN, NUM_DIRS, HIDDEN).sum(axis=2)
    hidden = hidden_stack.reshape(NUM_LAYERS, NUM_DIRS, N, HIDDEN)[-1].sum(axis=0)
    return gru_out, hidden


if __name__ == "__main__":
    key = jax.random.PRNGKey(0)
    key, pkey, xkey = jax.random.split(key, 3)

    params = init_params(pkey)
    packed = pack_params(params)          # one-time weight packing / transpose
    input_seq = jax.random.normal(xkey, (BATCH, SEQ_LEN, INPUT_FEAT),
                                  dtype=jnp.float32)   # (N, L, Hin), batch_first

    gru_out, hidden = rnn_encoder_forward(input_seq, packed)
    jax.block_until_ready((gru_out, hidden))

    assert gru_out.shape == (BATCH, SEQ_LEN, HIDDEN)
    assert hidden.shape == (BATCH, HIDDEN)

    ref_out, ref_hidden = _ref_forward(input_seq, params)
    assert jnp.allclose(gru_out, ref_out, atol=1e-4, rtol=1e-4), \
        float(jnp.max(jnp.abs(gru_out - ref_out)))
    assert jnp.allclose(hidden, ref_hidden, atol=1e-4, rtol=1e-4), \
        float(jnp.max(jnp.abs(hidden - ref_hidden)))

    print("KERNEL_OK")
</pallas_src>

<mosaic_0001>
module attributes {stable_mosaic.version = 11 : i64} {
  func.func @encoder_kernel(%arg0: memref<2x32xf32, #tpu.memory_space<vmem>>, %arg1: memref<8x192xf32, #tpu.memory_space<vmem>>, %arg2: memref<64x192xf32, #tpu.memory_space<vmem>>, %arg3: memref<1x192xf32, #tpu.memory_space<vmem>>, %arg4: memref<1x64xf32, #tpu.memory_space<vmem>>, %arg5: memref<64x192xf32, #tpu.memory_space<vmem>>, %arg6: memref<64x192xf32, #tpu.memory_space<vmem>>, %arg7: memref<64x192xf32, #tpu.memory_space<vmem>>, %arg8: memref<1x192xf32, #tpu.memory_space<vmem>>, %arg9: memref<1x64xf32, #tpu.memory_space<vmem>>, %arg10: memref<2x256xf32, #tpu.memory_space<vmem>>, %arg11: memref<2x32xf32, #tpu.memory_space<vmem>>, %arg12: memref<16x192xf32, #tpu.memory_space<vmem>>, %arg13: memref<16x192xf32, #tpu.memory_space<vmem>>, %arg14: memref<16x64xf32, #tpu.memory_space<vmem>>, %arg15: memref<16x64xf32, #tpu.memory_space<vmem>>) attributes {dimension_semantics = [], scalar_prefetch = 0 : i64, scratch_operands = 4 : i64, tpu.core_type = #tpu.core_type<tc>} {
    %c0 = arith.constant 0 : index
    %c0_0 = arith.constant 0 : index
    %0 = vector.load %arg0[%c0, %c0_0] : memref<2x32xf32, #tpu.memory_space<vmem>>, vector<2x32xf32>
    %1 = vector.extract_strided_slice %0 {offsets = [0, 0], sizes = [2, 4], strides = [1, 1]} : vector<2x32xf32> to vector<2x4xf32>
    %2 = vector.extract_strided_slice %0 {offsets = [0, 28], sizes = [2, 4], strides = [1, 1]} : vector<2x32xf32> to vector<2x4xf32>
    %3 = tpu.concatenate %1, %2 in 1 : vector<2x4xf32>, vector<2x4xf32> -> vector<2x8xf32>
    %4 = vector.extract_strided_slice %0 {offsets = [0, 4], sizes = [2, 4], strides = [1, 1]} : vector<2x32xf32> to vector<2x4xf32>
    %5 = vector.extract_strided_slice %0 {offsets = [0, 24], sizes = [2, 4], strides = [1, 1]} : vector<2x32xf32> to vector<2x4xf32>
    %6 = tpu.concatenate %4, %5 in 1 : vector<2x4xf32>, vector<2x4xf32> -> vector<2x8xf32>
    %7 = vector.extract_strided_slice %0 {offsets = [0, 8], sizes = [2, 4], strides = [1, 1]} : vector<2x32xf32> to vector<2x4xf32>
    %8 = vector.extract_strided_slice %0 {offsets = [0, 20], sizes = [2, 4], strides = [1, 1]} : vector<2x32xf32> to vector<2x4xf32>
    %9 = tpu.concatenate %7, %8 in 1 : vector<2x4xf32>, vector<2x4xf32> -> vector<2x8xf32>
    %10 = vector.extract_strided_slice %0 {offsets = [0, 12], sizes = [2, 4], strides = [1, 1]} : vector<2x32xf32> to vector<2x4xf32>
    %11 = vector.extract_strided_slice %0 {offsets = [0, 16], sizes = [2, 4], strides = [1, 1]} : vector<2x32xf32> to vector<2x4xf32>
    %12 = tpu.concatenate %10, %11 in 1 : vector<2x4xf32>, vector<2x4xf32> -> vector<2x8xf32>
    %13 = vector.extract_strided_slice %0 {offsets = [0, 16], sizes = [2, 4], strides = [1, 1]} : vector<2x32xf32> to vector<2x4xf32>
    %14 = vector.extract_strided_slice %0 {offsets = [0, 12], sizes = [2, 4], strides = [1, 1]} : vector<2x32xf32> to vector<2x4xf32>
    %15 = tpu.concatenate %13, %14 in 1 : vector<2x4xf32>, vector<2x4xf32> -> vector<2x8xf32>
    %16 = vector.extract_strided_slice %0 {offsets = [0, 20], sizes = [2, 4], strides = [1, 1]} : vector<2x32xf32> to vector<2x4xf32>
    %17 = vector.extract_strided_slice %0 {offsets = [0, 8], sizes = [2, 4], strides = [1, 1]} : vector<2x32xf32> to vector<2x4xf32>
    %18 = tpu.concatenate %16, %17 in 1 : vector<2x4xf32>, vector<2x4xf32> -> vector<2x8xf32>
    %19 = vector.extract_strided_slice %0 {offsets = [0, 24], sizes = [2, 4], strides = [1, 1]} : vector<2x32xf32> to vector<2x4xf32>
    %20 = vector.extract_strided_slice %0 {offsets = [0, 4], sizes = [2, 4], strides = [1, 1]} : vector<2x32xf32> to vector<2x4xf32>
    %21 = tpu.concatenate %19, %20 in 1 : vector<2x4xf32>, vector<2x4xf32> -> vector<2x8xf32>
    %22 = vector.extract_strided_slice %0 {offsets = [0, 28], sizes = [2, 4], strides = [1, 1]} : vector<2x32xf32> to vector<2x4xf32>
    %23 = vector.extract_strided_slice %0 {offsets = [0, 0], sizes = [2, 4], strides = [1, 1]} : vector<2x32xf32> to vector<2x4xf32>
    %24 = tpu.concatenate %22, %23 in 1 : vector<2x4xf32>, vector<2x4xf32> -> vector<2x8xf32>
    %25 = tpu.concatenate %3, %6, %9, %12, %15, %18, %21, %24 in 0 : vector<2x8xf32>, vector<2x8xf32>, vector<2x8xf32>, vector<2x8xf32>, vector<2x8xf32>, vector<2x8xf32>, vector<2x8xf32>, vector<2x8xf32> -> vector<16x8xf32>
    %c0_1 = arith.constant 0 : index
    %c0_2 = arith.constant 0 : index
    %26 = vector.load %arg1[%c0_1, %c0_2] : memref<8x192xf32, #tpu.memory_space<vmem>>, vector<8x192xf32>
    %cst = arith.constant dense<0.000000e+00> : vector<16x192xf32>
    %27 = tpu.matmul %25, %26, %cst {dimension_numbers = #tpu.dot_dimension_numbers<[1], [0], [0], [1], [0, 0, 1, 1], [], []>} : vector<16x8xf32>, vector<8x192xf32>, vector<16x192xf32> -> vector<16x192xf32>
    %c0_3 = arith.constant 0 : index
    %c0_4 = arith.constant 0 : index
    %28 = vector.load %arg3[%c0_3, %c0_4] : memref<1x192xf32, #tpu.memory_space<vmem>>, vector<1x192xf32>
    %29 = vector.broadcast %28 : vector<1x192xf32> to vector<16x192xf32>
    %30 = arith.addf %27, %29 : vector<16x192xf32>
    %c0_5 = arith.constant 0 : index
    %c0_6 = arith.constant 0 : index
    %31 = vector.load %arg12[%c0_5, %c0_6] : memref<16x192xf32, #tpu.memory_space<vmem>>, vector<16x192xf32>
    tpu.vector_store %arg12[%c0_5, %c0_6], %30 {strides = array<i32>} : memref<16x192xf32, #tpu.memory_space<vmem>>, vector<16x192xf32>,
    %c0_7 = arith.constant 0 : index
    %c0_8 = arith.constant 0 : index
    %32 = vector.load %arg2[%c0_7, %c0_8] : memref<64x192xf32, #tpu.memory_space<vmem>>, vector<64x192xf32>
    %c0_9 = arith.constant 0 : index
    %c0_10 = arith.constant 0 : index
    %33 = vector.load %arg4[%c0_9, %c0_10] : memref<1x64xf32, #tpu.memory_space<vmem>>, vector<1x64xf32>
    %34 = vector.shape_cast %33 : vector<1x64xf32> to vector<1x64xf32>
    %35 = vector.broadcast %34 : vector<1x64xf32> to vector<2x64xf32>
    %cst_11 = arith.constant 0.000000e+00 : f32
    %36 = vector.broadcast %cst_11 : f32 to vector<2x64xf32>
    %c0_12 = arith.constant 0 : index
    %c0_13 = arith.constant 0 : index
    %37 = vector.load %arg12[%c0_12, %c0_13] : memref<16x192xf32, #tpu.memory_space<vmem>>, vector<2x192xf32>
    %cst_14 = arith.constant dense<0.000000e+00> : vector<2x192xf32>
    %38 = tpu.matmul %36, %32, %cst_14 {dimension_numbers = #tpu.dot_dimension_numbers<[1], [0], [0], [1], [0, 0, 1, 1], [], []>} : vector<2x64xf32>, vector<64x192xf32>, vector<2x192xf32> -> vector<2x192xf32>
    %39 = vector.extract_strided_slice %37 {offsets = [0, 0], sizes = [2, 128], strides = [1, 1]} : vector<2x192xf32> to vector<2x128xf32>
    %40 = vector.extract_strided_slice %38 {offsets = [0, 0], sizes = [2, 128], strides = [1, 1]} : vector<2x192xf32> to vector<2x128xf32>
    %41 = arith.addf %39, %40 : vector<2x128xf32>
    %42 = arith.negf %41 : vector<2x128xf32>
    %43 = math.exp %42 : vector<2x128xf32>
    %cst_15 = arith.constant 1.000000e+00 : f32
    %44 = vector.broadcast %cst_15 : f32 to vector<2x128xf32>
    %45 = arith.addf %44, %43 : vector<2x128xf32>
    %46 = arith.divf %44, %45 : vector<2x128xf32>
    %47 = vector.extract_strided_slice %46 {offsets = [0, 0], sizes = [2, 64], strides = [1, 1]} : vector<2x128xf32> to vector<2x64xf32>
    %48 = vector.extract_strided_slice %46 {offsets = [0, 64], sizes = [2, 64], strides = [1, 1]} : vector<2x128xf32> to vector<2x64xf32>
    %49 = vector.extract_strided_slice %37 {offsets = [0, 128], sizes = [2, 64], strides = [1, 1]} : vector<2x192xf32> to vector<2x64xf32>
    %50 = vector.extract_strided_slice %38 {offsets = [0, 128], sizes = [2, 64], strides = [1, 1]} : vector<2x192xf32> to vector<2x64xf32>
    %51 = arith.addf %50, %35 : vector<2x64xf32>
    %52 = arith.mulf %47, %51 : vector<2x64xf32>
    %53 = arith.addf %49, %52 : vector<2x64xf32>
    %54 = math.tanh %53 : vector<2x64xf32>
    %cst_16 = arith.constant 1.000000e+00 : f32
    %55 = vector.broadcast %cst_16 : f32 to vector<2x64xf32>
    %56 = arith.subf %55, %48 : vector<2x64xf32>
    %57 = arith.mulf %56, %54 : vector<2x64xf32>
    %58 = arith.mulf %48, %36 : vector<2x64xf32>
    %59 = arith.addf %57, %58 : vector<2x64xf32>
    %c0_17 = arith.constant 0 : index
    %c0_18 = arith.constant 0 : index
    %60 = vector.load %arg14[%c0_17, %c0_18] : memref<16x64xf32, #tpu.memory_space<vmem>>, vector<2x64xf32>
    tpu.vector_store %arg14[%c0_17, %c0_18], %59 {strides = array<i32>} : memref<16x64xf32, #tpu.memory_space<vmem>>, vector<2x64xf32>,
    %c2 = arith.constant 2 : index
    %c0_19 = arith.constant 0 : index
    %61 = vector.load %arg12[%c2, %c0_19] : memref<16x192xf32, #tpu.memory_space<vmem>>, vector<2x192xf32>
    %cst_20 = arith.constant dense<0.000000e+00> : vector<2x192xf32>
    %62 = tpu.matmul %59, %32, %cst_20 {dimension_numbers = #tpu.dot_dimension_numbers<[1], [0], [0], [1], [0, 0, 1, 1], [], []>} : vector<2x64xf32>, vector<64x192xf32>, vector<2x192xf32> -> vector<2x192xf32>
    %63 = vector.extract_strided_slice %61 {offsets = [0, 0], sizes = [2, 128], strides = [1, 1]} : vector<2x192xf32> to vector<2x128xf32>
    %64 = vector.extract_strided_slice %62 {offsets = [0, 0], sizes = [2, 128], strides = [1, 1]} : vector<2x192xf32> to vector<2x128xf32>
    %65 = arith.addf %63, %64 : vector<2x128xf32>
    %66 = arith.negf %65 : vector<2x128xf32>
    %67 = math.exp %66 : vector<2x128xf32>
    %cst_21 = arith.constant 1.000000e+00 : f32
    %68 = vector.broadcast %cst_21 : f32 to vector<2x128xf32>
    %69 = arith.addf %68, %67 : vector<2x128xf32>
    %70 = arith.divf %68, %69 : vector<2x128xf32>
    %71 = vector.extract_strided_slice %70 {offsets = [0, 0], sizes = [2, 64], strides = [1, 1]} : vector<2x128xf32> to vector<2x64xf32>
    %72 = vector.extract_strided_slice %70 {offsets = [0, 64], sizes = [2, 64], strides = [1, 1]} : vector<2x128xf32> to vector<2x64xf32>
    %73 = vector.extract_strided_slice %61 {offsets = [0, 128], sizes = [2, 64], strides = [1, 1]} : vector<2x192xf32> to vector<2x64xf32>
    %74 = vector.extract_strided_slice %62 {offsets = [0, 128], sizes = [2, 64], strides = [1, 1]} : vector<2x192xf32> to vector<2x64xf32>
    %75 = arith.addf %74, %35 : vector<2x64xf32>
    %76 = arith.mulf %71, %75 : vector<2x64xf32>
    %77 = arith.addf %73, %76 : vector<2x64xf32>
    %78 = math.tanh %77 : vector<2x64xf32>
    %cst_22 = arith.constant 1.000000e+00 : f32
    %79 = vector.broadcast %cst_22 : f32 to vector<2x64xf32>
    %80 = arith.subf %79, %72 : vector<2x64xf32>
    %81 = arith.mulf %80, %78 : vector<2x64xf32>
    %82 = arith.mulf %72, %59 : vector<2x64xf32>
    %83 = arith.addf %81, %82 : vector<2x64xf32>
    %c2_23 = arith.constant 2 : index
    %c0_24 = arith.constant 0 : index
    %84 = vector.load %arg14[%c2_23, %c0_24] : memref<16x64xf32, #tpu.memory_space<vmem>>, vector<2x64xf32>
    tpu.vector_store %arg14[%c2_23, %c0_24], %83 {strides = array<i32>} : memref<16x64xf32, #tpu.memory_space<vmem>>, vector<2x64xf32>,
    %c4 = arith.constant 4 : index
    %c0_25 = arith.constant 0 : index
    %85 = vector.load %arg12[%c4, %c0_25] : memref<16x192xf32, #tpu.memory_space<vmem>>, vector<2x192xf32>
    %cst_26 = arith.constant dense<0.000000e+00> : vector<2x192xf32>
    %86 = tpu.matmul %83, %32, %cst_26 {dimension_numbers = #tpu.dot_dimension_numbers<[1], [0], [0], [1], [0, 0, 1, 1], [], []>} : vector<2x64xf32>, vector<64x192xf32>, vector<2x192xf32> -> vector<2x192xf32>
    %87 = vector.extract_strided_slice %85 {offsets = [0, 0], sizes = [2, 128], strides = [1, 1]} : vector<2x192xf32> to vector<2x128xf32>
    %88 = vector.extract_strided_slice %86 {offsets = [0, 0], sizes = [2, 128], strides = [1, 1]} : vector<2x192xf32> to vector<2x128xf32>
    %89 = arith.addf %87, %88 : vector<2x128xf32>
    %90 = arith.negf %89 : vector<2x128xf32>
    %91 = math.exp %90 : vector<2x128xf32>
    %cst_27 = arith.constant 1.000000e+00 : f32
    %92 = vector.broadcast %cst_27 : f32 to vector<2x128xf32>
    %93 = arith.addf %92, %91 : vector<2x128xf32>
    %94 = arith.divf %92, %93 : vector<2x128xf32>
    %95 = vector.extract_strided_slice %94 {offsets = [0, 0], sizes = [2, 64], strides = [1, 1]} : vector<2x128xf32> to vector<2x64xf32>
    %96 = vector.extract_strided_slice %94 {offsets = [0, 64], sizes = [2, 64], strides = [1, 1]} : vector<2x128xf32> to vector<2x64xf32>
    %97 = vector.extract_strided_slice %85 {offsets = [0, 128], sizes = [2, 64], strides = [1, 1]} : vector<2x192xf32> to vector<2x64xf32>
    %98 = vector.extract_strided_slice %86 {offsets = [0, 128], sizes = [2, 64], strides = [1, 1]} : vector<2x192xf32> to vector<2x64xf32>
    %99 = arith.addf %98, %35 : vector<2x64xf32>
    %100 = arith.mulf %95, %99 : vector<2x64xf32>
    %101 = arith.addf %97, %100 : vector<2x64xf32>
    %102 = math.tanh %101 : vector<2x64xf32>
    %cst_28 = arith.constant 1.000000e+00 : f32
    %103 = vector.broadcast %cst_28 : f32 to vector<2x64xf32>
    %104 = arith.subf %103, %96 : vector<2x64xf32>
    %105 = arith.mulf %104, %102 : vector<2x64xf32>
    %106 = arith.mulf %96, %83 : vector<2x64xf32>
    %107 = arith.addf %105, %106 : vector<2x64xf32>
    %c4_29 = arith.constant 4 : index
    %c0_30 = arith.constant 0 : index
    %108 = vector.load %arg14[%c4_29, %c0_30] : memref<16x64xf32, #tpu.memory_space<vmem>>, vector<2x64xf32>
    tpu.vector_store %arg14[%c4_29, %c0_30], %107 {strides = array<i32>} : memref<16x64xf32, #tpu.memory_space<vmem>>, vector<2x64xf32>,
    %c6 = arith.constant 6 : index
    %c0_31 = arith.constant 0 : index
    %109 = vector.load %arg12[%c6, %c0_31] : memref<16x192xf32, #tpu.memory_space<vmem>>, vector<2x192xf32>
    %cst_32 = arith.constant dense<0.000000e+00> : vector<2x192xf32>
    %110 = tpu.matmul %107, %32, %cst_32 {dimension_numbers = #tpu.dot_dimension_numbers<[1], [0], [0], [1], [0, 0, 1, 1], [], []>} : vector<2x64xf32>, vector<64x192xf32>, vector<2x192xf32> -> vector<2x192xf32>
    %111 = vector.extract_strided_slice %109 {offsets = [0, 0], sizes = [2, 128], strides = [1, 1]} : vector<2x192xf32> to vector<2x128xf32>
    %112 = vector.extract_strided_slice %110 {offsets = [0, 0], sizes = [2, 128], strides = [1, 1]} : vector<2x192xf32> to vector<2x128xf32>
    %113 = arith.addf %111, %112 : vector<2x128xf32>
    %114 = arith.negf %113 : vector<2x128xf32>
    %115 = math.exp %114 : vector<2x128xf32>
    %cst_33 = arith.constant 1.000000e+00 : f32
    %116 = vector.broadcast %cst_33 : f32 to vector<2x128xf32>
    %117 = arith.addf %116, %115 : vector<2x128xf32>
    %118 = arith.divf %116, %117 : vector<2x128xf32>
    %119 = vector.extract_strided_slice %118 {offsets = [0, 0], sizes = [2, 64], strides = [1, 1]} : vector<2x128xf32> to vector<2x64xf32>
    %120 = vector.extract_strided_slice %118 {offsets = [0, 64], sizes = [2, 64], strides = [1, 1]} : vector<2x128xf32> to vector<2x64xf32>
    %121 = vector.extract_strided_slice %109 {offsets = [0, 128], sizes = [2, 64], strides = [1, 1]} : vector<2x192xf32> to vector<2x64xf32>
    %122 = vector.extract_strided_slice %110 {offsets = [0, 128], sizes = [2, 64], strides = [1, 1]} : vector<2x192xf32> to vector<2x64xf32>
    %123 = arith.addf %122, %35 : vector<2x64xf32>
    %124 = arith.mulf %119, %123 : vector<2x64xf32>
    %125 = arith.addf %121, %124 : vector<2x64xf32>
    %126 = math.tanh %125 : vector<2x64xf32>
    %cst_34 = arith.constant 1.000000e+00 : f32
    %127 = vector.broadcast %cst_34 : f32 to vector<2x64xf32>
    %128 = arith.subf %127, %120 : vector<2x64xf32>
    %129 = arith.mulf %128, %126 : vector<2x64xf32>
    %130 = arith.mulf %120, %107 : vector<2x64xf32>
    %131 = arith.addf %129, %130 : vector<2x64xf32>
    %c6_35 = arith.constant 6 : index
    %c0_36 = arith.constant 0 : index
    %132 = vector.load %arg14[%c6_35, %c0_36] : memref<16x64xf32, #tpu.memory_space<vmem>>, vector<2x64xf32>
    tpu.vector_store %arg14[%c6_35, %c0_36], %131 {strides = array<i32>} : memref<16x64xf32, #tpu.memory_space<vmem>>, vector<2x64xf32>,
    %c8 = arith.constant 8 : index
    %c0_37 = arith.constant 0 : index
    %133 = vector.load %arg12[%c8, %c0_37] : memref<16x192xf32, #tpu.memory_space<vmem>>, vector<2x192xf32>
    %cst_38 = arith.constant dense<0.000000e+00> : vector<2x192xf32>
    %134 = tpu.matmul %131, %32, %cst_38 {dimension_numbers = #tpu.dot_dimension_numbers<[1], [0], [0], [1], [0, 0, 1, 1], [], []>} : vector<2x64xf32>, vector<64x192xf32>, vector<2x192xf32> -> vector<2x192xf32>
    %135 = vector.extract_strided_slice %133 {offsets = [0, 0], sizes = [2, 128], strides = [1, 1]} : vector<2x192xf32> to vector<2x128xf32>
    %136 = vector.extract_strided_slice %134 {offsets = [0, 0], sizes = [2, 128], strides = [1, 1]} : vector<2x192xf32> to vector<2x128xf32>
    %137 = arith.addf %135, %136 : vector<2x128xf32>
    %138 = arith.negf %137 : vector<2x128xf32>
    %139 = math.exp %138 : vector<2x128xf32>
    %cst_39 = arith.constant 1.000000e+00 : f32
    %140 = vector.broadcast %cst_39 : f32 to vector<2x128xf32>
    %141 = arith.addf %140, %139 : vector<2x128xf32>
    %142 = arith.divf %140, %141 : vector<2x128xf32>
    %143 = vector.extract_strided_slice %142 {offsets = [0, 0], sizes = [2, 64], strides = [1, 1]} : vector<2x128xf32> to vector<2x64xf32>
    %144 = vector.extract_strided_slice %142 {offsets = [0, 64], sizes = [2, 64], strides = [1, 1]} : vector<2x128xf32> to vector<2x64xf32>
    %145 = vector.extract_strided_slice %133 {offsets = [0, 128], sizes = [2, 64], strides = [1, 1]} : vector<2x192xf32> to vector<2x64xf32>
    %146 = vector.extract_strided_slice %134 {offsets = [0, 128], sizes = [2, 64], strides = [1, 1]} : vector<2x192xf32> to vector<2x64xf32>
    %147 = arith.addf %146, %35 : vector<2x64xf32>
    %148 = arith.mulf %143, %147 : vector<2x64xf32>
    %149 = arith.addf %145, %148 : vector<2x64xf32>
    %150 = math.tanh %149 : vector<2x64xf32>
    %cst_40 = arith.constant 1.000000e+00 : f32
    %151 = vector.broadcast %cst_40 : f32 to vector<2x64xf32>
    %152 = arith.subf %151, %144 : vector<2x64xf32>
    %153 = arith.mulf %152, %150 : vector<2x64xf32>
    %154 = arith.mulf %144, %131 : vector<2x64xf32>
    %155 = arith.addf %153, %154 : vector<2x64xf32>
    %c8_41 = arith.constant 8 : index
    %c0_42 = arith.constant 0 : index
    %156 = vector.load %arg14[%c8_41, %c0_42] : memref<16x64xf32, #tpu.memory_space<vmem>>, vector<2x64xf32>
    tpu.vector_store %arg14[%c8_41, %c0_42], %155 {strides = array<i32>} : memref<16x64xf32, #tpu.memory_space<vmem>>, vector<2x64xf32>,
    %c10 = arith.constant 10 : index
    %c0_43 = arith.constant 0 : index
    %157 = vector.load %arg12[%c10, %c0_43] : memref<16x192xf32, #tpu.memory_space<vmem>>, vector<2x192xf32>
    %cst_44 = arith.constant dense<0.000000e+00> : vector<2x192xf32>
    %158 = tpu.matmul %155, %32, %cst_44 {dimension_numbers = #tpu.dot_dimension_numbers<[1], [0], [0], [1], [0, 0, 1, 1], [], []>} : vector<2x64xf32>, vector<64x192xf32>, vector<2x192xf32> -> vector<2x192xf32>
    %159 = vector.extract_strided_slice %157 {offsets = [0, 0], sizes = [2, 128], strides = [1, 1]} : vector<2x192xf32> to vector<2x128xf32>
    %160 = vector.extract_strided_slice %158 {offsets = [0, 0], sizes = [2, 128], strides = [1, 1]} : vector<2x192xf32> to vector<2x128xf32>
    %161 = arith.addf %159, %160 : vector<2x128xf32>
    %162 = arith.negf %161 : vector<2x128xf32>
    %163 = math.exp %162 : vector<2x128xf32>
    %cst_45 = arith.constant 1.000000e+00 : f32
    %164 = vector.broadcast %cst_45 : f32 to vector<2x128xf32>
    %165 = arith.addf %164, %163 : vector<2x128xf32>
    %166 = arith.divf %164, %165 : vector<2x128xf32>
    %167 = vector.extract_strided_slice %166 {offsets = [0, 0], sizes = [2, 64], strides = [1, 1]} : vector<2x128xf32> to vector<2x64xf32>
    %168 = vector.extract_strided_slice %166 {offsets = [0, 64], sizes = [2, 64], strides = [1, 1]} : vector<2x128xf32> to vector<2x64xf32>
    %169 = vector.extract_strided_slice %157 {offsets = [0, 128], sizes = [2, 64], strides = [1, 1]} : vector<2x192xf32> to vector<2x64xf32>
    %170 = vector.extract_strided_slice %158 {offsets = [0, 128], sizes = [2, 64], strides = [1, 1]} : vector<2x192xf32> to vector<2x64xf32>
    %171 = arith.addf %170, %35 : vector<2x64xf32>
    %172 = arith.mulf %167, %171 : vector<2x64xf32>
    %173 = arith.addf %169, %172 : vector<2x64xf32>
    %174 = math.tanh %173 : vector<2x64xf32>
    %cst_46 = arith.constant 1.000000e+00 : f32
    %175 = vector.broadcast %cst_46 : f32 to vector<2x64xf32>
    %176 = arith.subf %175, %168 : vector<2x64xf32>
    %177 = arith.mulf %176, %174 : vector<2x64xf32>
    %178 = arith.mulf %168, %155 : vector<2x64xf32>
    %179 = arith.addf %177, %178 : vector<2x64xf32>
    %c10_47 = arith.constant 10 : index
    %c0_48 = arith.constant 0 : index
    %180 = vector.load %arg14[%c10_47, %c0_48] : memref<16x64xf32, #tpu.memory_space<vmem>>, vector<2x64xf32>
    tpu.vector_store %arg14[%c10_47, %c0_48], %179 {strides = array<i32>} : memref<16x64xf32, #tpu.memory_space<vmem>>, vector<2x64xf32>,
    %c12 = arith.constant 12 : index
    %c0_49 = arith.constant 0 : index
    %181 = vector.load %arg12[%c12, %c0_49] : memref<16x192xf32, #tpu.memory_space<vmem>>, vector<2x192xf32>
    %cst_50 = arith.constant dense<0.000000e+00> : vector<2x192xf32>
    %182 = tpu.matmul %179, %32, %cst_50 {dimension_numbers = #tpu.dot_dimension_numbers<[1], [0], [0], [1], [0, 0, 1, 1], [], []>} : vector<2x64xf32>, vector<64x192xf32>, vector<2x192xf32> -> vector<2x192xf32>
    %183 = vector.extract_strided_slice %181 {offsets = [0, 0], sizes = [2, 128], strides = [1, 1]} : vector<2x192xf32> to vector<2x128xf32>
    %184 = vector.extract_strided_slice %182 {offsets = [0, 0], sizes = [2, 128], strides = [1, 1]} : vector<2x192xf32> to vector<2x128xf32>
    %185 = arith.addf %183, %184 : vector<2x128xf32>
    %186 = arith.negf %185 : vector<2x128xf32>
    %187 = math.exp %186 : vector<2x128xf32>
    %cst_51 = arith.constant 1.000000e+00 : f32
    %188 = vector.broadcast %cst_51 : f32 to vector<2x128xf32>
    %189 = arith.addf %188, %187 : vector<2x128xf32>
    %190 = arith.divf %188, %189 : vector<2x128xf32>
    %191 = vector.extract_strided_slice %190 {offsets = [0, 0], sizes = [2, 64], strides = [1, 1]} : vector<2x128xf32> to vector<2x64xf32>
    %192 = vector.extract_strided_slice %190 {offsets = [0, 64], sizes = [2, 64], strides = [1, 1]} : vector<2x128xf32> to vector<2x64xf32>
    %193 = vector.extract_strided_slice %181 {offsets = [0, 128], sizes = [2, 64], strides = [1, 1]} : vector<2x192xf32> to vector<2x64xf32>
    %194 = vector.extract_strided_slice %182 {offsets = [0, 128], sizes = [2, 64], strides = [1, 1]} : vector<2x192xf32> to vector<2x64xf32>
    %195 = arith.addf %194, %35 : vector<2x64xf32>
    %196 = arith.mulf %191, %195 : vector<2x64xf32>
    %197 = arith.addf %193, %196 : vector<2x64xf32>
    %198 = math.tanh %197 : vector<2x64xf32>
    %cst_52 = arith.constant 1.000000e+00 : f32
    %199 = vector.broadcast %cst_52 : f32 to vector<2x64xf32>
    %200 = arith.subf %199, %192 : vector<2x64xf32>
    %201 = arith.mulf %200, %198 : vector<2x64xf32>
    %202 = arith.mulf %192, %179 : vector<2x64xf32>
    %203 = arith.addf %201, %202 : vector<2x64xf32>
    %c12_53 = arith.constant 12 : index
    %c0_54 = arith.constant 0 : index
    %204 = vector.load %arg14[%c12_53, %c0_54] : memref<16x64xf32, #tpu.memory_space<vmem>>, vector<2x64xf32>
    tpu.vector_store %arg14[%c12_53, %c0_54], %203 {strides = array<i32>} : memref<16x64xf32, #tpu.memory_space<vmem>>, vector<2x64xf32>,
    %c14 = arith.constant 14 : index
    %c0_55 = arith.constant 0 : index
    %205 = vector.load %arg12[%c14, %c0_55] : memref<16x192xf32, #tpu.memory_space<vmem>>, vector<2x192xf32>
    %cst_56 = arith.constant dense<0.000000e+00> : vector<2x192xf32>
    %206 = tpu.matmul %203, %32, %cst_56 {dimension_numbers = #tpu.dot_dimension_numbers<[1], [0], [0], [1], [0, 0, 1, 1], [], []>} : vector<2x64xf32>, vector<64x192xf32>, vector<2x192xf32> -> vector<2x192xf32>
    %207 = vector.extract_strided_slice %205 {offsets = [0, 0], sizes = [2, 128], strides = [1, 1]} : vector<2x192xf32> to vector<2x128xf32>
    %208 = vector.extract_strided_slice %206 {offsets = [0, 0], sizes = [2, 128], strides = [1, 1]} : vector<2x192xf32> to vector<2x128xf32>
    %209 = arith.addf %207, %208 : vector<2x128xf32>
    %210 = arith.negf %209 : vector<2x128xf32>
    %211 = math.exp %210 : vector<2x128xf32>
    %cst_57 = arith.constant 1.000000e+00 : f32
    %212 = vector.broadcast %cst_57 : f32 to vector<2x128xf32>
    %213 = arith.addf %212, %211 : vector<2x128xf32>
    %214 = arith.divf %212, %213 : vector<2x128xf32>
    %215 = vector.extract_strided_slice %214 {offsets = [0, 0], sizes = [2, 64], strides = [1, 1]} : vector<2x128xf32> to vector<2x64xf32>
    %216 = vector.extract_strided_slice %214 {offsets = [0, 64], sizes = [2, 64], strides = [1, 1]} : vector<2x128xf32> to vector<2x64xf32>
    %217 = vector.extract_strided_slice %205 {offsets = [0, 128], sizes = [2, 64], strides = [1, 1]} : vector<2x192xf32> to vector<2x64xf32>
    %218 = vector.extract_strided_slice %206 {offsets = [0, 128], sizes = [2, 64], strides = [1, 1]} : vector<2x192xf32> to vector<2x64xf32>
    %219 = arith.addf %218, %35 : vector<2x64xf32>
    %220 = arith.mulf %215, %219 : vector<2x64xf32>
    %221 = arith.addf %217, %220 : vector<2x64xf32>
    %222 = math.tanh %221 : vector<2x64xf32>
    %cst_58 = arith.constant 1.000000e+00 : f32
    %223 = vector.broadcast %cst_58 : f32 to vector<2x64xf32>
    %224 = arith.subf %223, %216 : vector<2x64xf32>
    %225 = arith.mulf %224, %222 : vector<2x64xf32>
    %226 = arith.mulf %216, %203 : vector<2x64xf32>
    %227 = arith.addf %225, %226 : vector<2x64xf32>
    %c14_59 = arith.constant 14 : index
    %c0_60 = arith.constant 0 : index
    %228 = vector.load %arg14[%c14_59, %c0_60] : memref<16x64xf32, #tpu.memory_space<vmem>>, vector<2x64xf32>
    tpu.vector_store %arg14[%c14_59, %c0_60], %227 {strides = array<i32>} : memref<16x64xf32, #tpu.memory_space<vmem>>, vector<2x64xf32>,
    %c0_61 = arith.constant 0 : index
    %c0_62 = arith.constant 0 : index
    %229 = vector.load %arg14[%c0_61, %c0_62] : memref<16x64xf32, #tpu.memory_space<vmem>>, vector<16x64xf32>
    %230 = vector.extract_strided_slice %229 {offsets = [14, 0], sizes = [2, 64], strides = [1, 1]} : vector<16x64xf32> to vector<2x64xf32>
    %231 = vector.extract_strided_slice %229 {offsets = [12, 0], sizes = [2, 64], strides = [1, 1]} : vector<16x64xf32> to vector<2x64xf32>
    %232 = vector.extract_strided_slice %229 {offsets = [10, 0], sizes = [2, 64], strides = [1, 1]} : vector<16x64xf32> to vector<2x64xf32>
    %233 = vector.extract_strided_slice %229 {offsets = [8, 0], sizes = [2, 64], strides = [1, 1]} : vector<16x64xf32> to vector<2x64xf32>
    %234 = vector.extract_strided_slice %229 {offsets = [6, 0], sizes = [2, 64], strides = [1, 1]} : vector<16x64xf32> to vector<2x64xf32>
    %235 = vector.extract_strided_slice %229 {offsets = [4, 0], sizes = [2, 64], strides = [1, 1]} : vector<16x64xf32> to vector<2x64xf32>
    %236 = vector.extract_strided_slice %229 {offsets = [2, 0], sizes = [2, 64], strides = [1, 1]} : vector<16x64xf32> to vector<2x64xf32>
    %237 = vector.extract_strided_slice %229 {offsets = [0, 0], sizes = [2, 64], strides = [1, 1]} : vector<16x64xf32> to vector<2x64xf32>
    %238 = tpu.concatenate %230, %231, %232, %233, %234, %235, %236, %237 in 0 : vector<2x64xf32>, vector<2x64xf32>, vector<2x64xf32>, vector<2x64xf32>, vector<2x64xf32>, vector<2x64xf32>, vector<2x64xf32>, vector<2x64xf32> -> vector<16x64xf32>
    %c0_63 = arith.constant 0 : index
    %c0_64 = arith.constant 0 : index
    %239 = vector.load %arg5[%c0_63, %c0_64] : memref<64x192xf32, #tpu.memory_space<vmem>>, vector<64x192xf32>
    %cst_65 = arith.constant dense<0.000000e+00> : vector<16x192xf32>
    %240 = tpu.matmul %229, %239, %cst_65 {dimension_numbers = #tpu.dot_dimension_numbers<[1], [0], [0], [1], [0, 0, 1, 1], [], []>} : vector<16x64xf32>, vector<64x192xf32>, vector<16x192xf32> -> vector<16x192xf32>
    %c0_66 = arith.constant 0 : index
    %c0_67 = arith.constant 0 : index
    %241 = vector.load %arg6[%c0_66, %c0_67] : memref<64x192xf32, #tpu.memory_space<vmem>>, vector<64x192xf32>
    %cst_68 = arith.constant dense<0.000000e+00> : vector<16x192xf32>
    %242 = tpu.matmul %238, %241, %cst_68 {dimension_numbers = #tpu.dot_dimension_numbers<[1], [0], [0], [1], [0, 0, 1, 1], [], []>} : vector<16x64xf32>, vector<64x192xf32>, vector<16x192xf32> -> vector<16x192xf32>
    %243 = arith.addf %240, %242 : vector<16x192xf32>
    %c0_69 = arith.constant 0 : index
    %c0_70 = arith.constant 0 : index
    %244 = vector.load %arg8[%c0_69, %c0_70] : memref<1x192xf32, #tpu.memory_space<vmem>>, vector<1x192xf32>
    %245 = vector.broadcast %244 : vector<1x192xf32> to vector<16x192xf32>
    %246 = arith.addf %243, %245 : vector<16x192xf32>
    %c0_71 = arith.constant 0 : index
    %c0_72 = arith.constant 0 : index
    %247 = vector.load %arg13[%c0_71, %c0_72] : memref<16x192xf32, #tpu.memory_space<vmem>>, vector<16x192xf32>
    tpu.vector_store %arg13[%c0_71, %c0_72], %246 {strides = array<i32>} : memref<16x192xf32, #tpu.memory_space<vmem>>, vector<16x192xf32>,
    %c0_73 = arith.constant 0 : index
    %c0_74 = arith.constant 0 : index
    %248 = vector.load %arg7[%c0_73, %c0_74] : memref<64x192xf32, #tpu.memory_space<vmem>>, vector<64x192xf32>
    %c0_75 = arith.constant 0 : index
    %c0_76 = arith.constant 0 : index
    %249 = vector.load %arg9[%c0_75, %c0_76] : memref<1x64xf32, #tpu.memory_space<vmem>>, vector<1x64xf32>
    %250 = vector.shape_cast %249 : vector<1x64xf32> to vector<1x64xf32>
    %251 = vector.broadcast %250 : vector<1x64xf32> to vector<2x64xf32>
    %cst_77 = arith.constant 0.000000e+00 : f32
    %252 = vector.broadcast %cst_77 : f32 to vector<2x64xf32>
    %c0_78 = arith.constant 0 : index
    %c0_79 = arith.constant 0 : index
    %253 = vector.load %arg13[%c0_78, %c0_79] : memref<16x192xf32, #tpu.memory_space<vmem>>, vector<2x192xf32>
    %cst_80 = arith.constant dense<0.000000e+00> : vector<2x192xf32>
    %254 = tpu.matmul %252, %248, %cst_80 {dimension_numbers = #tpu.dot_dimension_numbers<[1], [0], [0], [1], [0, 0, 1, 1], [], []>} : vector<2x64xf32>, vector<64x192xf32>, vector<2x192xf32> -> vector<2x192xf32>
    %255 = vector.extract_strided_slice %253 {offsets = [0, 0], sizes = [2, 128], strides = [1, 1]} : vector<2x192xf32> to vector<2x128xf32>
    %256 = vector.extract_strided_slice %254 {offsets = [0, 0], sizes = [2, 128], strides = [1, 1]} : vector<2x192xf32> to vector<2x128xf32>
    %257 = arith.addf %255, %256 : vector<2x128xf32>
    %258 = arith.negf %257 : vector<2x128xf32>
    %259 = math.exp %258 : vector<2x128xf32>
    %cst_81 = arith.constant 1.000000e+00 : f32
    %260 = vector.broadcast %cst_81 : f32 to vector<2x128xf32>
    %261 = arith.addf %260, %259 : vector<2x128xf32>
    %262 = arith.divf %260, %261 : vector<2x128xf32>
    %263 = vector.extract_strided_slice %262 {offsets = [0, 0], sizes = [2, 64], strides = [1, 1]} : vector<2x128xf32> to vector<2x64xf32>
    %264 = vector.extract_strided_slice %262 {offsets = [0, 64], sizes = [2, 64], strides = [1, 1]} : vector<2x128xf32> to vector<2x64xf32>
    %265 = vector.extract_strided_slice %253 {offsets = [0, 128], sizes = [2, 64], strides = [1, 1]} : vector<2x192xf32> to vector<2x64xf32>
    %266 = vector.extract_strided_slice %254 {offsets = [0, 128], sizes = [2, 64], strides = [1, 1]} : vector<2x192xf32> to vector<2x64xf32>
    %267 = arith.addf %266, %251 : vector<2x64xf32>
    %268 = arith.mulf %263, %267 : vector<2x64xf32>
    %269 = arith.addf %265, %268 : vector<2x64xf32>
    %270 = math.tanh %269 : vector<2x64xf32>
    %cst_82 = arith.constant 1.000000e+00 : f32
    %271 = vector.broadcast %cst_82 : f32 to vector<2x64xf32>
    %272 = arith.subf %271, %264 : vector<2x64xf32>
    %273 = arith.mulf %272, %270 : vector<2x64xf32>
    %274 = arith.mulf %264, %252 : vector<2x64xf32>
    %275 = arith.addf %273, %274 : vector<2x64xf32>
    %c0_83 = arith.constant 0 : index
    %c0_84 = arith.constant 0 : index
    %276 = vector.load %arg15[%c0_83, %c0_84] : memref<16x64xf32, #tpu.memory_space<vmem>>, vector<2x64xf32>
    tpu.vector_store %arg15[%c0_83, %c0_84], %275 {strides = array<i32>} : memref<16x64xf32, #tpu.memory_space<vmem>>, vector<2x64xf32>,
    %c2_85 = arith.constant 2 : index
    %c0_86 = arith.constant 0 : index
    %277 = vector.load %arg13[%c2_85, %c0_86] : memref<16x192xf32, #tpu.memory_space<vmem>>, vector<2x192xf32>
    %cst_87 = arith.constant dense<0.000000e+00> : vector<2x192xf32>
    %278 = tpu.matmul %275, %248, %cst_87 {dimension_numbers = #tpu.dot_dimension_numbers<[1], [0], [0], [1], [0, 0, 1, 1], [], []>} : vector<2x64xf32>, vector<64x192xf32>, vector<2x192xf32> -> vector<2x192xf32>
    %279 = vector.extract_strided_slice %277 {offsets = [0, 0], sizes = [2, 128], strides = [1, 1]} : vector<2x192xf32> to vector<2x128xf32>
    %280 = vector.extract_strided_slice %278 {offsets = [0, 0], sizes = [2, 128], strides = [1, 1]} : vector<2x192xf32> to vector<2x128xf32>
    %281 = arith.addf %279, %280 : vector<2x128xf32>
    %282 = arith.negf %281 : vector<2x128xf32>
    %283 = math.exp %282 : vector<2x128xf32>
    %cst_88 = arith.constant 1.000000e+00 : f32
    %284 = vector.broadcast %cst_88 : f32 to vector<2x128xf32>
    %285 = arith.addf %284, %283 : vector<2x128xf32>
    %286 = arith.divf %284, %285 : vector<2x128xf32>
    %287 = vector.extract_strided_slice %286 {offsets = [0, 0], sizes = [2, 64], strides = [1, 1]} : vector<2x128xf32> to vector<2x64xf32>
    %288 = vector.extract_strided_slice %286 {offsets = [0, 64], sizes = [2, 64], strides = [1, 1]} : vector<2x128xf32> to vector<2x64xf32>
    %289 = vector.extract_strided_slice %277 {offsets = [0, 128], sizes = [2, 64], strides = [1, 1]} : vector<2x192xf32> to vector<2x64xf32>
    %290 = vector.extract_strided_slice %278 {offsets = [0, 128], sizes = [2, 64], strides = [1, 1]} : vector<2x192xf32> to vector<2x64xf32>
    %291 = arith.addf %290, %251 : vector<2x64xf32>
    %292 = arith.mulf %287, %291 : vector<2x64xf32>
    %293 = arith.addf %289, %292 : vector<2x64xf32>
    %294 = math.tanh %293 : vector<2x64xf32>
    %cst_89 = arith.constant 1.000000e+00 : f32
    %295 = vector.broadcast %cst_89 : f32 to vector<2x64xf32>
    %296 = arith.subf %295, %288 : vector<2x64xf32>
    %297 = arith.mulf %296, %294 : vector<2x64xf32>
    %298 = arith.mulf %288, %275 : vector<2x64xf32>
    %299 = arith.addf %297, %298 : vector<2x64xf32>
    %c2_90 = arith.constant 2 : index
    %c0_91 = arith.constant 0 : index
    %300 = vector.load %arg15[%c2_90, %c0_91] : memref<16x64xf32, #tpu.memory_space<vmem>>, vector<2x64xf32>
    tpu.vector_store %arg15[%c2_90, %c0_91], %299 {strides = array<i32>} : memref<16x64xf32, #tpu.memory_space<vmem>>, vector<2x64xf32>,
    %c4_92 = arith.constant 4 : index
    %c0_93 = arith.constant 0 : index
    %301 = vector.load %arg13[%c4_92, %c0_93] : memref<16x192xf32, #tpu.memory_space<vmem>>, vector<2x192xf32>
    %cst_94 = arith.constant dense<0.000000e+00> : vector<2x192xf32>
    %302 = tpu.matmul %299, %248, %cst_94 {dimension_numbers = #tpu.dot_dimension_numbers<[1], [0], [0], [1], [0, 0, 1, 1], [], []>} : vector<2x64xf32>, vector<64x192xf32>, vector<2x192xf32> -> vector<2x192xf32>
    %303 = vector.extract_strided_slice %301 {offsets = [0, 0], sizes = [2, 128], strides = [1, 1]} : vector<2x192xf32> to vector<2x128xf32>
    %304 = vector.extract_strided_slice %302 {offsets = [0, 0], sizes = [2, 128], strides = [1, 1]} : vector<2x192xf32> to vector<2x128xf32>
    %305 = arith.addf %303, %304 : vector<2x128xf32>
    %306 = arith.negf %305 : vector<2x128xf32>
    %307 = math.exp %306 : vector<2x128xf32>
    %cst_95 = arith.constant 1.000000e+00 : f32
    %308 = vector.broadcast %cst_95 : f32 to vector<2x128xf32>
    %309 = arith.addf %308, %307 : vector<2x128xf32>
    %310 = arith.divf %308, %309 : vector<2x128xf32>
    %311 = vector.extract_strided_slice %310 {offsets = [0, 0], sizes = [2, 64], strides = [1, 1]} : vector<2x128xf32> to vector<2x64xf32>
    %312 = vector.extract_strided_slice %310 {offsets = [0, 64], sizes = [2, 64], strides = [1, 1]} : vector<2x128xf32> to vector<2x64xf32>
    %313 = vector.extract_strided_slice %301 {offsets = [0, 128], sizes = [2, 64], strides = [1, 1]} : vector<2x192xf32> to vector<2x64xf32>
    %314 = vector.extract_strided_slice %302 {offsets = [0, 128], sizes = [2, 64], strides = [1, 1]} : vector<2x192xf32> to vector<2x64xf32>
    %315 = arith.addf %314, %251 : vector<2x64xf32>
    %316 = arith.mulf %311, %315 : vector<2x64xf32>
    %317 = arith.addf %313, %316 : vector<2x64xf32>
    %318 = math.tanh %317 : vector<2x64xf32>
    %cst_96 = arith.constant 1.000000e+00 : f32
    %319 = vector.broadcast %cst_96 : f32 to vector<2x64xf32>
    %320 = arith.subf %319, %312 : vector<2x64xf32>
    %321 = arith.mulf %320, %318 : vector<2x64xf32>
    %322 = arith.mulf %312, %299 : vector<2x64xf32>
    %323 = arith.addf %321, %322 : vector<2x64xf32>
    %c4_97 = arith.constant 4 : index
    %c0_98 = arith.constant 0 : index
    %324 = vector.load %arg15[%c4_97, %c0_98] : memref<16x64xf32, #tpu.memory_space<vmem>>, vector<2x64xf32>
    tpu.vector_store %arg15[%c4_97, %c0_98], %323 {strides = array<i32>} : memref<16x64xf32, #tpu.memory_space<vmem>>, vector<2x64xf32>,
    %c6_99 = arith.constant 6 : index
    %c0_100 = arith.constant 0 : index
    %325 = vector.load %arg13[%c6_99, %c0_100] : memref<16x192xf32, #tpu.memory_space<vmem>>, vector<2x192xf32>
    %cst_101 = arith.constant dense<0.000000e+00> : vector<2x192xf32>
    %326 = tpu.matmul %323, %248, %cst_101 {dimension_numbers = #tpu.dot_dimension_numbers<[1], [0], [0], [1], [0, 0, 1, 1], [], []>} : vector<2x64xf32>, vector<64x192xf32>, vector<2x192xf32> -> vector<2x192xf32>
    %327 = vector.extract_strided_slice %325 {offsets = [0, 0], sizes = [2, 128], strides = [1, 1]} : vector<2x192xf32> to vector<2x128xf32>
    %328 = vector.extract_strided_slice %326 {offsets = [0, 0], sizes = [2, 128], strides = [1, 1]} : vector<2x192xf32> to vector<2x128xf32>
    %329 = arith.addf %327, %328 : vector<2x128xf32>
    %330 = arith.negf %329 : vector<2x128xf32>
    %331 = math.exp %330 : vector<2x128xf32>
    %cst_102 = arith.constant 1.000000e+00 : f32
    %332 = vector.broadcast %cst_102 : f32 to vector<2x128xf32>
    %333 = arith.addf %332, %331 : vector<2x128xf32>
    %334 = arith.divf %332, %333 : vector<2x128xf32>
    %335 = vector.extract_strided_slice %334 {offsets = [0, 0], sizes = [2, 64], strides = [1, 1]} : vector<2x128xf32> to vector<2x64xf32>
    %336 = vector.extract_strided_slice %334 {offsets = [0, 64], sizes = [2, 64], strides = [1, 1]} : vector<2x128xf32> to vector<2x64xf32>
    %337 = vector.extract_strided_slice %325 {offsets = [0, 128], sizes = [2, 64], strides = [1, 1]} : vector<2x192xf32> to vector<2x64xf32>
    %338 = vector.extract_strided_slice %326 {offsets = [0, 128], sizes = [2, 64], strides = [1, 1]} : vector<2x192xf32> to vector<2x64xf32>
    %339 = arith.addf %338, %251 : vector<2x64xf32>
    %340 = arith.mulf %335, %339 : vector<2x64xf32>
    %341 = arith.addf %337, %340 : vector<2x64xf32>
    %342 = math.tanh %341 : vector<2x64xf32>
    %cst_103 = arith.constant 1.000000e+00 : f32
    %343 = vector.broadcast %cst_103 : f32 to vector<2x64xf32>
    %344 = arith.subf %343, %336 : vector<2x64xf32>
    %345 = arith.mulf %344, %342 : vector<2x64xf32>
    %346 = arith.mulf %336, %323 : vector<2x64xf32>
    %347 = arith.addf %345, %346 : vector<2x64xf32>
    %c6_104 = arith.constant 6 : index
    %c0_105 = arith.constant 0 : index
    %348 = vector.load %arg15[%c6_104, %c0_105] : memref<16x64xf32, #tpu.memory_space<vmem>>, vector<2x64xf32>
    tpu.vector_store %arg15[%c6_104, %c0_105], %347 {strides = array<i32>} : memref<16x64xf32, #tpu.memory_space<vmem>>, vector<2x64xf32>,
    %c8_106 = arith.constant 8 : index
    %c0_107 = arith.constant 0 : index
    %349 = vector.load %arg13[%c8_106, %c0_107] : memref<16x192xf32, #tpu.memory_space<vmem>>, vector<2x192xf32>
    %cst_108 = arith.constant dense<0.000000e+00> : vector<2x192xf32>
    %350 = tpu.matmul %347, %248, %cst_108 {dimension_numbers = #tpu.dot_dimension_numbers<[1], [0], [0], [1], [0, 0, 1, 1], [], []>} : vector<2x64xf32>, vector<64x192xf32>, vector<2x192xf32> -> vector<2x192xf32>
    %351 = vector.extract_strided_slice %349 {offsets = [0, 0], sizes = [2, 128], strides = [1, 1]} : vector<2x192xf32> to vector<2x128xf32>
    %352 = vector.extract_strided_slice %350 {offsets = [0, 0], sizes = [2, 128], strides = [1, 1]} : vector<2x192xf32> to vector<2x128xf32>
    %353 = arith.addf %351, %352 : vector<2x128xf32>
    %354 = arith.negf %353 : vector<2x128xf32>
    %355 = math.exp %354 : vector<2x128xf32>
    %cst_109 = arith.constant 1.000000e+00 : f32
    %356 = vector.broadcast %cst_109 : f32 to vector<2x128xf32>
    %357 = arith.addf %356, %355 : vector<2x128xf32>
    %358 = arith.divf %356, %357 : vector<2x128xf32>
    %359 = vector.extract_strided_slice %358 {offsets = [0, 0], sizes = [2, 64], strides = [1, 1]} : vector<2x128xf32> to vector<2x64xf32>
    %360 = vector.extract_strided_slice %358 {offsets = [0, 64], sizes = [2, 64], strides = [1, 1]} : vector<2x128xf32> to vector<2x64xf32>
    %361 = vector.extract_strided_slice %349 {offsets = [0, 128], sizes = [2, 64], strides = [1, 1]} : vector<2x192xf32> to vector<2x64xf32>
    %362 = vector.extract_strided_slice %350 {offsets = [0, 128], sizes = [2, 64], strides = [1, 1]} : vector<2x192xf32> to vector<2x64xf32>
    %363 = arith.addf %362, %251 : vector<2x64xf32>
    %364 = arith.mulf %359, %363 : vector<2x64xf32>
    %365 = arith.addf %361, %364 : vector<2x64xf32>
    %366 = math.tanh %365 : vector<2x64xf32>
    %cst_110 = arith.constant 1.000000e+00 : f32
    %367 = vector.broadcast %cst_110 : f32 to vector<2x64xf32>
    %368 = arith.subf %367, %360 : vector<2x64xf32>
    %369 = arith.mulf %368, %366 : vector<2x64xf32>
    %370 = arith.mulf %360, %347 : vector<2x64xf32>
    %371 = arith.addf %369, %370 : vector<2x64xf32>
    %c8_111 = arith.constant 8 : index
    %c0_112 = arith.constant 0 : index
    %372 = vector.load %arg15[%c8_111, %c0_112] : memref<16x64xf32, #tpu.memory_space<vmem>>, vector<2x64xf32>
    tpu.vector_store %arg15[%c8_111, %c0_112], %371 {strides = array<i32>} : memref<16x64xf32, #tpu.memory_space<vmem>>, vector<2x64xf32>,
    %c10_113 = arith.constant 10 : index
    %c0_114 = arith.constant 0 : index
    %373 = vector.load %arg13[%c10_113, %c0_114] : memref<16x192xf32, #tpu.memory_space<vmem>>, vector<2x192xf32>
    %cst_115 = arith.constant dense<0.000000e+00> : vector<2x192xf32>
    %374 = tpu.matmul %371, %248, %cst_115 {dimension_numbers = #tpu.dot_dimension_numbers<[1], [0], [0], [1], [0, 0, 1, 1], [], []>} : vector<2x64xf32>, vector<64x192xf32>, vector<2x192xf32> -> vector<2x192xf32>
    %375 = vector.extract_strided_slice %373 {offsets = [0, 0], sizes = [2, 128], strides = [1, 1]} : vector<2x192xf32> to vector<2x128xf32>
    %376 = vector.extract_strided_slice %374 {offsets = [0, 0], sizes = [2, 128], strides = [1, 1]} : vector<2x192xf32> to vector<2x128xf32>
    %377 = arith.addf %375, %376 : vector<2x128xf32>
    %378 = arith.negf %377 : vector<2x128xf32>
    %379 = math.exp %378 : vector<2x128xf32>
    %cst_116 = arith.constant 1.000000e+00 : f32
    %380 = vector.broadcast %cst_116 : f32 to vector<2x128xf32>
    %381 = arith.addf %380, %379 : vector<2x128xf32>
    %382 = arith.divf %380, %381 : vector<2x128xf32>
    %383 = vector.extract_strided_slice %382 {offsets = [0, 0], sizes = [2, 64], strides = [1, 1]} : vector<2x128xf32> to vector<2x64xf32>
    %384 = vector.extract_strided_slice %382 {offsets = [0, 64], sizes = [2, 64], strides = [1, 1]} : vector<2x128xf32> to vector<2x64xf32>
    %385 = vector.extract_strided_slice %373 {offsets = [0, 128], sizes = [2, 64], strides = [1, 1]} : vector<2x192xf32> to vector<2x64xf32>
    %386 = vector.extract_strided_slice %374 {offsets = [0, 128], sizes = [2, 64], strides = [1, 1]} : vector<2x192xf32> to vector<2x64xf32>
    %387 = arith.addf %386, %251 : vector<2x64xf32>
    %388 = arith.mulf %383, %387 : vector<2x64xf32>
    %389 = arith.addf %385, %388 : vector<2x64xf32>
    %390 = math.tanh %389 : vector<2x64xf32>
    %cst_117 = arith.constant 1.000000e+00 : f32
    %391 = vector.broadcast %cst_117 : f32 to vector<2x64xf32>
    %392 = arith.subf %391, %384 : vector<2x64xf32>
    %393 = arith.mulf %392, %390 : vector<2x64xf32>
    %394 = arith.mulf %384, %371 : vector<2x64xf32>
    %395 = arith.addf %393, %394 : vector<2x64xf32>
    %c10_118 = arith.constant 10 : index
    %c0_119 = arith.constant 0 : index
    %396 = vector.load %arg15[%c10_118, %c0_119] : memref<16x64xf32, #tpu.memory_space<vmem>>, vector<2x64xf32>
    tpu.vector_store %arg15[%c10_118, %c0_119], %395 {strides = array<i32>} : memref<16x64xf32, #tpu.memory_space<vmem>>, vector<2x64xf32>,
    %c12_120 = arith.constant 12 : index
    %c0_121 = arith.constant 0 : index
    %397 = vector.load %arg13[%c12_120, %c0_121] : memref<16x192xf32, #tpu.memory_space<vmem>>, vector<2x192xf32>
    %cst_122 = arith.constant dense<0.000000e+00> : vector<2x192xf32>
    %398 = tpu.matmul %395, %248, %cst_122 {dimension_numbers = #tpu.dot_dimension_numbers<[1], [0], [0], [1], [0, 0, 1, 1], [], []>} : vector<2x64xf32>, vector<64x192xf32>, vector<2x192xf32> -> vector<2x192xf32>
    %399 = vector.extract_strided_slice %397 {offsets = [0, 0], sizes = [2, 128], strides = [1, 1]} : vector<2x192xf32> to vector<2x128xf32>
    %400 = vector.extract_strided_slice %398 {offsets = [0, 0], sizes = [2, 128], strides = [1, 1]} : vector<2x192xf32> to vector<2x128xf32>
    %401 = arith.addf %399, %400 : vector<2x128xf32>
    %402 = arith.negf %401 : vector<2x128xf32>
    %403 = math.exp %402 : vector<2x128xf32>
    %cst_123 = arith.constant 1.000000e+00 : f32
    %404 = vector.broadcast %cst_123 : f32 to vector<2x128xf32>
    %405 = arith.addf %404, %403 : vector<2x128xf32>
    %406 = arith.divf %404, %405 : vector<2x128xf32>
    %407 = vector.extract_strided_slice %406 {offsets = [0, 0], sizes = [2, 64], strides = [1, 1]} : vector<2x128xf32> to vector<2x64xf32>
    %408 = vector.extract_strided_slice %406 {offsets = [0, 64], sizes = [2, 64], strides = [1, 1]} : vector<2x128xf32> to vector<2x64xf32>
    %409 = vector.extract_strided_slice %397 {offsets = [0, 128], sizes = [2, 64], strides = [1, 1]} : vector<2x192xf32> to vector<2x64xf32>
    %410 = vector.extract_strided_slice %398 {offsets = [0, 128], sizes = [2, 64], strides = [1, 1]} : vector<2x192xf32> to vector<2x64xf32>
    %411 = arith.addf %410, %251 : vector<2x64xf32>
    %412 = arith.mulf %407, %411 : vector<2x64xf32>
    %413 = arith.addf %409, %412 : vector<2x64xf32>
    %414 = math.tanh %413 : vector<2x64xf32>
    %cst_124 = arith.constant 1.000000e+00 : f32
    %415 = vector.broadcast %cst_124 : f32 to vector<2x64xf32>
    %416 = arith.subf %415, %408 : vector<2x64xf32>
    %417 = arith.mulf %416, %414 : vector<2x64xf32>
    %418 = arith.mulf %408, %395 : vector<2x64xf32>
    %419 = arith.addf %417, %418 : vector<2x64xf32>
    %c12_125 = arith.constant 12 : index
    %c0_126 = arith.constant 0 : index
    %420 = vector.load %arg15[%c12_125, %c0_126] : memref<16x64xf32, #tpu.memory_space<vmem>>, vector<2x64xf32>
    tpu.vector_store %arg15[%c12_125, %c0_126], %419 {strides = array<i32>} : memref<16x64xf32, #tpu.memory_space<vmem>>, vector<2x64xf32>,
    %c14_127 = arith.constant 14 : index
    %c0_128 = arith.constant 0 : index
    %421 = vector.load %arg13[%c14_127, %c0_128] : memref<16x192xf32, #tpu.memory_space<vmem>>, vector<2x192xf32>
    %cst_129 = arith.constant dense<0.000000e+00> : vector<2x192xf32>
    %422 = tpu.matmul %419, %248, %cst_129 {dimension_numbers = #tpu.dot_dimension_numbers<[1], [0], [0], [1], [0, 0, 1, 1], [], []>} : vector<2x64xf32>, vector<64x192xf32>, vector<2x192xf32> -> vector<2x192xf32>
    %423 = vector.extract_strided_slice %421 {offsets = [0, 0], sizes = [2, 128], strides = [1, 1]} : vector<2x192xf32> to vector<2x128xf32>
    %424 = vector.extract_strided_slice %422 {offsets = [0, 0], sizes = [2, 128], strides = [1, 1]} : vector<2x192xf32> to vector<2x128xf32>
    %425 = arith.addf %423, %424 : vector<2x128xf32>
    %426 = arith.negf %425 : vector<2x128xf32>
    %427 = math.exp %426 : vector<2x128xf32>
    %cst_130 = arith.constant 1.000000e+00 : f32
    %428 = vector.broadcast %cst_130 : f32 to vector<2x128xf32>
    %429 = arith.addf %428, %427 : vector<2x128xf32>
    %430 = arith.divf %428, %429 : vector<2x128xf32>
    %431 = vector.extract_strided_slice %430 {offsets = [0, 0], sizes = [2, 64], strides = [1, 1]} : vector<2x128xf32> to vector<2x64xf32>
    %432 = vector.extract_strided_slice %430 {offsets = [0, 64], sizes = [2, 64], strides = [1, 1]} : vector<2x128xf32> to vector<2x64xf32>
    %433 = vector.extract_strided_slice %421 {offsets = [0, 128], sizes = [2, 64], strides = [1, 1]} : vector<2x192xf32> to vector<2x64xf32>
    %434 = vector.extract_strided_slice %422 {offsets = [0, 128], sizes = [2, 64], strides = [1, 1]} : vector<2x192xf32> to vector<2x64xf32>
    %435 = arith.addf %434, %251 : vector<2x64xf32>
    %436 = arith.mulf %431, %435 : vector<2x64xf32>
    %437 = arith.addf %433, %436 : vector<2x64xf32>
    %438 = math.tanh %437 : vector<2x64xf32>
    %cst_131 = arith.constant 1.000000e+00 : f32
    %439 = vector.broadcast %cst_131 : f32 to vector<2x64xf32>
    %440 = arith.subf %439, %432 : vector<2x64xf32>
    %441 = arith.mulf %440, %438 : vector<2x64xf32>
    %442 = arith.mulf %432, %419 : vector<2x64xf32>
    %443 = arith.addf %441, %442 : vector<2x64xf32>
    %c14_132 = arith.constant 14 : index
    %c0_133 = arith.constant 0 : index
    %444 = vector.load %arg15[%c14_132, %c0_133] : memref<16x64xf32, #tpu.memory_space<vmem>>, vector<2x64xf32>
    tpu.vector_store %arg15[%c14_132, %c0_133], %443 {strides = array<i32>} : memref<16x64xf32, #tpu.memory_space<vmem>>, vector<2x64xf32>,
    %445 = vector.extract_strided_slice %443 {offsets = [0, 0], sizes = [2, 32], strides = [1, 1]} : vector<2x64xf32> to vector<2x32xf32>
    %446 = vector.extract_strided_slice %443 {offsets = [0, 32], sizes = [2, 32], strides = [1, 1]} : vector<2x64xf32> to vector<2x32xf32>
    %447 = arith.addf %445, %446 : vector<2x32xf32>
    %c0_134 = arith.constant 0 : index
    %c0_135 = arith.constant 0 : index
    %448 = vector.load %arg11[%c0_134, %c0_135] : memref<2x32xf32, #tpu.memory_space<vmem>>, vector<2x32xf32>
    tpu.vector_store %arg11[%c0_134, %c0_135], %447 {strides = array<i32>} : memref<2x32xf32, #tpu.memory_space<vmem>>, vector<2x32xf32>,
    %c0_136 = arith.constant 0 : index
    %c0_137 = arith.constant 0 : index
    %449 = vector.load %arg15[%c0_136, %c0_137] : memref<16x64xf32, #tpu.memory_space<vmem>>, vector<16x64xf32>
    %450 = vector.extract_strided_slice %449 {offsets = [0, 0], sizes = [2, 32], strides = [1, 1]} : vector<16x64xf32> to vector<2x32xf32>
    %451 = vector.extract_strided_slice %449 {offsets = [14, 32], sizes = [2, 32], strides = [1, 1]} : vector<16x64xf32> to vector<2x32xf32>
    %452 = arith.addf %450, %451 : vector<2x32xf32>
    %453 = vector.extract_strided_slice %449 {offsets = [2, 0], sizes = [2, 32], strides = [1, 1]} : vector<16x64xf32> to vector<2x32xf32>
    %454 = vector.extract_strided_slice %449 {offsets = [12, 32], sizes = [2, 32], strides = [1, 1]} : vector<16x64xf32> to vector<2x32xf32>
    %455 = arith.addf %453, %454 : vector<2x32xf32>
    %456 = vector.extract_strided_slice %449 {offsets = [4, 0], sizes = [2, 32], strides = [1, 1]} : vector<16x64xf32> to vector<2x32xf32>
    %457 = vector.extract_strided_slice %449 {offsets = [10, 32], sizes = [2, 32], strides = [1, 1]} : vector<16x64xf32> to vector<2x32xf32>
    %458 = arith.addf %456, %457 : vector<2x32xf32>
    %459 = vector.extract_strided_slice %449 {offsets = [6, 0], sizes = [2, 32], strides = [1, 1]} : vector<16x64xf32> to vector<2x32xf32>
    %460 = vector.extract_strided_slice %449 {offsets = [8, 32], sizes = [2, 32], strides = [1, 1]} : vector<16x64xf32> to vector<2x32xf32>
    %461 = arith.addf %459, %460 : vector<2x32xf32>
    %462 = vector.extract_strided_slice %449 {offsets = [8, 0], sizes = [2, 32], strides = [1, 1]} : vector<16x64xf32> to vector<2x32xf32>
    %463 = vector.extract_strided_slice %449 {offsets = [6, 32], sizes = [2, 32], strides = [1, 1]} : vector<16x64xf32> to vector<2x32xf32>
    %464 = arith.addf %462, %463 : vector<2x32xf32>
    %465 = vector.extract_strided_slice %449 {offsets = [10, 0], sizes = [2, 32], strides = [1, 1]} : vector<16x64xf32> to vector<2x32xf32>
    %466 = vector.extract_strided_slice %449 {offsets = [4, 32], sizes = [2, 32], strides = [1, 1]} : vector<16x64xf32> to vector<2x32xf32>
    %467 = arith.addf %465, %466 : vector<2x32xf32>
    %468 = vector.extract_strided_slice %449 {offsets = [12, 0], sizes = [2, 32], strides = [1, 1]} : vector<16x64xf32> to vector<2x32xf32>
    %469 = vector.extract_strided_slice %449 {offsets = [2, 32], sizes = [2, 32], strides = [1, 1]} : vector<16x64xf32> to vector<2x32xf32>
    %470 = arith.addf %468, %469 : vector<2x32xf32>
    %471 = vector.extract_strided_slice %449 {offsets = [14, 0], sizes = [2, 32], strides = [1, 1]} : vector<16x64xf32> to vector<2x32xf32>
    %472 = vector.extract_strided_slice %449 {offsets = [0, 32], sizes = [2, 32], strides = [1, 1]} : vector<16x64xf32> to vector<2x32xf32>
    %473 = arith.addf %471, %472 : vector<2x32xf32>
    %474 = tpu.concatenate %452, %455, %458, %461, %464, %467, %470, %473 in 1 : vector<2x32xf32>, vector<2x32xf32>, vector<2x32xf32>, vector<2x32xf32>, vector<2x32xf32>, vector<2x32xf32>, vector<2x32xf32>, vector<2x32xf32> -> vector<2x256xf32>
    %c0_138 = arith.constant 0 : index
    %c0_139 = arith.constant 0 : index
    %475 = vector.load %arg10[%c0_138, %c0_139] : memref<2x256xf32, #tpu.memory_space<vmem>>, vector<2x256xf32>
    tpu.vector_store %arg10[%c0_138, %c0_139], %474 {strides = array<i32>} : memref<2x256xf32, #tpu.memory_space<vmem>>, vector<2x256xf32>,
    return
  }
}

</mosaic_0001>

<bundles_post_ra>
// kernel: rnn_encoder_forward.1
= control target key start
LH: loop header
LB: loop body
LE: loop exit
PB: predicated region body
PF: predicated region fallthrough
CT: control target
= control target key end

     0   :  { %17 = vsyncpa [#allocation7], 0  ;;  %s2901_s0 = inlined_call_operand.vmem [shape: f32[2,32], index: 0, kind: input, shape index: {}]   ;;  %s2902_s1 = inlined_call_operand.vmem [shape: f32[8,192], index: 1, kind: input, shape index: {}]   ;;  %s2903_s2 = inlined_call_operand.hbm [shape: f32[64,192], index: 2, kind: input, shape index: {}]   ;;  %s2904_s3 = inlined_call_operand.vmem [shape: f32[1,192], index: 3, kind: input, shape index: {}]   ;;  %s2905_s4 = inlined_call_operand.vmem [shape: f32[1,64], index: 4, kind: input, shape index: {}]   ;;  %s2906_s5 = inlined_call_operand.hbm [shape: f32[64,192], index: 5, kind: input, shape index: {}]   ;;  %s2907_s6 = inlined_call_operand.hbm [shape: f32[64,192], index: 6, kind: input, shape index: {}]   ;;  %s2908_s7 = inlined_call_operand.hbm [shape: f32[64,192], index: 7, kind: input, shape index: {}]   ;;  %s2909_s8 = inlined_call_operand.vmem [shape: f32[1,192], index: 8, kind: input, shape index: {}]   ;;  %s2910_s9 = inlined_call_operand.vmem [shape: f32[1,64], index: 9, kind: input, shape index: {}]   ;;  %s2911_s10 = inlined_call_operand.vmem [shape: f32[2,256], index: 10, kind: output, shape index: {0}]   ;;  %s2912_s11 = inlined_call_operand.hbm [shape: f32[2,32], index: 11, kind: output, shape index: {1}]  }
   0x1   :  { %18 = vsyncpa [#allocation10], 0 }
   0x2   :  { %19 = vsyncpa [#allocation13], 0 }
   0x3   :  { %20 = vsyncpa [#allocation8], 0  ;;  %s46_s19 = sshll.u32 %s2906_s5, 4  ;;  %s2261_s20 = smov [#allocation9]   ;;  %s47_s19 = int_to_ptr.hbm [resolvable:$true] %s46_s19 }
   0x4   :  { %s48_s21 = sshll.u32 %s2261_s20, 4  ;;  %s29_s24 = sshll.u32 %s2903_s2, 4  ;;  %s49_s21 = int_to_ptr.vmem [resolvable:$true] %s48_s21  ;;  %s30_s24 = int_to_ptr.hbm [resolvable:$true] %s29_s24 }
   0x5   :  { %s2262_s25 = smov 256   ;;  %s2263_s26 = smov 16  }
   0x6   :  { %54 = dma.hbm_to_vmem [thread:$0]  %s47_s19, 2048, %s49_s21, [#allocation10], %s2262_s25, %s2262_s25, %s2263_s26  }
   0x7   :  { %s2264_s27 = smov [#allocation6]   ;;  %s59_s12 = sshll.u32 %s2907_s6, 4  ;;  %s60_s12 = int_to_ptr.hbm [resolvable:$true] %s59_s12 }
   0x8   :  { %s31_s28 = sshll.u32 %s2264_s27, 4  ;;  %s72_s14 = sshll.u32 %s2908_s7, 4  ;;  %s32_s28 = int_to_ptr.vmem [resolvable:$true] %s31_s28  ;;  %s73_s14 = int_to_ptr.hbm [resolvable:$true] %s72_s14 }
   0x9   :  { %37 = dma.hbm_to_vmem [thread:$0]  %s30_s24, 2048, %s32_s28, [#allocation7], %s2262_s25, %s2262_s25, %s2263_s26  }
   0xa   :  { %s2265_s15 = smov [#allocation11]   ;;  %s2266_s2 = smov [#allocation12]  }
   0xb   :  { %s61_s16 = sshll.u32 %s2265_s15, 4  ;;  %s74_s17 = sshll.u32 %s2266_s2, 4  ;;  %s62_s16 = int_to_ptr.vmem [resolvable:$true] %s61_s16  ;;  %s75_s17 = int_to_ptr.vmem [resolvable:$true] %s74_s17 }
   0xc   :  { %67 = dma.hbm_to_vmem [thread:$0]  %s60_s12, 2048, %s62_s16, [#allocation10], %s2262_s25, %s2262_s25, %s2263_s26  }
   0xd   :  { %80 = dma.hbm_to_vmem [thread:$0]  %s73_s14, 2048, %s75_s17, [#allocation13], %s2262_s25, %s2262_s25, %s2263_s26  }
   0xe   :  { %2253 = dma.done.wait [#allocation7], 2048  }
   0xf   :  { %2254 = vsyncadd [#allocation7], 4294965248 }
  0x10   :  { %2255 = dma.done.wait [#allocation10], 4096  }
  0x11   :  { %2256 = vsyncadd [#allocation10], 4294963200 }
  0x12   :  { %2257 = dma.done.wait [#allocation13], 2048  }
  0x13   :  { %2258 = vsyncadd [#allocation13], 4294965248  ;;  %v2355_v0 = vld [vmem:[%s2901_s0] sm:$0x3]  ;;  %s2267_s7 = smov 120   ;;  %s2268_s19 = smov 124  }
  0x14   :  { %115 = vrot.lane.b32.xlu1 %v2355_v0, %s2267_s7  ;;  %108 = vrot.lane.b32.xlu0 %v2355_v0, %s2268_s19  ;;  %s2269_s20 = smov 104   ;;  %s2270_s21 = smov 112   ;;  %v2365_v1 = vld [vmem:[#allocation6 + $0x70] sm:$0xff]  ;;  %v2367_v2 = vld [vmem:[#allocation6 + $0x60] sm:$0xff]  ;;  %v163_v7 = vld [vmem:[%s2902_s1 + $0x8] sm:$0xff]  ;;  %v2275_v11 = vmov 0.0  }
  0x15   :  { %103 = vrot.lane.b32.xlu2 %v2355_v0, %s2269_s20  ;;  %s2271_s22 = smov 108   ;;  %s2272_s23 = smov 116   ;;  %261 = vmatpush.msra.mxu2 %v2365_v1  ;;  %v2370_v3 = vld [vmem:[#allocation6 + $0x50] sm:$0xff]  ;;  %v2374_v4 = vld [vmem:[#allocation6 + $0x40] sm:$0xff]  ;;  %v2404_v12 = vld [vmem:[#allocation6 + $0x78] sm:$0xff]  ;;  %vm106_vm0 = vcmask 31744  }
  0x16   :  { %s2273_s0 = smov 100   ;;  %s2274_s24 = smov 4   ;;  %v2377_v5 = vld [vmem:[#allocation6 + $0x30] sm:$0xff]  ;;  %v162_v6 = vld [vmem:[%s2902_s1] sm:$0xff]  ;;  %215 = vmatpush.msra.mxu1 %v163_v7  ;;  %v2406_v13 = vld [vmem:[#allocation6 + $0x68] sm:$0xff]  ;;  %281 = vmatpush.msra.mxu3 %v2404_v12  ;;  %vm153_vm1 = vcmask 1041408  }
  0x17   :  { %262 = vmatpush.msra.mxu2 %v2367_v2  ;;  %192 = vmatpush.msra.mxu0 %v162_v6  ;;  %v2385_v8 = vld [vmem:[#allocation6 + $0x20] sm:$0xff]  ;;  %v2391_v9 = vld [vmem:[#allocation6 + $0x10] sm:$0xff]  ;;  %v2410_v14 = vld [vmem:[#allocation6 + $0x58] sm:$0xff]  ;;  %vm155_vm2 = vcmask 1043456   ;;  %vm157_vm3 = vcmask 1045504   ;;  %vm170_vm4 = vcmask 64512  }
  0x18   :  { %v2395_v10 = vld [vmem:[#allocation6] sm:$0xff]  ;;  %363 = vmatpush.msrb.mxu1 %v2404_v12  ;;  %282 = vmatpush.msra.mxu3 %v2406_v13  ;;  %v2416_v16 = vld [vmem:[#allocation6 + $0x48] sm:$0xff]  ;;  %v2422_v17 = vld [vmem:[#allocation6 + $0x38] sm:$0xff]  ;;  %vm224_vm5 = vcmask 523264   ;;  %vm329_vm10 = vcmask 517120   ;;  %s2278_s14 = smov 32  }
  0x19   :  { %263 = vmatpush.msra.mxu2 %v2370_v3  ;;  %343 = vmatpush.msrb.mxu0 %v2365_v1  ;;  %v2427_v18 = vld [vmem:[#allocation6 + $0x28] sm:$0xff]  ;;  %v2432_v21 = vld [vmem:[#allocation6 + $0x18] sm:$0xff]  ;;  %v164_v47 = vld [vmem:[%s2904_s3] sm:$0x3]  ;;  %s2279_s15 = smov [#allocation14]   ;;  %s1946_s6 = sshll.u32 %s2912_s11, 4  ;;  %s1947_s6 = int_to_ptr.hbm [resolvable:$true] %s1946_s6 }
  0x1a   :  { %364 = vmatpush.msrb.mxu1 %v2406_v13  ;;  %283 = vmatpush.msra.mxu3 %v2410_v14  ;;  %v2437_v22 = vld [vmem:[#allocation6 + $0x8] sm:$0xff]  ;;  %v166_v48 = vperm.slane %v164_v47, 0  ;;  %v167_v49 = vperm.slane %v164_v47, 1  ;;  %v2512_v7 = vld [vmem:[%s2905_s4] ss:$0 sm:$0xff]  ;;  %s2276_s4 = smov 64  }
  0x1b   :  { %264 = vmatpush.msra.mxu2 %v2374_v4  ;;  %344 = vmatpush.msrb.mxu0 %v2367_v2  ;;  %s1944_s16 = sshll.u32 %s2279_s15, 4  ;;  %s1945_s16 = int_to_ptr.vmem [resolvable:$true] %s1944_s16 }
  0x1c   :  { %118 = vrot.lane.b32.xlu1 %v2355_v0, %s2270_s21  ;;  %111 = vrot.lane.b32.xlu0 %v2355_v0, %s2271_s22 }
  0x1d   :  { %122 = vrot.lane.b32.xlu2 %v2355_v0, %s2272_s23  ;;  %265 = vmatpush.msra.mxu2 %v2377_v5 }
  0x1e   :  { %345 = vmatpush.msrb.mxu0 %v2370_v3  ;;  %365 = vmatpush.msrb.mxu1 %v2410_v14 }
  0x1f   :  { %266 = vmatpush.msra.mxu2 %v2385_v8  ;;  %284 = vmatpush.msra.mxu3 %v2416_v16 }
  0x20   :  { %346 = vmatpush.msrb.mxu0 %v2374_v4  ;;  %366 = vmatpush.msrb.mxu1 %v2416_v16 }
  0x21   :  { %267 = vmatpush.msra.mxu2 %v2391_v9  ;;  %285 = vmatpush.msra.mxu3 %v2422_v17 }
  0x22   :  { %347 = vmatpush.msrb.mxu0 %v2377_v5  ;;  %367 = vmatpush.msrb.mxu1 %v2422_v17 }
  0x23   :  { %268 = vmatpush.msra.mxu2 %v2395_v10  ;;  %286 = vmatpush.msra.mxu3 %v2427_v18 }
  0x24   :  { %128 = vrot.lane.b32.xlu1 %v2355_v0, %s2273_s0  ;;  %269 = vmatmul.f32.vlgmr.msra.gmra.mxu2 %v2275_v11 }
  0x25   :  { %131 = vrot.lane.b32.xlu2 %v2355_v0, %s2274_s24  ;;  %436 = vmatpush.msrb.mxu2 %v2365_v1 }
  0x26   :  { %348 = vmatpush.msrb.mxu0 %v2385_v8  ;;  %368 = vmatpush.msrb.mxu1 %v2427_v18 }
  0x27   :  { %437 = vmatpush.msrb.mxu2 %v2367_v2  ;;  %287 = vmatpush.msra.mxu3 %v2432_v21 }
  0x28   :  { %349 = vmatpush.msrb.mxu0 %v2391_v9  ;;  %369 = vmatpush.msrb.mxu1 %v2432_v21 }
  0x29   :  { %438 = vmatpush.msrb.mxu2 %v2370_v3  ;;  %288 = vmatpush.msra.mxu3 %v2437_v22 }
  0x2a   :  { %350 = vmatpush.msrb.mxu0 %v2395_v10  ;;  %370 = vmatpush.msrb.mxu1 %v2437_v22 }
  0x2b   :  { %439 = vmatpush.msrb.mxu2 %v2374_v4  ;;  %289 = vmatmul.f32.vlgmr.msra.gmra.mxu3 %v2275_v11 }
  0x2c   :  { %456 = vmatpush.msrb.mxu3 %v2404_v12 }
  0x2d   :  { %440 = vmatpush.msrb.mxu2 %v2377_v5 }
  0x2e   :  { %457 = vmatpush.msrb.mxu3 %v2406_v13 }
  0x2f   :  { %441 = vmatpush.msrb.mxu2 %v2385_v8 }
  0x30   :  { %458 = vmatpush.msrb.mxu3 %v2410_v14 }
  0x31   :  { %442 = vmatpush.msrb.mxu2 %v2391_v9 }
  0x32   :  { %459 = vmatpush.msrb.mxu3 %v2416_v16 }
  0x33   :  { %443 = vmatpush.msrb.mxu2 %v2395_v10 }
  0x34   :  { %460 = vmatpush.msrb.mxu3 %v2422_v17 }
  0x35   :  { %622 = vmatpush.msra.mxu2 %v2365_v1 }
  0x36   :  { %461 = vmatpush.msrb.mxu3 %v2427_v18 }
  0x37   :  { %623 = vmatpush.msra.mxu2 %v2367_v2 }
  0x38   :  { %462 = vmatpush.msrb.mxu3 %v2432_v21 }
  0x39   :  { %624 = vmatpush.msra.mxu2 %v2370_v3 }
  0x3a   :  { %463 = vmatpush.msrb.mxu3 %v2437_v22 }
  0x3b   :  { %625 = vmatpush.msra.mxu2 %v2374_v4 }
  0x3c   :  { %642 = vmatpush.msra.mxu3 %v2404_v12 }
  0x3d   :  { %626 = vmatpush.msra.mxu2 %v2377_v5 }
  0x3e   :  { %643 = vmatpush.msra.mxu3 %v2406_v13 }
  0x3f   :  { %627 = vmatpush.msra.mxu2 %v2385_v8 }
  0x40   :  { %644 = vmatpush.msra.mxu3 %v2410_v14 }
  0x41   :  { %628 = vmatpush.msra.mxu2 %v2391_v9 }
  0x42   :  { %645 = vmatpush.msra.mxu3 %v2416_v16 }
  0x43   :  { %629 = vmatpush.msra.mxu2 %v2395_v10 }
  0x44   :  { %646 = vmatpush.msra.mxu3 %v2422_v17 }
  0x46   :  { %647 = vmatpush.msra.mxu3 %v2427_v18 }
  0x48   :  { %648 = vmatpush.msra.mxu3 %v2432_v21 }
  0x4a   :  { %649 = vmatpush.msra.mxu3 %v2437_v22 }
  0x6f   :  { %v104_v15 = vpop.permute.xlu2 %103 }
  0x70   :  { %v107_v31 = vsel %vm106_vm0, %v2355_v0, %v104_v15  ;;  %v127_v38 = vsel %vm106_vm0, %v104_v15, %v2355_v0 }
  0x71   :  { %v148_v44 = vrot.slane %v127_v38, 4 }
  0x77   :  { %v123_v23 = vpop.permute.xlu2 %122 }
  0x78   :  { %v142_v28 = vrot.slane %v123_v23, 2 }
  0x7f   :  { %v132_v37 = vpop.permute.xlu2 %131 }
  0x86   :  { %v116_v19 = vpop.permute.xlu1 %115  ;;  %v109_v20 = vpop.permute.xlu0 %108 }
  0x8e   :  { %v119_v24 = vpop.permute.xlu1 %118  ;;  %v112_v25 = vpop.permute.xlu0 %111 }
  0x8f   :  { %v121_v26 = vsel %vm106_vm0, %v116_v19, %v119_v24  ;;  %v114_v27 = vsel %vm106_vm0, %v109_v20, %v112_v25  ;;  %v126_v32 = vsel %vm106_vm0, %v112_v25, %v109_v20  ;;  %v125_v40 = vsel %vm106_vm0, %v119_v24, %v116_v19 }
  0x90   :  { %v139_v29 = vrot.slane %v121_v26, 4  ;;  %v136_v30 = vrot.slane %v114_v27, 6  ;;  %v145_v35 = vrot.slane %v126_v32, 6 }
  0x92   :  { %v154_v33 = vsel %vm153_vm1, %v107_v31, %v136_v30  ;;  %v159_v43 = vsel %vm153_vm1, %v125_v40, %v145_v35 }
  0x93   :  { %v156_v34 = vsel %vm155_vm2, %v154_v33, %v139_v29  ;;  %v160_v45 = vsel %vm155_vm2, %v159_v43, %v148_v44 }
  0x94   :  { %v158_v36 = vsel %vm157_vm3, %v156_v34, %v142_v28 }
  0x95   :  { %1960 = vmatmul.msk.f32.vlgmr.msra.gmra.mxu0 %vm170_vm4, %v158_v36  ;;  %1962 = vmatmul.msk.f32.vlgmr.msra.gmra.mxu1 %vm170_vm4, %v158_v36 }
  0x96   :  { %v129_v39 = vpop.permute.xlu1 %128  ;;  %529 = vmatpush.msra.mxu0 %v2365_v1  ;;  %549 = vmatpush.msra.mxu1 %v2404_v12 }
  0x97   :  { %v134_v41 = vsel %vm106_vm0, %v129_v39, %v132_v37 }
  0x98   :  { %v151_v42 = vrot.slane %v134_v41, 2  ;;  %530 = vmatpush.msra.mxu0 %v2367_v2  ;;  %550 = vmatpush.msra.mxu1 %v2406_v13 }
  0x9a   :  { %531 = vmatpush.msra.mxu0 %v2370_v3  ;;  %551 = vmatpush.msra.mxu1 %v2410_v14  ;;  %v161_v46 = vsel %vm157_vm3, %v160_v45, %v151_v42 }
  0x9c   :  { %532 = vmatpush.msra.mxu0 %v2374_v4  ;;  %552 = vmatpush.msra.mxu1 %v2416_v16 }
  0x9d   :  { %1961 = vmatmul.msk.f32.gmra.mxu0 %vm170_vm4, %v161_v46  ;;  %1963 = vmatmul.msk.f32.gmra.mxu1 %vm170_vm4, %v161_v46 }
  0x9e   :  { %533 = vmatpush.msra.mxu0 %v2377_v5  ;;  %553 = vmatpush.msra.mxu1 %v2422_v17 }
  0xa0   :  { %534 = vmatpush.msra.mxu0 %v2385_v8  ;;  %554 = vmatpush.msra.mxu1 %v2427_v18 }
  0xa2   :  { %535 = vmatpush.msra.mxu0 %v2391_v9  ;;  %555 = vmatpush.msra.mxu1 %v2432_v21 }
  0xa4   :  { %536 = vmatpush.msra.mxu0 %v2395_v10  ;;  %556 = vmatpush.msra.mxu1 %v2437_v22 }
  0xa7   :  { %v270_v54 = vpop.f32.mrf.mxu2 }
  0xae   :  { %v290_v19 = vpop.f32.mrf.mxu3 }
  0xaf   :  { %v313_v26 = vadd.f32 %v2512_v7, %v290_v19 }
 0x112   :  { %v194_v50 = vpop.f32.mrf.mxu0  ;;  %v217_v51 = vpop.f32.mrf.mxu1 }
 0x113   :  { %v195_v52 = vadd.f32 %v194_v50, %v166_v48  ;;  %v218_v53 = vadd.f32 %v217_v51, %v167_v49 }
 0x115   :  { %223 = vst [vmem:[#allocation2] sm:$0xff] %v195_v52 }
 0x116   :  { %225 = vst.msk [vmem:[#allocation2 + $0x8] sm:$0xff] %vm224_vm5, %v218_v53 }
 0x11a   :  { %v197_v55 = vpop.f32.mrf.mxu0  ;;  %v220_v56 = vpop.f32.mrf.mxu1 }
 0x11b   :  { %v198_v57 = vadd.f32 %v197_v55, %v166_v48  ;;  %v221_v58 = vadd.f32 %v220_v56, %v167_v49 }
 0x11c   :  { %v248_v59 = vld [vmem:[#allocation2] sm:$0x3]  ;;  %v331_v42 = vld [vmem:[#allocation2] sm:$0xc] }
 0x11d   :  { %226 = vst [vmem:[#allocation2 + $0x10] sm:$0xff] %v198_v57  ;;  %v293_v60 = vadd.f32 %v270_v54, %v248_v59  ;;  %v249_v31 = vld [vmem:[#allocation2 + $0x8] sm:$0x3] }
 0x11e   :  { %227 = vst.msk [vmem:[#allocation2 + $0x18] sm:$0xff] %vm224_vm5, %v221_v58 }
 0x11f   :  { %v1964_v61 = vmul.f32 -1.442695, %v293_v60 }
 0x121   :  { %2037 = vpow2.f32 %v1964_v61 }
 0x127   :  { %v2038_v62 = vpop.eup %2037 }
 0x128   :  { %v297_v63 = vadd.f32 1.0, %v2038_v62 }
 0x12a   :  { %2039 = vrcp.f32 %v297_v63  ;;  %v309_v20 = vand.u32 2147483648, %v297_v63  ;;  %v307_v24 = vand.u32 2147483647, %v297_v63  ;;  %vm303_vm7 = vweird.f32 %v297_v63 }
 0x12c   :  { %v310_v27 = vor.u32 1.1754944e-38, %v309_v20  ;;  %vm308_vm9 = vcmp.eq.f32.partialorder %v307_v24, 8.507059e+37 }
 0x130   :  { %v2040_v0 = vpop.eup %2039 }
 0x131   :  { %v299_v6 = vmul.f32 %v2040_v0, %v297_v63  ;;  %vm304_vm6 = vweird.f32 %v2040_v0  ;;  %v332_v63 = vld [vmem:[#allocation2 + $0x8] sm:$0xc] }
 0x132   :  { %vm305_vm8 = vmor %vm303_vm7, %vm304_vm6 }
 0x133   :  { %v300_v15 = vsub.f32 1.0, %v299_v6 }
 0x135   :  { %v301_v23 = vmul.f32 %v2040_v0, %v300_v15 }
 0x137   :  { %v302_v25 = vadd.f32 %v2040_v0, %v301_v23 }
 0x139   :  { %v306_v28 = vsel %vm305_vm8, %v2040_v0, %v302_v25 }
 0x13a   :  { %v311_v29 = vsel %vm308_vm9, %v310_v27, %v306_v28  ;;  %v421_v28 = vld [vmem:[#allocation2] sm:$0x30] }
 0x13b   :  { %v314_v30 = vmul.f32 %v313_v26, %v311_v29  ;;  %v317_v34 = vsub.f32 1.0, %v311_v29  ;;  %v323_v36 = vmul.f32 0.0, %v311_v29 }
 0x13d   :  { %v315_v32 = vadd.f32 %v314_v30, %v249_v31 }
 0x13f   :  { %2041 = vtanh.f32 %v315_v32 }
 0x145   :  { %v2042_v33 = vpop.eup %2041 }
 0x146   :  { %319 = vrot.lane.b32.xlu0 %v2042_v33, %s2276_s4 }
 0x1b8   :  { %v320_v35 = vpop.permute.xlu0 %319 }
 0x1b9   :  { %v322_v37 = vmul.f32 %v320_v35, %v317_v34 }
 0x1bb   :  { %v324_v38 = vadd.f32 %v323_v36, %v322_v37 }
 0x1bd   :  { %326 = vrot.lane.b32.xlu0 %v324_v38, %s2276_s4  ;;  %v411_v57 = vrot.slane %v324_v38, 6 }
 0x22f   :  { %v327_v39 = vpop.permute.xlu0 %326 }
 0x230   :  { %330 = vst.msk [vmem:[#allocation4] sm:$0x3] %vm329_vm10, %v327_v39  ;;  %1965 = vmatmul.msk.f32.vlgmr.msrb.gmra.mxu0 %vm224_vm5, %v327_v39  ;;  %1966 = vmatmul.msk.f32.vlgmr.msrb.gmra.mxu1 %vm224_vm5, %v327_v39 }
 0x231   :  { %704 = vmatpush.msrb.mxu0 %v2365_v1  ;;  %724 = vmatpush.msrb.mxu1 %v2404_v12 }
 0x233   :  { %705 = vmatpush.msrb.mxu0 %v2367_v2  ;;  %725 = vmatpush.msrb.mxu1 %v2406_v13 }
 0x235   :  { %706 = vmatpush.msrb.mxu0 %v2370_v3  ;;  %726 = vmatpush.msrb.mxu1 %v2410_v14 }
 0x237   :  { %707 = vmatpush.msrb.mxu0 %v2374_v4  ;;  %727 = vmatpush.msrb.mxu1 %v2416_v16 }
 0x239   :  { %708 = vmatpush.msrb.mxu0 %v2377_v5  ;;  %728 = vmatpush.msrb.mxu1 %v2422_v17 }
 0x23b   :  { %709 = vmatpush.msrb.mxu0 %v2385_v8  ;;  %729 = vmatpush.msrb.mxu1 %v2427_v18 }
 0x23d   :  { %710 = vmatpush.msrb.mxu0 %v2391_v9  ;;  %730 = vmatpush.msrb.mxu1 %v2432_v21 }
 0x23f   :  { %711 = vmatpush.msrb.mxu0 %v2395_v10  ;;  %731 = vmatpush.msrb.mxu1 %v2437_v22 }
 0x2ad   :  { %v352_v40 = vpop.f32.mrf.mxu0  ;;  %v372_v49 = vpop.f32.mrf.mxu1 }
 0x2ae   :  { %v376_v41 = vrot.slane %v352_v40, 6  ;;  %v398_v54 = vadd.f32 %v2512_v7, %v372_v49 }
 0x2b0   :  { %v378_v43 = vadd.f32 %v376_v41, %v331_v42  ;;  %v400_v59 = vrot.slane %v398_v54, 6 }
 0x2b2   :  { %v1967_v44 = vmul.f32 -1.442695, %v378_v43 }
 0x2b4   :  { %2043 = vpow2.f32 %v1967_v44 }
 0x2ba   :  { %v2044_v45 = vpop.eup %2043 }
 0x2bb   :  { %v382_v46 = vadd.f32 1.0, %v2044_v45 }
 0x2bd   :  { %2045 = vrcp.f32 %v382_v46  ;;  %v394_v51 = vand.u32 2147483648, %v382_v46  ;;  %v392_v53 = vand.u32 2147483647, %v382_v46  ;;  %vm388_vm12 = vweird.f32 %v382_v46 }
 0x2bf   :  { %v395_v56 = vor.u32 1.1754944e-38, %v394_v51  ;;  %vm393_vm14 = vcmp.eq.f32.partialorder %v392_v53, 8.507059e+37 }
 0x2c3   :  { %v2046_v47 = vpop.eup %2045 }
 0x2c4   :  { %v384_v48 = vmul.f32 %v2046_v47, %v382_v46  ;;  %vm389_vm11 = vweird.f32 %v2046_v47 }
 0x2c5   :  { %vm390_vm13 = vmor %vm388_vm12, %vm389_vm11 }
 0x2c6   :  { %v385_v50 = vsub.f32 1.0, %v384_v48 }
 0x2c8   :  { %v386_v52 = vmul.f32 %v2046_v47, %v385_v50 }
 0x2ca   :  { %v387_v55 = vadd.f32 %v2046_v47, %v386_v52 }
 0x2cc   :  { %v391_v58 = vsel %vm390_vm13, %v2046_v47, %v387_v55  ;;  %v422_v47 = vld [vmem:[#allocation2 + $0x8] sm:$0x30] }
 0x2cd   :  { %v396_v60 = vsel %vm393_vm14, %v395_v56, %v391_v58 }
 0x2ce   :  { %v402_v61 = vmul.f32 %v400_v59, %v396_v60  ;;  %v413_v62 = vmul.f32 %v411_v57, %v396_v60  ;;  %v405_v15 = vsub.f32 1.0, %v396_v60 }
 0x2d0   :  { %v403_v0 = vadd.f32 %v402_v61, %v332_v63  ;;  %v515_v63 = vld [vmem:[#allocation2 + $0x8] sm:$0xc0] }
 0x2d2   :  { %2047 = vtanh.f32 %v403_v0 }
 0x2d8   :  { %v2048_v6 = vpop.eup %2047 }
 0x2d9   :  { %407 = vrot.lane.b32.xlu1 %v2048_v6, %s2276_s4 }
 0x34b   :  { %v408_v19 = vpop.permute.xlu1 %407 }
 0x34c   :  { %v410_v20 = vmul.f32 %v408_v19, %v405_v15 }
 0x34e   :  { %v2538_v23 = vadd.f32 %v413_v62, %v410_v20 }
 0x350   :  { %v423_v24 = vrot.slane %v2538_v23, 2  ;;  %v504_v51 = vrot.slane %v2538_v23, 6 }
 0x352   :  { %424 = vrot.lane.b32.xlu2 %v423_v24, %s2276_s4 }
 0x3ac   :  { %v425_v25 = vpop.permute.xlu2 %424 }
 0x3ad   :  { %1968 = vmatmul.msk.f32.vlgmr.msrb.gmra.mxu2 %vm224_vm5, %v425_v25  ;;  %1969 = vmatmul.msk.f32.vlgmr.msrb.gmra.mxu3 %vm224_vm5, %v425_v25 }
 0x3ae   :  { %796 = vmatpush.msrb.mxu2 %v2365_v1  ;;  %816 = vmatpush.msrb.mxu3 %v2404_v12 }
 0x3b0   :  { %797 = vmatpush.msrb.mxu2 %v2367_v2  ;;  %817 = vmatpush.msrb.mxu3 %v2406_v13 }
 0x3b2   :  { %798 = vmatpush.msrb.mxu2 %v2370_v3  ;;  %818 = vmatpush.msrb.mxu3 %v2410_v14 }
 0x3b4   :  { %799 = vmatpush.msrb.mxu2 %v2374_v4  ;;  %819 = vmatpush.msrb.mxu3 %v2416_v16 }
 0x3b6   :  { %800 = vmatpush.msrb.mxu2 %v2377_v5  ;;  %820 = vmatpush.msrb.mxu3 %v2422_v17 }
 0x3b8   :  { %801 = vmatpush.msrb.mxu2 %v2385_v8  ;;  %821 = vmatpush.msrb.mxu3 %v2427_v18 }
 0x3ba   :  { %802 = vmatpush.msrb.mxu2 %v2391_v9  ;;  %822 = vmatpush.msrb.mxu3 %v2432_v21 }
 0x3bc   :  { %803 = vmatpush.msrb.mxu2 %v2395_v10  ;;  %823 = vmatpush.msrb.mxu3 %v2437_v22 }
 0x430   :  { %v445_v26 = vpop.f32.mrf.mxu2  ;;  %v465_v35 = vpop.f32.mrf.mxu3 }
 0x431   :  { %v469_v27 = vrot.slane %v445_v26, 4  ;;  %v491_v40 = vadd.f32 %v2512_v7, %v465_v35 }
 0x433   :  { %v471_v29 = vadd.f32 %v469_v27, %v421_v28  ;;  %v493_v44 = vrot.slane %v491_v40, 4 }
 0x435   :  { %v1970_v30 = vmul.f32 -1.442695, %v471_v29  ;;  %v607_v29 = vld [vmem:[#allocation2 + $0x10] sm:$0x3] }
 0x437   :  { %2049 = vpow2.f32 %v1970_v30 }
 0x43d   :  { %v2050_v31 = vpop.eup %2049 }
 0x43e   :  { %v475_v32 = vadd.f32 1.0, %v2050_v31 }
 0x440   :  { %2051 = vrcp.f32 %v475_v32  ;;  %v487_v37 = vand.u32 2147483648, %v475_v32  ;;  %v485_v39 = vand.u32 2147483647, %v475_v32  ;;  %vm481_vm0 = vweird.f32 %v475_v32 }
 0x442   :  { %v488_v42 = vor.u32 1.1754944e-38, %v487_v37  ;;  %vm486_vm6 = vcmp.eq.f32.partialorder %v485_v39, 8.507059e+37 }
 0x446   :  { %v2052_v33 = vpop.eup %2051 }
 0x447   :  { %v477_v34 = vmul.f32 %v2052_v33, %v475_v32  ;;  %vm482_vm15 = vweird.f32 %v2052_v33 }
 0x448   :  { %vm483_vm4 = vmor %vm481_vm0, %vm482_vm15 }
 0x449   :  { %v478_v36 = vsub.f32 1.0, %v477_v34 }
 0x44b   :  { %v479_v38 = vmul.f32 %v2052_v33, %v478_v36 }
 0x44d   :  { %v480_v41 = vadd.f32 %v2052_v33, %v479_v38 }
 0x44f   :  { %v484_v43 = vsel %vm483_vm4, %v2052_v33, %v480_v41 }
 0x450   :  { %v489_v45 = vsel %vm486_vm6, %v488_v42, %v484_v43 }
 0x451   :  { %v495_v46 = vmul.f32 %v493_v44, %v489_v45  ;;  %v498_v50 = vsub.f32 1.0, %v489_v45  ;;  %v506_v53 = vmul.f32 %v504_v51, %v489_v45 }
 0x453   :  { %v496_v48 = vadd.f32 %v495_v46, %v422_v47 }
 0x455   :  { %2053 = vtanh.f32 %v496_v48  ;;  %v608_v48 = vld [vmem:[#allocation2 + $0x18] sm:$0x3] }
 0x45b   :  { %v2054_v49 = vpop.eup %2053 }
 0x45c   :  { %500 = vrot.lane.b32.xlu0 %v2054_v49, %s2276_s4 }
 0x4ce   :  { %v501_v52 = vpop.permute.xlu0 %500 }
 0x4cf   :  { %v503_v54 = vmul.f32 %v501_v52, %v498_v50 }
 0x4d1   :  { %v2563_v55 = vadd.f32 %v506_v53, %v503_v54 }
 0x4d3   :  { %v516_v56 = vrot.slane %v2563_v55, 4  ;;  %v597_v19 = vrot.slane %v2563_v55, 6 }
 0x4d5   :  { %517 = vrot.lane.b32.xlu1 %v516_v56, %s2276_s4 }
 0x547   :  { %v518_v57 = vpop.permute.xlu1 %517 }
 0x548   :  { %1971 = vmatmul.msk.f32.vlgmr.msra.gmra.mxu0 %vm224_vm5, %v518_v57  ;;  %1972 = vmatmul.msk.f32.vlgmr.msra.gmra.mxu1 %vm224_vm5, %v518_v57 }
 0x549   :  { %888 = vmatpush.msra.mxu0 %v2365_v1  ;;  %908 = vmatpush.msra.mxu1 %v2404_v12 }
 0x54b   :  { %889 = vmatpush.msra.mxu0 %v2367_v2  ;;  %909 = vmatpush.msra.mxu1 %v2406_v13 }
 0x54d   :  { %890 = vmatpush.msra.mxu0 %v2370_v3  ;;  %910 = vmatpush.msra.mxu1 %v2410_v14  ;;  %v514_v3 = vld [vmem:[#allocation2] sm:$0xc0] }
 0x54f   :  { %891 = vmatpush.msra.mxu0 %v2374_v4  ;;  %911 = vmatpush.msra.mxu1 %v2416_v16 }
 0x551   :  { %892 = vmatpush.msra.mxu0 %v2377_v5  ;;  %912 = vmatpush.msra.mxu1 %v2422_v17 }
 0x553   :  { %893 = vmatpush.msra.mxu0 %v2385_v8  ;;  %913 = vmatpush.msra.mxu1 %v2427_v18 }
 0x555   :  { %894 = vmatpush.msra.mxu0 %v2391_v9  ;;  %914 = vmatpush.msra.mxu1 %v2432_v21 }
 0x557   :  { %895 = vmatpush.msra.mxu0 %v2395_v10  ;;  %915 = vmatpush.msra.mxu1 %v2437_v22 }
 0x5c5   :  { %v538_v1 = vpop.f32.mrf.mxu0  ;;  %v558_v16 = vpop.f32.mrf.mxu1 }
 0x5c6   :  { %v562_v2 = vrot.slane %v538_v1, 2  ;;  %v584_v10 = vadd.f32 %v2512_v7, %v558_v16 }
 0x5c8   :  { %v564_v4 = vadd.f32 %v562_v2, %v514_v3  ;;  %v586_v60 = vrot.slane %v584_v10, 2  ;;  %v692_v3 = vld [vmem:[#allocation2 + $0x10] sm:$0xc] }
 0x5ca   :  { %v1973_v12 = vmul.f32 -1.442695, %v564_v4 }
 0x5cc   :  { %2055 = vpow2.f32 %v1973_v12 }
 0x5d2   :  { %v2056_v5 = vpop.eup %2055 }
 0x5d3   :  { %v568_v13 = vadd.f32 1.0, %v2056_v5 }
 0x5d5   :  { %2057 = vrcp.f32 %v568_v13  ;;  %v580_v9 = vand.u32 2147483648, %v568_v13  ;;  %v578_v21 = vand.u32 2147483647, %v568_v13  ;;  %vm574_vm8 = vweird.f32 %v568_v13 }
 0x5d7   :  { %v581_v58 = vor.u32 1.1754944e-38, %v580_v9  ;;  %vm579_vm11 = vcmp.eq.f32.partialorder %v578_v21, 8.507059e+37 }
 0x5db   :  { %v2058_v8 = vpop.eup %2057 }
 0x5dc   :  { %v570_v14 = vmul.f32 %v2058_v8, %v568_v13  ;;  %vm575_vm7 = vweird.f32 %v2058_v8 }
 0x5dd   :  { %vm576_vm9 = vmor %vm574_vm8, %vm575_vm7 }
 0x5de   :  { %v571_v17 = vsub.f32 1.0, %v570_v14 }
 0x5e0   :  { %v572_v18 = vmul.f32 %v2058_v8, %v571_v17 }
 0x5e2   :  { %v573_v22 = vadd.f32 %v2058_v8, %v572_v18 }
 0x5e4   :  { %v577_v59 = vsel %vm576_vm9, %v2058_v8, %v573_v22 }
 0x5e5   :  { %v582_v61 = vsel %vm579_vm11, %v581_v58, %v577_v59 }
 0x5e6   :  { %v588_v62 = vmul.f32 %v586_v60, %v582_v61  ;;  %v591_v15 = vsub.f32 1.0, %v582_v61  ;;  %v599_v24 = vmul.f32 %v597_v19, %v582_v61 }
 0x5e8   :  { %v589_v0 = vadd.f32 %v588_v62, %v515_v63 }
 0x5ea   :  { %2059 = vtanh.f32 %v589_v0 }
 0x5f0   :  { %v2060_v6 = vpop.eup %2059 }
 0x5f1   :  { %593 = vrot.lane.b32.xlu2 %v2060_v6, %s2276_s4  ;;  %v693_v6 = vld [vmem:[#allocation2 + $0x18] sm:$0xc] }
 0x64b   :  { %v594_v20 = vpop.permute.xlu2 %593 }
 0x64c   :  { %v596_v25 = vmul.f32 %v594_v20, %v591_v15 }
 0x64e   :  { %v2588_v26 = vadd.f32 %v599_v24, %v596_v25 }
 0x650   :  { %v609_v27 = vrot.slane %v2588_v26, 6 }
 0x652   :  { %610 = vrot.lane.b32.xlu0 %v609_v27, %s2276_s4 }
 0x6c4   :  { %v611_v28 = vpop.permute.xlu0 %610 }
 0x6c5   :  { %1974 = vmatmul.msk.f32.vlgmr.msra.gmra.mxu2 %vm224_vm5, %v611_v28  ;;  %1975 = vmatmul.msk.f32.vlgmr.msra.gmra.mxu3 %vm224_vm5, %v611_v28 }
 0x748   :  { %v631_v30 = vpop.f32.mrf.mxu2  ;;  %v651_v41 = vpop.f32.mrf.mxu3 }
 0x749   :  { %v654_v31 = vadd.f32 %v631_v30, %v607_v29  ;;  %v674_v45 = vadd.f32 %v2512_v7, %v651_v41 }
 0x74b   :  { %v1976_v32 = vmul.f32 -1.442695, %v654_v31 }
 0x74d   :  { %2061 = vpow2.f32 %v1976_v32  ;;  %v781_v32 = vld [vmem:[#allocation2 + $0x10] sm:$0x30] }
 0x753   :  { %v2062_v33 = vpop.eup %2061 }
 0x754   :  { %v658_v34 = vadd.f32 1.0, %v2062_v33 }
 0x756   :  { %2063 = vrcp.f32 %v658_v34  ;;  %v670_v38 = vand.u32 2147483648, %v658_v34  ;;  %v668_v40 = vand.u32 2147483647, %v658_v34  ;;  %vm664_vm13 = vweird.f32 %v658_v34 }
 0x758   :  { %v671_v43 = vor.u32 1.1754944e-38, %v670_v38  ;;  %vm669_vm15 = vcmp.eq.f32.partialorder %v668_v40, 8.507059e+37 }
 0x75c   :  { %v2064_v35 = vpop.eup %2063 }
 0x75d   :  { %v660_v36 = vmul.f32 %v2064_v35, %v658_v34  ;;  %vm665_vm12 = vweird.f32 %v2064_v35 }
 0x75e   :  { %vm666_vm14 = vmor %vm664_vm13, %vm665_vm12  ;;  %vm419_vm13 = vcmask 519170  }
 0x75f   :  { %v661_v37 = vsub.f32 1.0, %v660_v36 }
 0x761   :  { %v662_v39 = vmul.f32 %v2064_v35, %v661_v37 }
 0x763   :  { %v663_v42 = vadd.f32 %v2064_v35, %v662_v39 }
 0x765   :  { %v667_v44 = vsel %vm666_vm14, %v2064_v35, %v663_v42  ;;  %vm512_vm14 = vcmask 521220  }
 0x766   :  { %v672_v46 = vsel %vm669_vm15, %v671_v43, %v667_v44 }
 0x767   :  { %v675_v47 = vmul.f32 %v674_v45, %v672_v46  ;;  %v678_v51 = vsub.f32 1.0, %v672_v46  ;;  %v685_v53 = vmul.f32 %v672_v46, %v609_v27 }
 0x769   :  { %v676_v49 = vadd.f32 %v675_v47, %v608_v48 }
 0x76b   :  { %2065 = vtanh.f32 %v676_v49 }
 0x771   :  { %v2066_v50 = vpop.eup %2065 }
 0x772   :  { %680 = vrot.lane.b32.xlu1 %v2066_v50, %s2276_s4 }
 0x7e4   :  { %v681_v52 = vpop.permute.xlu1 %680 }
 0x7e5   :  { %v683_v54 = vmul.f32 %v681_v52, %v678_v51  ;;  %v782_v51 = vld [vmem:[#allocation2 + $0x18] sm:$0x30] }
 0x7e7   :  { %v686_v56 = vadd.f32 %v685_v53, %v683_v54 }
 0x7e9   :  { %688 = vrot.lane.b32.xlu2 %v686_v56, %s2276_s4  ;;  %v772_v59 = vrot.slane %v686_v56, 6 }
 0x843   :  { %v689_v57 = vpop.permute.xlu2 %688 }
 0x844   :  { %691 = vst.msk [vmem:[#allocation4 + $0x8] sm:$0x3] %vm329_vm10, %v689_v57  ;;  %1977 = vmatmul.msk.f32.vlgmr.msrb.gmra.mxu0 %vm224_vm5, %v689_v57  ;;  %1978 = vmatmul.msk.f32.vlgmr.msrb.gmra.mxu1 %vm224_vm5, %v689_v57 }
 0x8c1   :  { %v713_v1 = vpop.f32.mrf.mxu0  ;;  %v733_v16 = vpop.f32.mrf.mxu1 }
 0x8c2   :  { %v737_v2 = vrot.slane %v713_v1, 6  ;;  %v759_v10 = vadd.f32 %v2512_v7, %v733_v16 }
 0x8c4   :  { %v739_v4 = vadd.f32 %v737_v2, %v692_v3  ;;  %v761_v61 = vrot.slane %v759_v10, 6 }
 0x8c6   :  { %v1979_v12 = vmul.f32 -1.442695, %v739_v4 }
 0x8c8   :  { %2067 = vpow2.f32 %v1979_v12 }
 0x8ce   :  { %v2068_v5 = vpop.eup %2067 }
 0x8cf   :  { %v743_v13 = vadd.f32 1.0, %v2068_v5 }
 0x8d1   :  { %2069 = vrcp.f32 %v743_v13  ;;  %v755_v9 = vand.u32 2147483648, %v743_v13  ;;  %v753_v21 = vand.u32 2147483647, %v743_v13  ;;  %vm749_vm4 = vweird.f32 %v743_v13 }
 0x8d3   :  { %v756_v58 = vor.u32 1.1754944e-38, %v755_v9  ;;  %vm754_vm7 = vcmp.eq.f32.partialorder %v753_v21, 8.507059e+37 }
 0x8d7   :  { %v2070_v8 = vpop.eup %2069 }
 0x8d8   :  { %v745_v14 = vmul.f32 %v2070_v8, %v743_v13  ;;  %vm750_vm0 = vweird.f32 %v2070_v8 }
 0x8d9   :  { %vm751_vm6 = vmor %vm749_vm4, %vm750_vm0 }
 0x8da   :  { %v746_v17 = vsub.f32 1.0, %v745_v14 }
 0x8dc   :  { %v747_v18 = vmul.f32 %v2070_v8, %v746_v17  ;;  %v873_v17 = vld [vmem:[#allocation2 + $0x10] sm:$0xc0] }
 0x8de   :  { %v748_v22 = vadd.f32 %v2070_v8, %v747_v18 }
 0x8e0   :  { %v752_v60 = vsel %vm751_vm6, %v2070_v8, %v748_v22 }
 0x8e1   :  { %v757_v62 = vsel %vm754_vm7, %v756_v58, %v752_v60  ;;  %vm605_vm7 = vcmask 523270  }
 0x8e2   :  { %v763_v63 = vmul.f32 %v761_v61, %v757_v62  ;;  %v774_v0 = vmul.f32 %v772_v59, %v757_v62  ;;  %v766_v20 = vsub.f32 1.0, %v757_v62 }
 0x8e4   :  { %v764_v15 = vadd.f32 %v763_v63, %v693_v6 }
 0x8e6   :  { %2071 = vtanh.f32 %v764_v15 }
 0x8ec   :  { %v2072_v19 = vpop.eup %2071 }
 0x8ed   :  { %768 = vrot.lane.b32.xlu0 %v2072_v19, %s2276_s4 }
 0x95f   :  { %v769_v24 = vpop.permute.xlu0 %768 }
 0x960   :  { %v771_v25 = vmul.f32 %v769_v24, %v766_v20 }
 0x962   :  { %v775_v27 = vadd.f32 %v774_v0, %v771_v25 }
 0x964   :  { %v783_v28 = vrot.slane %v775_v27, 2  ;;  %v864_v56 = vrot.slane %v775_v27, 6 }
 0x966   :  { %784 = vrot.lane.b32.xlu1 %v783_v28, %s2276_s4  ;;  %v874_v28 = vld [vmem:[#allocation2 + $0x18] sm:$0xc0] }
 0x9d8   :  { %v785_v29 = vpop.permute.xlu1 %784 }
 0x9d9   :  { %1980 = vmatmul.msk.f32.vlgmr.msrb.gmra.mxu2 %vm224_vm5, %v785_v29  ;;  %1981 = vmatmul.msk.f32.vlgmr.msrb.gmra.mxu3 %vm224_vm5, %v785_v29 }
 0xa5c   :  { %v805_v30 = vpop.f32.mrf.mxu2  ;;  %v825_v39 = vpop.f32.mrf.mxu3 }
 0xa5d   :  { %v829_v31 = vrot.slane %v805_v30, 4  ;;  %v851_v44 = vadd.f32 %v2512_v7, %v825_v39  ;;  %v998_v39 = vld [vmem:[#allocation9 + $0x78] sm:$0xff] }
 0xa5e   :  { %1102 = vmatpush.msrb.mxu1 %v998_v39 }
 0xa5f   :  { %v831_v33 = vadd.f32 %v829_v31, %v781_v32  ;;  %v853_v48 = vrot.slane %v851_v44, 4  ;;  %v1013_v31 = vld [vmem:[#allocation11 + $0x70] sm:$0xff]  ;;  %v1014_v32 = vld [vmem:[#allocation11 + $0x78] sm:$0xff]  ;;  %v1007_v44 = vld [vmem:[#allocation11 + $0x40] sm:$0xff] }
 0xa60   :  { %1029 = vmatpush.msra.mxu2 %v1013_v31  ;;  %1052 = vmatpush.msra.mxu3 %v1014_v32 }
 0xa61   :  { %v1982_v34 = vmul.f32 -1.442695, %v831_v33 }
 0xa63   :  { %2073 = vpow2.f32 %v1982_v34 }
 0xa69   :  { %v2074_v35 = vpop.eup %2073 }
 0xa6a   :  { %v835_v36 = vadd.f32 1.0, %v2074_v35 }
 0xa6c   :  { %2075 = vrcp.f32 %v835_v36  ;;  %v847_v41 = vand.u32 2147483648, %v835_v36  ;;  %v845_v43 = vand.u32 2147483647, %v835_v36  ;;  %vm841_vm9 = vweird.f32 %v835_v36 }
 0xa6e   :  { %v848_v46 = vor.u32 1.1754944e-38, %v847_v41  ;;  %vm846_vm12 = vcmp.eq.f32.partialorder %v845_v43, 8.507059e+37  ;;  %v1010_v41 = vld [vmem:[#allocation11 + $0x58] sm:$0xff]  ;;  %v996_v43 = vld [vmem:[#allocation9 + $0x68] sm:$0xff] }
 0xa6f   :  { %1103 = vmatpush.msrb.mxu1 %v996_v43 }
 0xa72   :  { %v2076_v37 = vpop.eup %2075 }
 0xa73   :  { %v837_v38 = vmul.f32 %v2076_v37, %v835_v36  ;;  %vm842_vm8 = vweird.f32 %v2076_v37  ;;  %v1011_v36 = vld [vmem:[#allocation11 + $0x60] sm:$0xff] }
 0xa74   :  { %vm843_vm11 = vmor %vm841_vm9, %vm842_vm8  ;;  %1030 = vmatpush.msra.mxu2 %v1011_v36 }
 0xa75   :  { %v838_v40 = vsub.f32 1.0, %v837_v38  ;;  %v997_v38 = vld [vmem:[#allocation9 + $0x70] sm:$0xff] }
 0xa76   :  { %1079 = vmatpush.msrb.mxu0 %v997_v38 }
 0xa77   :  { %v839_v42 = vmul.f32 %v2076_v37, %v838_v40  ;;  %v1009_v40 = vld [vmem:[#allocation11 + $0x50] sm:$0xff] }
 0xa78   :  { %1031 = vmatpush.msra.mxu2 %v1009_v40 }
 0xa79   :  { %v840_v45 = vadd.f32 %v2076_v37, %v839_v42  ;;  %v995_v42 = vld [vmem:[#allocation9 + $0x60] sm:$0xff] }
 0xa7a   :  { %1080 = vmatpush.msrb.mxu0 %v995_v42  ;;  %1032 = vmatpush.msra.mxu2 %v1007_v44 }
 0xa7b   :  { %v844_v47 = vsel %vm843_vm11, %v2076_v37, %v840_v45  ;;  %v1012_v37 = vld [vmem:[#allocation11 + $0x68] sm:$0xff] }
 0xa7c   :  { %v849_v49 = vsel %vm846_vm12, %v848_v46, %v844_v47  ;;  %1053 = vmatpush.msra.mxu3 %v1012_v37  ;;  %v1008_v45 = vld [vmem:[#allocation11 + $0x48] sm:$0xff]  ;;  %v993_v46 = vld [vmem:[#allocation9 + $0x50] sm:$0xff]  ;;  %v994_v47 = vld [vmem:[#allocation9 + $0x58] sm:$0xff] }
 0xa7d   :  { %v855_v50 = vmul.f32 %v853_v48, %v849_v49  ;;  %v858_v54 = vsub.f32 1.0, %v849_v49  ;;  %v866_v1 = vmul.f32 %v864_v56, %v849_v49  ;;  %v1006_v48 = vld [vmem:[#allocation11 + $0x38] sm:$0xff]  ;;  %v991_v49 = vld [vmem:[#allocation9 + $0x40] sm:$0xff]  ;;  %1081 = vmatpush.msrb.mxu0 %v993_v46  ;;  %1104 = vmatpush.msrb.mxu1 %v994_v47  ;;  %v1001_v56 = vld [vmem:[#allocation11 + $0x10] sm:$0xff] }
 0xa7e   :  { %1054 = vmatpush.msra.mxu3 %v1010_v41 }
 0xa7f   :  { %v856_v52 = vadd.f32 %v855_v50, %v782_v51  ;;  %v992_v50 = vld [vmem:[#allocation9 + $0x48] sm:$0xff]  ;;  %1082 = vmatpush.msrb.mxu0 %v991_v49  ;;  %v1003_v51 = vld [vmem:[#allocation11 + $0x20] sm:$0xff] }
 0xa80   :  { %1055 = vmatpush.msra.mxu3 %v1008_v45  ;;  %1105 = vmatpush.msrb.mxu1 %v992_v50 }
 0xa81   :  { %2077 = vtanh.f32 %v856_v52  ;;  %v1004_v52 = vld [vmem:[#allocation11 + $0x28] sm:$0xff] }
 0xa82   :  { %1056 = vmatpush.msra.mxu3 %v1006_v48 }
 0xa84   :  { %1057 = vmatpush.msra.mxu3 %v1004_v52 }
 0xa87   :  { %v2078_v53 = vpop.eup %2077 }
 0xa88   :  { %860 = vrot.lane.b32.xlu2 %v2078_v53, %s2276_s4  ;;  %v989_v53 = vld [vmem:[#allocation9 + $0x30] sm:$0xff] }
 0xa89   :  { %1083 = vmatpush.msrb.mxu0 %v989_v53 }
 0xa90   :  { %777 = vrot.lane.b32.xlu2 %v775_v27, %s2276_s4 }
 0xa98   :  { %416 = vrot.lane.b32.xlu2 %v2538_v23, %s2276_s4 }
 0xae2   :  { %v861_v57 = vpop.permute.xlu2 %860 }
 0xae3   :  { %v863_v2 = vmul.f32 %v861_v57, %v858_v54  ;;  %v990_v54 = vld [vmem:[#allocation9 + $0x38] sm:$0xff] }
 0xae4   :  { %v1002_v57 = vld [vmem:[#allocation11 + $0x18] sm:$0xff]  ;;  %1106 = vmatpush.msrb.mxu1 %v990_v54 }
 0xae5   :  { %v867_v3 = vadd.f32 %v866_v1, %v863_v2  ;;  %v987_v1 = vld [vmem:[#allocation9 + $0x20] sm:$0xff]  ;;  %v988_v2 = vld [vmem:[#allocation9 + $0x28] sm:$0xff]  ;;  %1058 = vmatpush.msra.mxu3 %v1002_v57 }
 0xae6   :  { %1084 = vmatpush.msrb.mxu0 %v987_v1  ;;  %1107 = vmatpush.msrb.mxu1 %v988_v2  ;;  %v2763_v2 = vld [vmem:[%s2910_s9] ss:$0 sm:$0xff]  ;;  %s2277_s9 = smov 96  }
 0xae7   :  { %v875_v4 = vrot.slane %v867_v3, 4  ;;  %v956_v20 = vrot.slane %v867_v3, 6 }
 0xae9   :  { %876 = vrot.lane.b32.xlu0 %v875_v4, %s2276_s4  ;;  %v1000_v4 = vld [vmem:[#allocation11 + $0x8] sm:$0xff] }
 0xaea   :  { %v778_v12 = vpop.permute.xlu2 %777  ;;  %1059 = vmatpush.msra.mxu3 %v1000_v4 }
 0xaeb   :  { %780 = vst.msk [vmem:[#allocation4 + $0x8] sm:$0xc] %vm419_vm13, %v778_v12  ;;  %v985_v12 = vld [vmem:[#allocation9 + $0x10] sm:$0xff] }
 0xaec   :  { %1085 = vmatpush.msrb.mxu0 %v985_v12 }
 0xaf1   :  { %869 = vrot.lane.b32.xlu0 %v867_v3, %s2276_s4  ;;  %v999_v3 = vld [vmem:[#allocation11] sm:$0xff] }
 0xaf2   :  { %v417_v5 = vpop.permute.xlu2 %416 }
 0xaf3   :  { %420 = vst.msk [vmem:[#allocation4] sm:$0xc] %vm419_vm13, %v417_v5  ;;  %v986_v5 = vld [vmem:[#allocation9 + $0x18] sm:$0xff] }
 0xaf4   :  { %1108 = vmatpush.msrb.mxu1 %v986_v5 }
 0xaf9   :  { %509 = vrot.lane.b32.xlu0 %v2563_v55, %s2276_s4 }
 0xb5b   :  { %v877_v23 = vpop.permute.xlu0 %876 }
 0xb5c   :  { %1983 = vmatmul.msk.f32.vlgmr.msra.gmra.mxu0 %vm224_vm5, %v877_v23  ;;  %1984 = vmatmul.msk.f32.vlgmr.msra.gmra.mxu1 %vm224_vm5, %v877_v23  ;;  %v2625_v23 = vld [vmem:[#allocation12 + $0x70] sm:$0xff] }
 0xb63   :  { %v870_v13 = vpop.permute.xlu0 %869 }
 0xb64   :  { %872 = vst.msk [vmem:[#allocation4 + $0x8] sm:$0x30] %vm512_vm14, %v870_v13  ;;  %v983_v13 = vld [vmem:[#allocation9] sm:$0xff] }
 0xb65   :  { %1086 = vmatpush.msrb.mxu0 %v983_v13 }
 0xb67   :  { %1242 = vmatpush.msra.mxu0 %v2625_v23 }
 0xb6b   :  { %v510_v8 = vpop.permute.xlu0 %509 }
 0xb6c   :  { %513 = vst.msk [vmem:[#allocation4] sm:$0x30] %vm512_vm14, %v510_v8  ;;  %v984_v8 = vld [vmem:[#allocation9 + $0x8] sm:$0xff] }
 0xb6d   :  { %1109 = vmatpush.msrb.mxu1 %v984_v8 }
 0xbd9   :  { %v897_v14 = vpop.f32.mrf.mxu0  ;;  %v917_v58 = vpop.f32.mrf.mxu1 }
 0xbda   :  { %v921_v16 = vrot.slane %v897_v14, 2  ;;  %v943_v63 = vadd.f32 %v2512_v7, %v917_v58  ;;  %v2627_v14 = vld [vmem:[#allocation12 + $0x60] sm:$0xff] }
 0xbdb   :  { %1243 = vmatpush.msra.mxu0 %v2627_v14 }
 0xbdc   :  { %v923_v9 = vadd.f32 %v921_v16, %v873_v17  ;;  %v945_v19 = vrot.slane %v943_v63, 2  ;;  %v2630_v16 = vld [vmem:[#allocation12 + $0x50] sm:$0xff]  ;;  %v2634_v17 = vld [vmem:[#allocation12 + $0x40] sm:$0xff] }
 0xbdd   :  { %1244 = vmatpush.msra.mxu0 %v2630_v16 }
 0xbde   :  { %v1985_v18 = vmul.f32 -1.442695, %v923_v9  ;;  %v2639_v9 = vld [vmem:[#allocation12 + $0x30] sm:$0xff] }
 0xbdf   :  { %1245 = vmatpush.msra.mxu0 %v2634_v17 }
 0xbe0   :  { %2079 = vpow2.f32 %v1985_v18  ;;  %v2642_v18 = vld [vmem:[#allocation12 + $0x20] sm:$0xff] }
 0xbe1   :  { %1246 = vmatpush.msra.mxu0 %v2639_v9 }
 0xbe3   :  { %1247 = vmatpush.msra.mxu0 %v2642_v18 }
 0xbe6   :  { %v2080_v21 = vpop.eup %2079 }
 0xbe7   :  { %v927_v55 = vadd.f32 1.0, %v2080_v21  ;;  %v2646_v21 = vld [vmem:[#allocation12 + $0x10] sm:$0xff] }
 0xbe8   :  { %1248 = vmatpush.msra.mxu0 %v2646_v21 }
 0xbe9   :  { %2081 = vrcp.f32 %v927_v55  ;;  %v939_v60 = vand.u32 2147483648, %v927_v55  ;;  %v937_v62 = vand.u32 2147483647, %v927_v55  ;;  %vm933_vm0 = vweird.f32 %v927_v55 }
 0xbeb   :  { %v940_v6 = vor.u32 1.1754944e-38, %v939_v60  ;;  %vm938_vm6 = vcmp.eq.f32.partialorder %v937_v62, 8.507059e+37  ;;  %v2668_v60 = vld [vmem:[#allocation12 + $0x48] sm:$0xff] }
 0xbec   :  { %v2676_v62 = vld [vmem:[#allocation12 + $0x28] sm:$0xff] }
 0xbef   :  { %v2082_v10 = vpop.eup %2081 }
 0xbf0   :  { %v929_v22 = vmul.f32 %v2082_v10, %v927_v55  ;;  %vm934_vm15 = vweird.f32 %v2082_v10  ;;  %v2650_v55 = vld [vmem:[#allocation12] sm:$0xff] }
 0xbf1   :  { %vm935_vm4 = vmor %vm933_vm0, %vm934_vm15  ;;  %1249 = vmatpush.msra.mxu0 %v2650_v55 }
 0xbf2   :  { %v930_v59 = vsub.f32 1.0, %v929_v22  ;;  %v2657_v22 = vld [vmem:[#allocation12 + $0x68] sm:$0xff] }
 0xbf4   :  { %v931_v61 = vmul.f32 %v2082_v10, %v930_v59  ;;  %v2662_v59 = vld [vmem:[#allocation12 + $0x58] sm:$0xff] }
 0xbf6   :  { %v932_v0 = vadd.f32 %v2082_v10, %v931_v61  ;;  %v2672_v61 = vld [vmem:[#allocation12 + $0x38] sm:$0xff] }
 0xbf8   :  { %v936_v15 = vsel %vm935_vm4, %v2082_v10, %v932_v0  ;;  %v2655_v10 = vld [vmem:[#allocation12 + $0x78] sm:$0xff] }
 0xbf9   :  { %v941_v24 = vsel %vm938_vm6, %v940_v6, %v936_v15  ;;  %1181 = vmatpush.msrb.mxu3 %v2655_v10  ;;  %1262 = vmatpush.msra.mxu1 %v2655_v10  ;;  %v2680_v6 = vld [vmem:[#allocation12 + $0x18] sm:$0xff] }
 0xbfa   :  { %v947_v25 = vmul.f32 %v945_v19, %v941_v24  ;;  %v958_v27 = vmul.f32 %v956_v20, %v941_v24  ;;  %v950_v7 = vsub.f32 1.0, %v941_v24  ;;  %v2685_v20 = vld [vmem:[#allocation12 + $0x8] sm:$0xff] }
 0xbfb   :  { %1182 = vmatpush.msrb.mxu3 %v2657_v22  ;;  %1263 = vmatpush.msra.mxu1 %v2657_v22 }
 0xbfc   :  { %v948_v29 = vadd.f32 %v947_v25, %v874_v28 }
 0xbfd   :  { %1183 = vmatpush.msrb.mxu3 %v2662_v59  ;;  %1264 = vmatpush.msra.mxu1 %v2662_v59 }
 0xbfe   :  { %2083 = vtanh.f32 %v948_v29 }
 0xbff   :  { %1184 = vmatpush.msrb.mxu3 %v2668_v60  ;;  %1265 = vmatpush.msra.mxu1 %v2668_v60 }
 0xc01   :  { %1185 = vmatpush.msrb.mxu3 %v2672_v61  ;;  %1266 = vmatpush.msra.mxu1 %v2672_v61 }
 0xc03   :  { %1186 = vmatpush.msrb.mxu3 %v2676_v62  ;;  %1267 = vmatpush.msra.mxu1 %v2676_v62 }
 0xc04   :  { %v2084_v30 = vpop.eup %2083 }
 0xc05   :  { %952 = vrot.lane.b32.xlu1 %v2084_v30, %s2276_s4  ;;  %1187 = vmatpush.msrb.mxu3 %v2680_v6 }
 0xc06   :  { %1268 = vmatpush.msra.mxu1 %v2680_v6 }
 0xc07   :  { %1188 = vmatpush.msrb.mxu3 %v2685_v20 }
 0xc08   :  { %1269 = vmatpush.msra.mxu1 %v2685_v20 }
 0xc77   :  { %v953_v33 = vpop.permute.xlu1 %952 }
 0xc78   :  { %v955_v34 = vmul.f32 %v953_v33, %v950_v7 }
 0xc7a   :  { %v959_v35 = vadd.f32 %v958_v27, %v955_v34 }
 0xc7c   :  { %961 = vrot.lane.b32.xlu1 %v959_v35, %s2276_s4 }
 0xc84   :  { %602 = vrot.lane.b32.xlu1 %v2588_v26, %s2276_s4  ;;  %v1005_v26 = vld [vmem:[#allocation11 + $0x30] sm:$0xff] }
 0xc85   :  { %1033 = vmatpush.msra.mxu2 %v1005_v26 }
 0xc87   :  { %1034 = vmatpush.msra.mxu2 %v1003_v51 }
 0xc89   :  { %1035 = vmatpush.msra.mxu2 %v1001_v56 }
 0xc8b   :  { %1036 = vmatpush.msra.mxu2 %v999_v3 }
 0xc8d   :  { %1161 = vmatpush.msrb.mxu2 %v2625_v23 }
 0xc8f   :  { %1162 = vmatpush.msrb.mxu2 %v2627_v14 }
 0xc91   :  { %1163 = vmatpush.msrb.mxu2 %v2630_v16 }
 0xc93   :  { %1164 = vmatpush.msrb.mxu2 %v2634_v17 }
 0xc95   :  { %1165 = vmatpush.msrb.mxu2 %v2639_v9 }
 0xc97   :  { %1166 = vmatpush.msrb.mxu2 %v2642_v18 }
 0xc99   :  { %1167 = vmatpush.msrb.mxu2 %v2646_v21 }
 0xc9b   :  { %1168 = vmatpush.msrb.mxu2 %v2650_v55 }
 0xcee   :  { %v962_v58 = vpop.permute.xlu1 %961 }
 0xcef   :  { %964 = vst.msk [vmem:[#allocation4 + $0x8] sm:$0xc0] %vm605_vm7, %v962_v58 }
 0xcf6   :  { %v603_v63 = vpop.permute.xlu1 %602  ;;  %v966_v0 = vld [vmem:[#allocation4 + $0x8] sm:$0xff] }
 0xcf7   :  { %606 = vst.msk [vmem:[#allocation4] sm:$0xc0] %vm605_vm7, %v603_v63  ;;  %v968_v15 = vrot.slane %v966_v0, 6  ;;  %v970_v19 = vrot.slane %v966_v0, 2 }
 0xcf9   :  { %v977_v24 = vsel %vm153_vm1, %v968_v15, %v970_v19 }
 0xcfa   :  { %v978_v25 = vsel %vm155_vm2, %v977_v24, %v968_v15 }
 0xcfb   :  { %v979_v27 = vsel %vm157_vm3, %v978_v25, %v970_v19 }
 0xcfc   :  { %1986 = vmatmul.msk.f32.vlgmr.msra.gmra.mxu2 %vm224_vm5, %v979_v27  ;;  %1988 = vmatmul.msk.f32.vlgmr.msra.gmra.mxu3 %vm224_vm5, %v979_v27 }
 0xcfd   :  { %1334 = vmatpush.msra.mxu2 %v2625_v23  ;;  %1354 = vmatpush.msra.mxu3 %v2655_v10 }
 0xcfe   :  { %v965_v28 = vld [vmem:[#allocation4] sm:$0xff] }
 0xcff   :  { %1990 = vmatmul.msk.f32.vlgmr.msrb.gmra.mxu0 %vm224_vm5, %v965_v28  ;;  %1992 = vmatmul.msk.f32.vlgmr.msrb.gmra.mxu1 %vm224_vm5, %v965_v28  ;;  %v973_v29 = vrot.slane %v965_v28, 6  ;;  %v975_v30 = vrot.slane %v965_v28, 2 }
 0xd00   :  { %1335 = vmatpush.msra.mxu2 %v2627_v14  ;;  %1355 = vmatpush.msra.mxu3 %v2657_v22 }
 0xd01   :  { %v980_v31 = vsel %vm153_vm1, %v973_v29, %v975_v30  ;;  %1426 = vmatpush.msrb.mxu0 %v2625_v23  ;;  %1446 = vmatpush.msrb.mxu1 %v2655_v10 }
 0xd02   :  { %v981_v32 = vsel %vm155_vm2, %v980_v31, %v973_v29  ;;  %1336 = vmatpush.msra.mxu2 %v2630_v16  ;;  %1356 = vmatpush.msra.mxu3 %v2662_v59 }
 0xd03   :  { %v982_v7 = vsel %vm157_vm3, %v981_v32, %v975_v30  ;;  %1427 = vmatpush.msrb.mxu0 %v2627_v14  ;;  %1447 = vmatpush.msrb.mxu1 %v2657_v22 }
 0xd04   :  { %1987 = vmatmul.msk.f32.gmra.mxu2 %vm224_vm5, %v982_v7  ;;  %1989 = vmatmul.msk.f32.gmra.mxu3 %vm224_vm5, %v982_v7 }
 0xd05   :  { %1337 = vmatpush.msra.mxu2 %v2634_v17  ;;  %1357 = vmatpush.msra.mxu3 %v2668_v60 }
 0xd06   :  { %1428 = vmatpush.msrb.mxu0 %v2630_v16  ;;  %1448 = vmatpush.msrb.mxu1 %v2662_v59 }
 0xd07   :  { %1991 = vmatmul.msk.f32.gmra.mxu0 %vm224_vm5, %v966_v0  ;;  %1993 = vmatmul.msk.f32.gmra.mxu1 %vm224_vm5, %v966_v0 }
 0xd08   :  { %1338 = vmatpush.msra.mxu2 %v2639_v9  ;;  %1358 = vmatpush.msra.mxu3 %v2672_v61 }
 0xd09   :  { %1429 = vmatpush.msrb.mxu0 %v2634_v17  ;;  %1449 = vmatpush.msrb.mxu1 %v2668_v60 }
 0xd0a   :  { %1339 = vmatpush.msra.mxu2 %v2642_v18  ;;  %1359 = vmatpush.msra.mxu3 %v2676_v62 }
 0xd0b   :  { %1430 = vmatpush.msrb.mxu0 %v2639_v9  ;;  %1450 = vmatpush.msrb.mxu1 %v2672_v61 }
 0xd0c   :  { %1169 = vmatmul.f32.vlgmr.msrb.gmra.mxu2 %v2275_v11  ;;  %1189 = vmatmul.f32.vlgmr.msrb.gmra.mxu3 %v2275_v11  ;;  %v1117_v11 = vld [vmem:[%s2909_s8] sm:$0x3] }
 0xd0d   :  { %1340 = vmatpush.msra.mxu2 %v2646_v21  ;;  %1360 = vmatpush.msra.mxu3 %v2680_v6  ;;  %v1119_v35 = vperm.slane %v1117_v11, 0  ;;  %v1120_v36 = vperm.slane %v1117_v11, 1 }
 0xd0e   :  { %1431 = vmatpush.msrb.mxu0 %v2642_v18  ;;  %1451 = vmatpush.msrb.mxu1 %v2676_v62 }
 0xd0f   :  { %1341 = vmatpush.msra.mxu2 %v2650_v55  ;;  %1361 = vmatpush.msra.mxu3 %v2685_v20 }
 0xd10   :  { %1432 = vmatpush.msrb.mxu0 %v2646_v21  ;;  %1452 = vmatpush.msrb.mxu1 %v2680_v6 }
 0xd11   :  { %1518 = vmatpush.msrb.mxu2 %v2625_v23  ;;  %1538 = vmatpush.msrb.mxu3 %v2655_v10 }
 0xd12   :  { %1433 = vmatpush.msrb.mxu0 %v2650_v55  ;;  %1453 = vmatpush.msrb.mxu1 %v2685_v20 }
 0xd13   :  { %1519 = vmatpush.msrb.mxu2 %v2627_v14  ;;  %1539 = vmatpush.msrb.mxu3 %v2657_v22 }
 0xd15   :  { %1520 = vmatpush.msrb.mxu2 %v2630_v16  ;;  %1540 = vmatpush.msrb.mxu3 %v2662_v59 }
 0xd17   :  { %1521 = vmatpush.msrb.mxu2 %v2634_v17  ;;  %1541 = vmatpush.msrb.mxu3 %v2668_v60 }
 0xd19   :  { %1522 = vmatpush.msrb.mxu2 %v2639_v9  ;;  %1542 = vmatpush.msrb.mxu3 %v2672_v61 }
 0xd1b   :  { %1523 = vmatpush.msrb.mxu2 %v2642_v18  ;;  %1543 = vmatpush.msrb.mxu3 %v2676_v62 }
 0xd1d   :  { %1524 = vmatpush.msrb.mxu2 %v2646_v21  ;;  %1544 = vmatpush.msrb.mxu3 %v2680_v6 }
 0xd1f   :  { %1525 = vmatpush.msrb.mxu2 %v2650_v55  ;;  %1545 = vmatpush.msrb.mxu3 %v2685_v20 }
 0xd7c   :  { %v1088_v33 = vpop.f32.mrf.mxu0  ;;  %v1111_v34 = vpop.f32.mrf.mxu1 }
 0xd7f   :  { %v1038_v37 = vpop.f32.mrf.mxu2  ;;  %v1061_v38 = vpop.f32.mrf.mxu3 }
 0xd80   :  { %v1089_v39 = vadd.f32 %v1088_v33, %v1038_v37  ;;  %v1112_v40 = vadd.f32 %v1111_v34, %v1061_v38 }
 0xd82   :  { %v1123_v41 = vadd.f32 %v1119_v35, %v1089_v39  ;;  %v1124_v42 = vadd.f32 %v1120_v36, %v1112_v40 }
 0xd84   :  { %1127 = vst [vmem:[#allocation3] sm:$0xff] %v1123_v41  ;;  %v1091_v43 = vpop.f32.mrf.mxu0  ;;  %v1114_v44 = vpop.f32.mrf.mxu1 }
 0xd85   :  { %1128 = vst.msk [vmem:[#allocation3 + $0x8] sm:$0xff] %vm224_vm5, %v1124_v42 }
 0xd87   :  { %v1041_v45 = vpop.f32.mrf.mxu2  ;;  %v1064_v46 = vpop.f32.mrf.mxu3 }
 0xd88   :  { %v1092_v47 = vadd.f32 %v1091_v43, %v1041_v45  ;;  %v1115_v26 = vadd.f32 %v1114_v44, %v1064_v46 }
 0xd8a   :  { %v1125_v48 = vadd.f32 %v1119_v35, %v1092_v47  ;;  %v1126_v49 = vadd.f32 %v1120_v36, %v1115_v26 }
 0xd8b   :  { %v1151_v50 = vld [vmem:[#allocation3] sm:$0x3]  ;;  %v1230_v34 = vld [vmem:[#allocation3] sm:$0xc] }
 0xd8c   :  { %1129 = vst [vmem:[#allocation3 + $0x10] sm:$0xff] %v1125_v48  ;;  %v1152_v24 = vld [vmem:[#allocation3 + $0x8] sm:$0x3] }
 0xd8d   :  { %1130 = vst.msk [vmem:[#allocation3 + $0x18] sm:$0xff] %vm224_vm5, %v1126_v49 }
 0xd8f   :  { %v1170_v51 = vpop.f32.mrf.mxu2  ;;  %v1190_v4 = vpop.f32.mrf.mxu3 }
 0xd90   :  { %v1193_v52 = vadd.f32 %v1170_v51, %v1151_v50  ;;  %v1213_v58 = vadd.f32 %v2763_v2, %v1190_v4 }
 0xd92   :  { %v1994_v53 = vmul.f32 -1.442695, %v1193_v52 }
 0xd94   :  { %2085 = vpow2.f32 %v1994_v53 }
 0xd9a   :  { %v2086_v54 = vpop.eup %2085 }
 0xd9b   :  { %v1197_v56 = vadd.f32 1.0, %v2086_v54  ;;  %v1231_v54 = vld [vmem:[#allocation3 + $0x8] sm:$0xc] }
 0xd9d   :  { %2087 = vrcp.f32 %v1197_v56  ;;  %v1209_v12 = vand.u32 2147483648, %v1197_v56  ;;  %v1207_v13 = vand.u32 2147483647, %v1197_v56  ;;  %vm1203_vm3 = vweird.f32 %v1197_v56 }
 0xd9f   :  { %v1210_v63 = vor.u32 1.1754944e-38, %v1209_v12  ;;  %vm1208_vm9 = vcmp.eq.f32.partialorder %v1207_v13, 8.507059e+37 }
 0xda3   :  { %v2088_v57 = vpop.eup %2087 }
 0xda4   :  { %v1199_v1 = vmul.f32 %v2088_v57, %v1197_v56  ;;  %vm1204_vm2 = vweird.f32 %v2088_v57 }
 0xda5   :  { %vm1205_vm8 = vmor %vm1203_vm3, %vm1204_vm2 }
 0xda6   :  { %v1200_v3 = vsub.f32 1.0, %v1199_v1 }
 0xda8   :  { %v1201_v5 = vmul.f32 %v2088_v57, %v1200_v3 }
 0xdaa   :  { %v1202_v8 = vadd.f32 %v2088_v57, %v1201_v5 }
 0xdac   :  { %v1206_v0 = vsel %vm1205_vm8, %v2088_v57, %v1202_v8 }
 0xdad   :  { %v1211_v15 = vsel %vm1208_vm9, %v1210_v63, %v1206_v0  ;;  %v1319_v63 = vld [vmem:[#allocation3] sm:$0x30] }
 0xdae   :  { %v1214_v19 = vmul.f32 %v1213_v58, %v1211_v15  ;;  %v1217_v28 = vsub.f32 1.0, %v1211_v15  ;;  %v1223_v30 = vmul.f32 0.0, %v1211_v15 }
 0xdb0   :  { %v1215_v25 = vadd.f32 %v1214_v19, %v1152_v24 }
 0xdb2   :  { %2089 = vtanh.f32 %v1215_v25 }
 0xdb8   :  { %v2090_v27 = vpop.eup %2089 }
 0xdb9   :  { %1219 = vrot.lane.b32.xlu2 %v2090_v27, %s2276_s4 }
 0xe13   :  { %v1220_v29 = vpop.permute.xlu2 %1219 }
 0xe14   :  { %v1222_v31 = vmul.f32 %v1220_v29, %v1217_v28 }
 0xe16   :  { %v1224_v32 = vadd.f32 %v1223_v30, %v1222_v31 }
 0xe18   :  { %1226 = vrot.lane.b32.xlu0 %v1224_v32, %s2276_s4  ;;  %v1310_v48 = vrot.slane %v1224_v32, 6 }
 0xe8a   :  { %v1227_v7 = vpop.permute.xlu0 %1226 }
 0xe8b   :  { %1229 = vst.msk [vmem:[#allocation5] sm:$0x3] %vm329_vm10, %v1227_v7  ;;  %1995 = vmatmul.msk.f32.vlgmr.msra.gmra.mxu0 %vm224_vm5, %v1227_v7  ;;  %1996 = vmatmul.msk.f32.vlgmr.msra.gmra.mxu1 %vm224_vm5, %v1227_v7 }
 0xe8c   :  { %1600 = vmatpush.msra.mxu0 %v2625_v23  ;;  %1620 = vmatpush.msra.mxu1 %v2655_v10 }
 0xe8e   :  { %1601 = vmatpush.msra.mxu0 %v2627_v14  ;;  %1621 = vmatpush.msra.mxu1 %v2657_v22 }
 0xe90   :  { %1602 = vmatpush.msra.mxu0 %v2630_v16  ;;  %1622 = vmatpush.msra.mxu1 %v2662_v59 }
 0xe92   :  { %1603 = vmatpush.msra.mxu0 %v2634_v17  ;;  %1623 = vmatpush.msra.mxu1 %v2668_v60 }
 0xe94   :  { %1604 = vmatpush.msra.mxu0 %v2639_v9  ;;  %1624 = vmatpush.msra.mxu1 %v2672_v61 }
 0xe96   :  { %1605 = vmatpush.msra.mxu0 %v2642_v18  ;;  %1625 = vmatpush.msra.mxu1 %v2676_v62 }
 0xe98   :  { %1606 = vmatpush.msra.mxu0 %v2646_v21  ;;  %1626 = vmatpush.msra.mxu1 %v2680_v6 }
 0xe9a   :  { %1607 = vmatpush.msra.mxu0 %v2650_v55  ;;  %1627 = vmatpush.msra.mxu1 %v2685_v20 }
 0xf08   :  { %v1251_v11 = vpop.f32.mrf.mxu0  ;;  %v1271_v41 = vpop.f32.mrf.mxu1 }
 0xf09   :  { %v1275_v33 = vrot.slane %v1251_v11, 6  ;;  %v1297_v46 = vadd.f32 %v2763_v2, %v1271_v41 }
 0xf0b   :  { %v1277_v35 = vadd.f32 %v1275_v33, %v1230_v34  ;;  %v1299_v50 = vrot.slane %v1297_v46, 6 }
 0xf0d   :  { %v1997_v36 = vmul.f32 -1.442695, %v1277_v35 }
 0xf0f   :  { %2091 = vpow2.f32 %v1997_v36 }
 0xf15   :  { %v2092_v37 = vpop.eup %2091 }
 0xf16   :  { %v1281_v38 = vadd.f32 1.0, %v2092_v37 }
 0xf18   :  { %2093 = vrcp.f32 %v1281_v38  ;;  %v1293_v43 = vand.u32 2147483648, %v1281_v38  ;;  %v1291_v45 = vand.u32 2147483647, %v1281_v38  ;;  %vm1287_vm12 = vweird.f32 %v1281_v38 }
 0xf1a   :  { %v1294_v26 = vor.u32 1.1754944e-38, %v1293_v43  ;;  %vm1292_vm0 = vcmp.eq.f32.partialorder %v1291_v45, 8.507059e+37 }
 0xf1e   :  { %v2094_v39 = vpop.eup %2093 }
 0xf1f   :  { %v1283_v40 = vmul.f32 %v2094_v39, %v1281_v38  ;;  %vm1288_vm11 = vweird.f32 %v2094_v39  ;;  %v1320_v38 = vld [vmem:[#allocation3 + $0x8] sm:$0x30] }
 0xf20   :  { %vm1289_vm15 = vmor %vm1287_vm12, %vm1288_vm11 }
 0xf21   :  { %v1284_v42 = vsub.f32 1.0, %v1283_v40 }
 0xf23   :  { %v1285_v44 = vmul.f32 %v2094_v39, %v1284_v42 }
 0xf25   :  { %v1286_v47 = vadd.f32 %v2094_v39, %v1285_v44 }
 0xf27   :  { %v1290_v49 = vsel %vm1289_vm15, %v2094_v39, %v1286_v47 }
 0xf28   :  { %v1295_v51 = vsel %vm1292_vm0, %v1294_v26, %v1290_v49 }
 0xf29   :  { %v1301_v52 = vmul.f32 %v1299_v50, %v1295_v51  ;;  %v1312_v53 = vmul.f32 %v1310_v48, %v1295_v51  ;;  %v1304_v1 = vsub.f32 1.0, %v1295_v51 }
 0xf2b   :  { %v1302_v56 = vadd.f32 %v1301_v52, %v1231_v54 }
 0xf2d   :  { %2095 = vtanh.f32 %v1302_v56 }
 0xf33   :  { %v2096_v57 = vpop.eup %2095 }
 0xf34   :  { %1306 = vrot.lane.b32.xlu1 %v2096_v57, %s2276_s4 }
 0xfa6   :  { %v1307_v3 = vpop.permute.xlu1 %1306 }
 0xfa7   :  { %v1309_v4 = vmul.f32 %v1307_v3, %v1304_v1 }
 0xfa9   :  { %v2789_v12 = vadd.f32 %v1312_v53, %v1309_v4  ;;  %v1412_v53 = vld [vmem:[#allocation3 + $0x8] sm:$0xc0] }
 0xfab   :  { %v1321_v5 = vrot.slane %v2789_v12, 2  ;;  %v1402_v42 = vrot.slane %v2789_v12, 6 }
 0xfad   :  { %1322 = vrot.lane.b32.xlu2 %v1321_v5, %s2276_s4 }
0x1007   :  { %v1323_v13 = vpop.permute.xlu2 %1322 }
0x1008   :  { %1998 = vmatmul.msk.f32.vlgmr.msra.gmra.mxu2 %vm224_vm5, %v1323_v13  ;;  %1999 = vmatmul.msk.f32.vlgmr.msra.gmra.mxu3 %vm224_vm5, %v1323_v13 }
0x1009   :  { %1692 = vmatpush.msra.mxu2 %v2625_v23  ;;  %1712 = vmatpush.msra.mxu3 %v2655_v10 }
0x100b   :  { %1693 = vmatpush.msra.mxu2 %v2627_v14  ;;  %1713 = vmatpush.msra.mxu3 %v2657_v22 }
0x100d   :  { %1694 = vmatpush.msra.mxu2 %v2630_v16  ;;  %1714 = vmatpush.msra.mxu3 %v2662_v59 }
0x100f   :  { %1695 = vmatpush.msra.mxu2 %v2634_v17  ;;  %1715 = vmatpush.msra.mxu3 %v2668_v60 }
0x1011   :  { %1696 = vmatpush.msra.mxu2 %v2639_v9  ;;  %1716 = vmatpush.msra.mxu3 %v2672_v61 }
0x1013   :  { %1697 = vmatpush.msra.mxu2 %v2642_v18  ;;  %1717 = vmatpush.msra.mxu3 %v2676_v62 }
0x1015   :  { %1698 = vmatpush.msra.mxu2 %v2646_v21  ;;  %1718 = vmatpush.msra.mxu3 %v2680_v6 }
0x1017   :  { %1699 = vmatpush.msra.mxu2 %v2650_v55  ;;  %1719 = vmatpush.msra.mxu3 %v2685_v20 }
0x108b   :  { %v1343_v8 = vpop.f32.mrf.mxu2  ;;  %v1363_v28 = vpop.f32.mrf.mxu3 }
0x108c   :  { %v1367_v58 = vrot.slane %v1343_v8, 4  ;;  %v1389_v7 = vadd.f32 %v2763_v2, %v1363_v28 }
0x108e   :  { %v1369_v0 = vadd.f32 %v1367_v58, %v1319_v63  ;;  %v1391_v35 = vrot.slane %v1389_v7, 4  ;;  %v1503_v63 = vld [vmem:[#allocation3 + $0x10] sm:$0x3] }
0x1090   :  { %v2000_v15 = vmul.f32 -1.442695, %v1369_v0 }
0x1092   :  { %2097 = vpow2.f32 %v2000_v15 }
0x1098   :  { %v2098_v19 = vpop.eup %2097 }
0x1099   :  { %v1373_v24 = vadd.f32 1.0, %v2098_v19 }
0x109b   :  { %2099 = vrcp.f32 %v1373_v24  ;;  %v1385_v30 = vand.u32 2147483648, %v1373_v24  ;;  %v1383_v32 = vand.u32 2147483647, %v1373_v24  ;;  %vm1379_vm6 = vweird.f32 %v1373_v24 }
0x109d   :  { %v1386_v33 = vor.u32 1.1754944e-38, %v1385_v30  ;;  %vm1384_vm3 = vcmp.eq.f32.partialorder %v1383_v32, 8.507059e+37 }
0x10a1   :  { %v2100_v25 = vpop.eup %2099 }
0x10a2   :  { %v1375_v27 = vmul.f32 %v2100_v25, %v1373_v24  ;;  %vm1380_vm4 = vweird.f32 %v2100_v25 }
0x10a3   :  { %vm1381_vm2 = vmor %vm1379_vm6, %vm1380_vm4 }
0x10a4   :  { %v1376_v29 = vsub.f32 1.0, %v1375_v27 }
0x10a6   :  { %v1377_v31 = vmul.f32 %v2100_v25, %v1376_v29 }
0x10a8   :  { %v1378_v11 = vadd.f32 %v2100_v25, %v1377_v31 }
0x10aa   :  { %v1382_v34 = vsel %vm1381_vm2, %v2100_v25, %v1378_v11 }
0x10ab   :  { %v1387_v36 = vsel %vm1384_vm3, %v1386_v33, %v1382_v34 }
0x10ac   :  { %v1393_v37 = vmul.f32 %v1391_v35, %v1387_v36  ;;  %v1396_v41 = vsub.f32 1.0, %v1387_v36  ;;  %v1404_v44 = vmul.f32 %v1402_v42, %v1387_v36 }
0x10ae   :  { %v1394_v39 = vadd.f32 %v1393_v37, %v1320_v38  ;;  %v1504_v38 = vld [vmem:[#allocation3 + $0x18] sm:$0x3] }
0x10b0   :  { %2101 = vtanh.f32 %v1394_v39 }
0x10b6   :  { %v2102_v40 = vpop.eup %2101 }
0x10b7   :  { %1398 = vrot.lane.b32.xlu0 %v2102_v40, %s2276_s4 }
0x1129   :  { %v1399_v43 = vpop.permute.xlu0 %1398 }
0x112a   :  { %v1401_v45 = vmul.f32 %v1399_v43, %v1396_v41 }
0x112c   :  { %v2814_v46 = vadd.f32 %v1404_v44, %v1401_v45 }
0x112e   :  { %v1413_v47 = vrot.slane %v2814_v46, 4  ;;  %v1494_v1 = vrot.slane %v2814_v46, 6 }
0x1130   :  { %1414 = vrot.lane.b32.xlu1 %v1413_v47, %s2276_s4 }
0x11a2   :  { %v1415_v26 = vpop.permute.xlu1 %1414 }
0x11a3   :  { %2001 = vmatmul.msk.f32.vlgmr.msrb.gmra.mxu0 %vm224_vm5, %v1415_v26  ;;  %2002 = vmatmul.msk.f32.vlgmr.msrb.gmra.mxu1 %vm224_vm5, %v1415_v26 }
0x11a4   :  { %1784 = vmatpush.msrb.mxu0 %v2625_v23  ;;  %1804 = vmatpush.msrb.mxu1 %v2655_v10 }
0x11a6   :  { %1785 = vmatpush.msrb.mxu0 %v2627_v14  ;;  %1805 = vmatpush.msrb.mxu1 %v2657_v22 }
0x11a8   :  { %1786 = vmatpush.msrb.mxu0 %v2630_v16  ;;  %1806 = vmatpush.msrb.mxu1 %v2662_v59  ;;  %v1411_v16 = vld [vmem:[#allocation3] sm:$0xc0] }
0x11aa   :  { %1787 = vmatpush.msrb.mxu0 %v2634_v17  ;;  %1807 = vmatpush.msrb.mxu1 %v2668_v60 }
0x11ac   :  { %1788 = vmatpush.msrb.mxu0 %v2639_v9  ;;  %1808 = vmatpush.msrb.mxu1 %v2672_v61 }
0x11ae   :  { %1789 = vmatpush.msrb.mxu0 %v2642_v18  ;;  %1809 = vmatpush.msrb.mxu1 %v2676_v62 }
0x11b0   :  { %1790 = vmatpush.msrb.mxu0 %v2646_v21  ;;  %1810 = vmatpush.msrb.mxu1 %v2680_v6 }
0x11b2   :  { %1791 = vmatpush.msrb.mxu0 %v2650_v55  ;;  %1811 = vmatpush.msrb.mxu1 %v2685_v20 }
0x1220   :  { %v1435_v23 = vpop.f32.mrf.mxu0  ;;  %v1455_v60 = vpop.f32.mrf.mxu1 }
0x1221   :  { %v1459_v14 = vrot.slane %v1435_v23, 2  ;;  %v1481_v55 = vadd.f32 %v2763_v2, %v1455_v60 }
0x1223   :  { %v1461_v17 = vadd.f32 %v1459_v14, %v1411_v16  ;;  %v1483_v50 = vrot.slane %v1481_v55, 2  ;;  %v1588_v14 = vld [vmem:[#allocation3 + $0x10] sm:$0xc] }
0x1225   :  { %v2003_v10 = vmul.f32 -1.442695, %v1461_v17 }
0x1227   :  { %2103 = vpow2.f32 %v2003_v10 }
0x122d   :  { %v2104_v9 = vpop.eup %2103 }
0x122e   :  { %v1465_v22 = vadd.f32 1.0, %v2104_v9 }
0x1230   :  { %2105 = vrcp.f32 %v1465_v22  ;;  %v1477_v21 = vand.u32 2147483648, %v1465_v22  ;;  %v1475_v6 = vand.u32 2147483647, %v1465_v22  ;;  %vm1471_vm9 = vweird.f32 %v1465_v22 }
0x1232   :  { %v1478_v48 = vor.u32 1.1754944e-38, %v1477_v21  ;;  %vm1476_vm12 = vcmp.eq.f32.partialorder %v1475_v6, 8.507059e+37 }
0x1236   :  { %v2106_v18 = vpop.eup %2105 }
0x1237   :  { %v1467_v59 = vmul.f32 %v2106_v18, %v1465_v22  ;;  %vm1472_vm8 = vweird.f32 %v2106_v18 }
0x1238   :  { %vm1473_vm11 = vmor %vm1471_vm9, %vm1472_vm8 }
0x1239   :  { %v1468_v61 = vsub.f32 1.0, %v1467_v59 }
0x123b   :  { %v1469_v62 = vmul.f32 %v2106_v18, %v1468_v61 }
0x123d   :  { %v1470_v20 = vadd.f32 %v2106_v18, %v1469_v62 }
0x123f   :  { %v1474_v49 = vsel %vm1473_vm11, %v2106_v18, %v1470_v20 }
0x1240   :  { %v1479_v51 = vsel %vm1476_vm12, %v1478_v48, %v1474_v49 }
0x1241   :  { %v1485_v52 = vmul.f32 %v1483_v50, %v1479_v51  ;;  %v1488_v57 = vsub.f32 1.0, %v1479_v51  ;;  %v1496_v4 = vmul.f32 %v1494_v1, %v1479_v51 }
0x1243   :  { %v1486_v54 = vadd.f32 %v1485_v52, %v1412_v53 }
0x1245   :  { %2107 = vtanh.f32 %v1486_v54  ;;  %v1589_v54 = vld [vmem:[#allocation3 + $0x18] sm:$0xc] }
0x124b   :  { %v2108_v56 = vpop.eup %2107 }
0x124c   :  { %1490 = vrot.lane.b32.xlu2 %v2108_v56, %s2276_s4 }
0x12a6   :  { %v1491_v3 = vpop.permute.xlu2 %1490 }
0x12a7   :  { %v1493_v5 = vmul.f32 %v1491_v3, %v1488_v57 }
0x12a9   :  { %v2839_v13 = vadd.f32 %v1496_v4, %v1493_v5 }
0x12ab   :  { %v1505_v8 = vrot.slane %v2839_v13, 6 }
0x12ad   :  { %1506 = vrot.lane.b32.xlu0 %v1505_v8, %s2276_s4 }
0x131f   :  { %v1507_v58 = vpop.permute.xlu0 %1506 }
0x1320   :  { %2004 = vmatmul.msk.f32.vlgmr.msrb.gmra.mxu2 %vm224_vm5, %v1507_v58  ;;  %2005 = vmatmul.msk.f32.vlgmr.msrb.gmra.mxu3 %vm224_vm5, %v1507_v58 }
0x13a3   :  { %v1527_v0 = vpop.f32.mrf.mxu2  ;;  %v1547_v7 = vpop.f32.mrf.mxu3 }
0x13a4   :  { %v1550_v15 = vadd.f32 %v1527_v0, %v1503_v63  ;;  %v1570_v35 = vadd.f32 %v2763_v2, %v1547_v7 }
0x13a6   :  { %v2006_v19 = vmul.f32 -1.442695, %v1550_v15  ;;  %v1677_v15 = vld [vmem:[#allocation3 + $0x10] sm:$0x30] }
0x13a8   :  { %2109 = vpow2.f32 %v2006_v19 }
0x13ae   :  { %v2110_v24 = vpop.eup %2109 }
0x13af   :  { %v1554_v25 = vadd.f32 1.0, %v2110_v24 }
0x13b1   :  { %2111 = vrcp.f32 %v1554_v25  ;;  %v1566_v30 = vand.u32 2147483648, %v1554_v25  ;;  %v1564_v32 = vand.u32 2147483647, %v1554_v25  ;;  %vm1560_vm0 = vweird.f32 %v1554_v25 }
0x13b3   :  { %v1567_v33 = vor.u32 1.1754944e-38, %v1566_v30  ;;  %vm1565_vm6 = vcmp.eq.f32.partialorder %v1564_v32, 8.507059e+37 }
0x13b7   :  { %v2112_v27 = vpop.eup %2111 }
0x13b8   :  { %v1556_v28 = vmul.f32 %v2112_v27, %v1554_v25  ;;  %vm1561_vm15 = vweird.f32 %v2112_v27 }
0x13b9   :  { %vm1562_vm4 = vmor %vm1560_vm0, %vm1561_vm15 }
0x13ba   :  { %v1557_v29 = vsub.f32 1.0, %v1556_v28 }
0x13bc   :  { %v1558_v31 = vmul.f32 %v2112_v27, %v1557_v29 }
0x13be   :  { %v1559_v11 = vadd.f32 %v2112_v27, %v1558_v31 }
0x13c0   :  { %v1563_v34 = vsel %vm1562_vm4, %v2112_v27, %v1559_v11 }
0x13c1   :  { %v1568_v36 = vsel %vm1565_vm6, %v1567_v33, %v1563_v34  ;;  %vm1926_vm6 = vcmask 785408  }
0x13c2   :  { %v1571_v37 = vmul.f32 %v1570_v35, %v1568_v36  ;;  %v1574_v41 = vsub.f32 1.0, %v1568_v36  ;;  %v1581_v43 = vmul.f32 %v1568_v36, %v1505_v8 }
0x13c4   :  { %v1572_v39 = vadd.f32 %v1571_v37, %v1504_v38 }
0x13c6   :  { %2113 = vtanh.f32 %v1572_v39 }
0x13cc   :  { %v2114_v40 = vpop.eup %2113 }
0x13cd   :  { %1576 = vrot.lane.b32.xlu1 %v2114_v40, %s2276_s4  ;;  %v1678_v40 = vld [vmem:[#allocation3 + $0x18] sm:$0x30] }
0x143f   :  { %v1577_v42 = vpop.permute.xlu1 %1576 }
0x1440   :  { %v1579_v44 = vmul.f32 %v1577_v42, %v1574_v41 }
0x1442   :  { %v1582_v45 = vadd.f32 %v1581_v43, %v1579_v44 }
0x1444   :  { %1584 = vrot.lane.b32.xlu2 %v1582_v45, %s2276_s4  ;;  %v1668_v48 = vrot.slane %v1582_v45, 6 }
0x149e   :  { %v1585_v47 = vpop.permute.xlu2 %1584 }
0x149f   :  { %1587 = vst.msk [vmem:[#allocation5 + $0x8] sm:$0x3] %vm329_vm10, %v1585_v47  ;;  %2007 = vmatmul.msk.f32.vlgmr.msra.gmra.mxu0 %vm224_vm5, %v1585_v47  ;;  %2008 = vmatmul.msk.f32.vlgmr.msra.gmra.mxu1 %vm224_vm5, %v1585_v47 }
0x151c   :  { %v1609_v26 = vpop.f32.mrf.mxu0  ;;  %v1629_v59 = vpop.f32.mrf.mxu1 }
0x151d   :  { %v1633_v23 = vrot.slane %v1609_v26, 6  ;;  %v1655_v6 = vadd.f32 %v2763_v2, %v1629_v59  ;;  %v1769_v59 = vld [vmem:[#allocation3 + $0x10] sm:$0xc0] }
0x151f   :  { %v1635_v16 = vadd.f32 %v1633_v23, %v1588_v14  ;;  %v1657_v50 = vrot.slane %v1655_v6, 6 }
0x1521   :  { %v2009_v17 = vmul.f32 -1.442695, %v1635_v16 }
0x1523   :  { %2115 = vpow2.f32 %v2009_v17 }
0x1529   :  { %v2116_v10 = vpop.eup %2115 }
0x152a   :  { %v1639_v9 = vadd.f32 1.0, %v2116_v10 }
0x152c   :  { %2117 = vrcp.f32 %v1639_v9  ;;  %v1651_v61 = vand.u32 2147483648, %v1639_v9  ;;  %v1649_v62 = vand.u32 2147483647, %v1639_v9  ;;  %vm1645_vm2 = vweird.f32 %v1639_v9 }
0x152e   :  { %v1652_v20 = vor.u32 1.1754944e-38, %v1651_v61  ;;  %vm1650_vm8 = vcmp.eq.f32.partialorder %v1649_v62, 8.507059e+37 }
0x1532   :  { %v2118_v22 = vpop.eup %2117 }
0x1533   :  { %v1641_v18 = vmul.f32 %v2118_v22, %v1639_v9  ;;  %vm1646_vm10 = vweird.f32 %v2118_v22 }
0x1534   :  { %vm1647_vm3 = vmor %vm1645_vm2, %vm1646_vm10  ;;  %vm1869_vm10 = vcmask 261126  }
0x1535   :  { %v1642_v60 = vsub.f32 1.0, %v1641_v18 }
0x1537   :  { %v1643_v21 = vmul.f32 %v2118_v22, %v1642_v60 }
0x1539   :  { %v1644_v55 = vadd.f32 %v2118_v22, %v1643_v21 }
0x153b   :  { %v1648_v49 = vsel %vm1647_vm3, %v2118_v22, %v1644_v55 }
0x153c   :  { %v1653_v51 = vsel %vm1650_vm8, %v1652_v20, %v1648_v49 }
0x153d   :  { %v1659_v52 = vmul.f32 %v1657_v50, %v1653_v51  ;;  %v1670_v53 = vmul.f32 %v1668_v48, %v1653_v51  ;;  %v1662_v1 = vsub.f32 1.0, %v1653_v51 }
0x153f   :  { %v1660_v56 = vadd.f32 %v1659_v52, %v1589_v54 }
0x1541   :  { %2119 = vtanh.f32 %v1660_v56 }
0x1547   :  { %v2120_v57 = vpop.eup %2119 }
0x1548   :  { %1664 = vrot.lane.b32.xlu0 %v2120_v57, %s2276_s4 }
0x15ba   :  { %v1665_v3 = vpop.permute.xlu0 %1664 }
0x15bb   :  { %v1667_v4 = vmul.f32 %v1665_v3, %v1662_v1 }
0x15bd   :  { %v1671_v5 = vadd.f32 %v1670_v53, %v1667_v4 }
0x15bf   :  { %v1679_v8 = vrot.slane %v1671_v5, 2  ;;  %v1760_v44 = vrot.slane %v1671_v5, 6 }
0x15c1   :  { %1680 = vrot.lane.b32.xlu1 %v1679_v8, %s2276_s4 }
0x1633   :  { %v1681_v58 = vpop.permute.xlu1 %1680 }
0x1634   :  { %2010 = vmatmul.msk.f32.vlgmr.msra.gmra.mxu2 %vm224_vm5, %v1681_v58  ;;  %2011 = vmatmul.msk.f32.vlgmr.msra.gmra.mxu3 %vm224_vm5, %v1681_v58 }
0x16b7   :  { %v1701_v63 = vpop.f32.mrf.mxu2  ;;  %v1721_v30 = vpop.f32.mrf.mxu3 }
0x16b8   :  { %v1725_v0 = vrot.slane %v1701_v63, 4  ;;  %v1747_v33 = vadd.f32 %v2763_v2, %v1721_v30 }
0x16ba   :  { %v1727_v19 = vadd.f32 %v1725_v0, %v1677_v15  ;;  %v1749_v37 = vrot.slane %v1747_v33, 4 }
0x16bc   :  { %v2012_v24 = vmul.f32 -1.442695, %v1727_v19 }
0x16be   :  { %2121 = vpow2.f32 %v2012_v24 }
0x16c4   :  { %v2122_v25 = vpop.eup %2121 }
0x16c5   :  { %v1731_v27 = vadd.f32 1.0, %v2122_v25 }
0x16c7   :  { %2123 = vrcp.f32 %v1731_v27  ;;  %v1743_v32 = vand.u32 2147483648, %v1731_v27  ;;  %v1741_v11 = vand.u32 2147483647, %v1731_v27  ;;  %vm1737_vm11 = vweird.f32 %v1731_v27 }
0x16c9   :  { %v1744_v35 = vor.u32 1.1754944e-38, %v1743_v32  ;;  %vm1742_vm15 = vcmp.eq.f32.partialorder %v1741_v11, 8.507059e+37 }
0x16cd   :  { %v2124_v28 = vpop.eup %2123 }
0x16ce   :  { %v1733_v29 = vmul.f32 %v2124_v28, %v1731_v27  ;;  %vm1738_vm9 = vweird.f32 %v2124_v28 }
0x16cf   :  { %vm1739_vm12 = vmor %vm1737_vm11, %vm1738_vm9 }
0x16d0   :  { %v1734_v31 = vsub.f32 1.0, %v1733_v29 }
0x16d2   :  { %v1735_v7 = vmul.f32 %v2124_v28, %v1734_v31 }
0x16d4   :  { %v1736_v34 = vadd.f32 %v2124_v28, %v1735_v7 }
0x16d6   :  { %v1740_v36 = vsel %vm1739_vm12, %v2124_v28, %v1736_v34 }
0x16d7   :  { %v1745_v38 = vsel %vm1742_vm15, %v1744_v35, %v1740_v36 }
0x16d8   :  { %v1751_v39 = vmul.f32 %v1749_v37, %v1745_v38  ;;  %v1754_v43 = vsub.f32 1.0, %v1745_v38  ;;  %v1762_v47 = vmul.f32 %v1760_v44, %v1745_v38 }
0x16da   :  { %v1752_v41 = vadd.f32 %v1751_v39, %v1678_v40 }
0x16dc   :  { %2125 = vtanh.f32 %v1752_v41 }
0x16e2   :  { %v2126_v42 = vpop.eup %2125 }
0x16e3   :  { %1756 = vrot.lane.b32.xlu2 %v2126_v42, %s2276_s4 }
0x16eb   :  { %1315 = vrot.lane.b32.xlu2 %v2789_v12, %s2276_s4 }
0x16f3   :  { %1673 = vrot.lane.b32.xlu2 %v1671_v5, %s2276_s4  ;;  %v1770_v5 = vld [vmem:[#allocation3 + $0x18] sm:$0xc0] }
0x173d   :  { %v1757_v45 = vpop.permute.xlu2 %1756 }
0x173e   :  { %v1759_v26 = vmul.f32 %v1757_v45, %v1754_v43 }
0x1740   :  { %v1763_v23 = vadd.f32 %v1762_v47, %v1759_v26 }
0x1742   :  { %v1771_v14 = vrot.slane %v1763_v23, 4  ;;  %v1852_v57 = vrot.slane %v1763_v23, 6 }
0x1744   :  { %1772 = vrot.lane.b32.xlu0 %v1771_v14, %s2276_s4 }
0x1745   :  { %v1316_v16 = vpop.permute.xlu2 %1315 }
0x1746   :  { %1318 = vst.msk [vmem:[#allocation5] sm:$0xc] %vm419_vm13, %v1316_v16 }
0x174c   :  { %1407 = vrot.lane.b32.xlu0 %v2814_v46, %s2276_s4 }
0x174d   :  { %v1674_v17 = vpop.permute.xlu2 %1673 }
0x174e   :  { %1676 = vst.msk [vmem:[#allocation5 + $0x8] sm:$0xc] %vm419_vm13, %v1674_v17 }
0x1754   :  { %1765 = vrot.lane.b32.xlu0 %v1763_v23, %s2276_s4 }
0x17b6   :  { %v1773_v12 = vpop.permute.xlu0 %1772 }
0x17b7   :  { %2013 = vmatmul.msk.f32.vlgmr.msrb.gmra.mxu0 %vm224_vm5, %v1773_v12  ;;  %2014 = vmatmul.msk.f32.vlgmr.msrb.gmra.mxu1 %vm224_vm5, %v1773_v12 }
0x17be   :  { %v1408_v10 = vpop.permute.xlu0 %1407 }
0x17bf   :  { %1410 = vst.msk [vmem:[#allocation5] sm:$0x30] %vm512_vm14, %v1408_v10 }
0x17c6   :  { %v1766_v9 = vpop.permute.xlu0 %1765 }
0x17c7   :  { %1768 = vst.msk [vmem:[#allocation5 + $0x8] sm:$0x30] %vm512_vm14, %v1766_v9 }
0x1834   :  { %v1793_v22 = vpop.f32.mrf.mxu0  ;;  %v1813_v55 = vpop.f32.mrf.mxu1 }
0x1835   :  { %v1817_v18 = vrot.slane %v1793_v22, 2  ;;  %v1839_v51 = vadd.f32 %v2763_v2, %v1813_v55 }
0x1837   :  { %v1819_v46 = vadd.f32 %v1817_v18, %v1769_v59  ;;  %v1841_v56 = vrot.slane %v1839_v51, 2 }
0x1839   :  { %v2015_v60 = vmul.f32 -1.442695, %v1819_v46 }
0x183b   :  { %2127 = vpow2.f32 %v2015_v60 }
0x1841   :  { %v2128_v61 = vpop.eup %2127 }
0x1842   :  { %v1823_v21 = vadd.f32 1.0, %v2128_v61 }
0x1844   :  { %2129 = vrcp.f32 %v1823_v21  ;;  %v1835_v48 = vand.u32 2147483648, %v1823_v21  ;;  %v1833_v50 = vand.u32 2147483647, %v1823_v21  ;;  %vm1829_vm14 = vweird.f32 %v1823_v21 }
0x1846   :  { %v1836_v53 = vor.u32 1.1754944e-38, %v1835_v48  ;;  %vm1834_vm4 = vcmp.eq.f32.partialorder %v1833_v50, 8.507059e+37 }
0x184a   :  { %v2130_v62 = vpop.eup %2129 }
0x184b   :  { %v1825_v6 = vmul.f32 %v2130_v62, %v1823_v21  ;;  %vm1830_vm13 = vweird.f32 %v2130_v62 }
0x184c   :  { %vm1831_vm0 = vmor %vm1829_vm14, %vm1830_vm13 }
0x184d   :  { %v1826_v20 = vsub.f32 1.0, %v1825_v6 }
0x184f   :  { %v1827_v49 = vmul.f32 %v2130_v62, %v1826_v20 }
0x1851   :  { %v1828_v52 = vadd.f32 %v2130_v62, %v1827_v49 }
0x1853   :  { %v1832_v54 = vsel %vm1831_vm0, %v2130_v62, %v1828_v52 }
0x1854   :  { %v1837_v1 = vsel %vm1834_vm4, %v1836_v53, %v1832_v54 }
0x1855   :  { %v1843_v3 = vmul.f32 %v1841_v56, %v1837_v1  ;;  %v1854_v4 = vmul.f32 %v1852_v57, %v1837_v1  ;;  %v1846_v2 = vsub.f32 1.0, %v1837_v1 }
0x1857   :  { %v1844_v8 = vadd.f32 %v1843_v3, %v1770_v5 }
0x1859   :  { %2131 = vtanh.f32 %v1844_v8 }
0x185f   :  { %v2132_v58 = vpop.eup %2131 }
0x1860   :  { %1848 = vrot.lane.b32.xlu1 %v2132_v58, %s2276_s4 }
0x1868   :  { %1499 = vrot.lane.b32.xlu1 %v2839_v13, %s2276_s4 }
0x18d2   :  { %v1849_v63 = vpop.permute.xlu1 %1848 }
0x18d3   :  { %v1851_v0 = vmul.f32 %v1849_v63, %v1846_v2 }
0x18d5   :  { %v1855_v15 = vadd.f32 %v1854_v4, %v1851_v0 }
0x18d7   :  { %1857 = vrot.lane.b32.xlu1 %v1855_v15, %s2276_s4 }
0x18da   :  { %v1500_v19 = vpop.permute.xlu1 %1499 }
0x18db   :  { %1502 = vst.msk [vmem:[#allocation5] sm:$0xc0] %vm605_vm7, %v1500_v19 }
0x18e2   :  { %v1871_v24 = vld [vmem:[#allocation5] sm:$0xff] }
0x18e3   :  { %v1890_v25 = vrot.slane %v1871_v24, 2  ;;  %v1885_v27 = vrot.slane %v1871_v24, 6 }
0x18e5   :  { %1891 = vrot.lane.b32.xlu2 %v1890_v25, %s2277_s9  ;;  %1886 = vrot.lane.b32.xlu0 %v1885_v27, %s2277_s9 }
0x18ed   :  { %1861 = vrot.lane.b32.xlu0 %v1855_v15, %s2277_s9 }
0x193f   :  { %v1892_v31 = vpop.permute.xlu2 %1891 }
0x1949   :  { %v1858_v13 = vpop.permute.xlu1 %1857 }
0x194a   :  { %1860 = vst.msk [vmem:[#allocation5 + $0x8] sm:$0xc0] %vm605_vm7, %v1858_v13  ;;  %vm1923_vm7 = vcmask 261120  }
0x1951   :  { %v1872_v28 = vld [vmem:[#allocation5 + $0x8] sm:$0xff] }
0x1952   :  { %v1879_v29 = vrot.slane %v1872_v28, 2  ;;  %v1874_v30 = vrot.slane %v1872_v28, 6  ;;  %v1894_v32 = vadd.f32 %v1892_v31, %v1872_v28 }
0x1954   :  { %1880 = vrot.lane.b32.xlu1 %v1879_v29, %s2277_s9  ;;  %1875 = vrot.lane.b32.xlu2 %v1874_v30, %s2277_s9  ;;  %v1910_v34 = vrot.slane %v1894_v32, 2  ;;  %v1919_v35 = vrot.slane %v1894_v32, 6 }
0x1957   :  { %v1887_v7 = vpop.permute.xlu0 %1886 }
0x1958   :  { %v1889_v11 = vadd.f32 %v1887_v7, %v1872_v28 }
0x195a   :  { %v1915_v33 = vrot.slane %v1889_v11, 4 }
0x195c   :  { %1916 = vrot.lane.b32.xlu2 %v1915_v33, %s2276_s4  ;;  %1911 = vrot.lane.b32.xlu1 %v1910_v34, %s2278_s14 }
0x195f   :  { %v1862_v36 = vpop.permute.xlu0 %1861 }
0x1960   :  { %v1864_v37 = vadd.f32 %v1862_v36, %v1855_v15 }
0x1964   :  { %1920 = vrot.lane.b32.xlu1 %v1919_v35, %s2277_s9 }
0x196c   :  { %1866 = vrot.lane.b32.xlu1 %v1864_v37, %s2276_s4 }
0x19ae   :  { %v1876_v38 = vpop.permute.xlu2 %1875 }
0x19af   :  { %v1878_v39 = vadd.f32 %v1876_v38, %v1871_v24 }
0x19b1   :  { %v1901_v40 = vrot.slane %v1878_v39, 4 }
0x19b3   :  { %1902 = vrot.lane.b32.xlu2 %v1901_v40, %s2276_s4 }
0x19b6   :  { %v1917_v26 = vpop.permute.xlu2 %1916 }
0x19c6   :  { %v1881_v41 = vpop.permute.xlu1 %1880 }
0x19c7   :  { %v1883_v42 = vadd.f32 %v1881_v41, %v1871_v24 }
0x19c9   :  { %v1896_v43 = vrot.slane %v1883_v42, 2  ;;  %v1905_v45 = vrot.slane %v1883_v42, 6 }
0x19cb   :  { %1897 = vrot.lane.b32.xlu0 %v1896_v43, %s2278_s14 }
0x19ce   :  { %v1912_v44 = vpop.permute.xlu1 %1911 }
0x19cf   :  { %v1928_v47 = vsel %vm1923_vm7, %v1889_v11, %v1912_v44 }
0x19d0   :  { %v1929_v14 = vsel %vm224_vm5, %v1928_v47, %v1917_v26 }
0x19d3   :  { %1906 = vrot.lane.b32.xlu0 %v1905_v45, %s2277_s9 }
0x19d6   :  { %v1921_v23 = vpop.permute.xlu1 %1920 }
0x19d7   :  { %v1930_v16 = vsel %vm1926_vm6, %v1929_v14, %v1921_v23 }
0x19d8   :  { %v1933_v22 = vrot.slane %v1930_v16, 6 }
0x19de   :  { %v1867_v17 = vpop.permute.xlu1 %1866 }
0x19df   :  { %1870 = vst.msk [vmem:[#allocation14 - $0x6] sm:$0xc0] %vm1869_vm10, %v1867_v17 }
0x19e0   :  { %1949 = dma.vmem_to_hbm [thread:$0]  %s1945_s16, 32, %s1947_s6, [#allocation8]  }
0x1a0d   :  { %v1903_v9 = vpop.permute.xlu2 %1902 }
0x1a3d   :  { %v1898_v12 = vpop.permute.xlu0 %1897 }
0x1a3e   :  { %v1924_v10 = vsel %vm1923_vm7, %v1878_v39, %v1898_v12 }
0x1a3f   :  { %v1925_v59 = vsel %vm224_vm5, %v1924_v10, %v1903_v9 }
0x1a45   :  { %v1907_v18 = vpop.permute.xlu0 %1906 }
0x1a46   :  { %v1927_v46 = vsel %vm1926_vm6, %v1925_v59, %v1907_v18 }
0x1a47   :  { %v1934_v60 = vsel %vm153_vm1, %v1927_v46, %v1933_v22 }
0x1a48   :  { %1936 = vst [vmem:[%s2911_s10] sm:$0xf] %v1934_v60 }
0x1a49   :  { %2259 = dma.done.wait [#allocation8], 32  }
0x1a4a   :  { %2260 = vsyncadd [#allocation8], 4294967264 }
0x1a4b   :  { %1956 = vsyncpa [#allocation7], 1 }
0x1a4c   :  { %1957 = vsyncpa [#allocation10], 1 }
0x1a4d   :  { %1958 = vsyncpa [#allocation13], 1 }
0x1a4e   :  { %1959 = vsyncpa [#allocation8], 1 }

</bundles_post_ra>
